<compile_context>
chip_gen: v5e
topology: v5e:2x2
jax: 0.10.0
libtpu: 0.0.40
codegen_flags: <defaults>
</compile_context>

<pallas_src>
import functools

import jax
import jax.numpy as jnp
from jax.experimental import pallas as pl
from jax.experimental.pallas import tpu as pltpu

# ----------------------------- model hyper-params -----------------------------
D_MODEL = 32
NHEAD = 4
DIM_FF = 64
NUM_LAYERS = 2
T_LEN = 8     # tgt sequence length
S_LEN = 8     # memory sequence length
BATCH = 2
EPS = 1e-5
NEG_INF = -1e30            # large finite negative (replaces the -inf additive mask)
MM_DTYPE = jnp.bfloat16    # MXU operand dtype (accumulation stays f32); jnp.float32 to disable
APPROX_RECIP = True        # pl.reciprocal approx flag for the softmax denominator


# ----------------------------- fused decoder kernel ----------------------------
def fused_decoder_kernel(*refs, nhead, t_len, s_len, has_final_norm, return_hidden):
    it = iter(refs)
    x_ref = next(it)         # (B*T, D)
    mem_ref = next(it)       # (B*S, D)
    attn_w_ref = next(it)    # (L, 2, D, 4D)  bf16  [Wq^T | Wk^T | Wv^T | Wo^T]
    attn_b_ref = next(it)    # (L, 2, 4D)     f32   [bq ; bk ; bv ; bo]
    ffn_w1_ref = next(it)    # (L, D, FF)     bf16
    ffn_w2_ref = next(it)    # (L, FF, D)     bf16
    ffn_b1_ref = next(it)    # (L, FF)        f32
    ffn_b2_ref = next(it)    # (L, D)         f32
    ln_ref = next(it)        # (L, 6, D)      f32
    final_ln_ref = next(it) if has_final_norm else None   # (2, D) f32
    out_ref = next(it)       # (B*T, D)
    hid_ref = next(it) if return_hidden else None          # (L, B*T, D)

    num_layers = attn_w_ref.shape[0]
    bt, d = x_ref.shape
    bs = mem_ref.shape[0]
    batch = bt // t_len
    hd = d // nhead

    x = x_ref[...].astype(jnp.float32)
    mem = mem_ref[...].astype(jnp.float32)

    # ---------- constants hoisted above the layer loop ----------
    # Block-diagonal(+causal) additive biases, built from comparisons only (no div/mod).
    r_s = jax.lax.broadcasted_iota(jnp.int32, (bt, bt), 0)
    c_s = jax.lax.broadcasted_iota(jnp.int32, (bt, bt), 1)
    r_x = jax.lax.broadcasted_iota(jnp.int32, (bt, bs), 0)
    c_x = jax.lax.broadcasted_iota(jnp.int32, (bt, bs), 1)
    same_b_self = None
    same_b_cross = None
    for b_i in range(batch):
        rs_in = (r_s >= b_i * t_len) & (r_s < (b_i + 1) * t_len)
        cs_in = (c_s >= b_i * t_len) & (c_s < (b_i + 1) * t_len)
        blk_s = rs_in & cs_in
        rx_in = (r_x >= b_i * t_len) & (r_x < (b_i + 1) * t_len)
        cx_in = (c_x >= b_i * s_len) & (c_x < (b_i + 1) * s_len)
        blk_x = rx_in & cx_in
        same_b_self = blk_s if same_b_self is None else (same_b_self | blk_s)
        same_b_cross = blk_x if same_b_cross is None else (same_b_cross | blk_x)
    # within the same batch block, causal <=> column index <= row index
    self_bias = jnp.where(same_b_self & (c_s <= r_s), 0.0, NEG_INF).astype(jnp.float32)
    cross_bias = jnp.where(same_b_cross, 0.0, NEG_INF).astype(jnp.float32)

    # Per-head lane masks; the 1/sqrt(hd) scale is folded into the q mask so each
    # head's scores come from a full-width (K=D) masked matmul (no lane slicing).
    lane = jax.lax.broadcasted_iota(jnp.int32, (1, d), 1)
    scale = 1.0 / (hd ** 0.5)
    q_masks, v_masks = [], []
    for h in range(nhead):
        in_h = (lane >= h * hd) & (lane < (h + 1) * hd)
        q_masks.append(jnp.where(in_h, scale, 0.0).astype(jnp.float32))
        v_masks.append(jnp.where(in_h, 1.0, 0.0).astype(jnp.float32))

    # ones columns used to push last-dim sums onto the MXU
    ones_d = jnp.ones((d, 1), jnp.float32)
    ones_k_self = jnp.ones((bt, 1), jnp.float32)
    ones_k_cross = jnp.ones((bs, 1), jnp.float32)
    inv_d = 1.0 / d

    def layernorm(v, g, b_):
        # mean / E[(x-mu)^2] as MXU dots with a ones column (exact sums).
        mu = jnp.dot(v, ones_d, preferred_element_type=jnp.float32) * inv_d
        vc = v - mu
        var = jnp.dot(vc * vc, ones_d, preferred_element_type=jnp.float32) * inv_d
        return vc * jax.lax.rsqrt(var + EPS) * g + b_

    def attention(q, k, v, bias, ones_k):
        """q:(R,D) k,v:(Rk,D) f32; returns concatenated multi-head output (R,D) f32."""
        k_b = k.astype(MM_DTYPE)
        o = None
        for qm, vm in zip(q_masks, v_masks):
            qh = (q * qm).astype(MM_DTYPE)                      # head-masked, pre-scaled q
            s = jax.lax.dot_general(qh, k_b, (((1,), (1,)), ((), ())),
                                    preferred_element_type=jnp.float32)
            s = s + bias
            s = s - jnp.max(s, axis=-1, keepdims=True)          # row-max stays on the XLU
            p = jnp.exp(s)
            l_sum = jnp.dot(p, ones_k, preferred_element_type=jnp.float32)  # MXU row-sum
            vh = (v * vm).astype(MM_DTYPE)                      # head-masked v
            oh = jnp.dot(p.astype(MM_DTYPE), vh, preferred_element_type=jnp.float32)
            oh = oh * pl.reciprocal(l_sum, approx=APPROX_RECIP)
            o = oh if o is None else o + oh                     # heads land pre-"concatenated"
        return o

    for l in range(num_layers):                                 # static unrolled layer loop
        # --- causal self-attention block (post-norm) ---
        w_slab = attn_w_ref[l, 0]                               # (D, 4D) bf16
        b_slab = attn_b_ref[l, 0]                               # (4D,) f32
        qkv = jnp.dot(x.astype(MM_DTYPE), w_slab[:, :3 * d],
                      preferred_element_type=jnp.float32) + b_slab[:3 * d]
        q, k, v = qkv[:, :d], qkv[:, d:2 * d], qkv[:, 2 * d:]
        sa = attention(q, k, v, self_bias, ones_k_self)
        sa = jnp.dot(sa.astype(MM_DTYPE), w_slab[:, 3 * d:],
                     preferred_element_type=jnp.float32) + b_slab[3 * d:]
        x = layernorm(x + sa, ln_ref[l, 0], ln_ref[l, 1])

        # --- cross-attention block ---
        w_slab = attn_w_ref[l, 1]
        b_slab = attn_b_ref[l, 1]
        q2 = jnp.dot(x.astype(MM_DTYPE), w_slab[:, :d],
                     preferred_element_type=jnp.float32) + b_slab[:d]
        kv = jnp.dot(mem.astype(MM_DTYPE), w_slab[:, d:3 * d],
                     preferred_element_type=jnp.float32) + b_slab[d:3 * d]
        k2, v2 = kv[:, :d], kv[:, d:]
        ca = attention(q2, k2, v2, cross_bias, ones_k_cross)
        ca = jnp.dot(ca.astype(MM_DTYPE), w_slab[:, 3 * d:],
                     preferred_element_type=jnp.float32) + b_slab[3 * d:]
        x = layernorm(x + ca, ln_ref[l, 2], ln_ref[l, 3])

        # --- feed-forward block (ReLU) ---
        h1 = jnp.dot(x.astype(MM_DTYPE), ffn_w1_ref[l],
                     preferred_element_type=jnp.float32) + ffn_b1_ref[l]
        h1 = jnp.maximum(h1, 0.0)
        ff = jnp.dot(h1.astype(MM_DTYPE), ffn_w2_ref[l],
                     preferred_element_type=jnp.float32) + ffn_b2_ref[l]
        x = layernorm(x + ff, ln_ref[l, 4], ln_ref[l, 5])

        if hid_ref is not None:
            hid_ref[l] = x.astype(hid_ref.dtype)

    if has_final_norm:
        fl = final_ln_ref[...]
        x = layernorm(x, fl[0], fl[1])
    out_ref[...] = x.astype(out_ref.dtype)


# ----------------------------- parameter packing --------------------------------
def pack_params(layers_params):
    """Stack per-layer PyTorch-style parameters into lane-dense (in, out) slabs."""
    attn_w, attn_b, ffn_w1, ffn_w2, ffn_b1, ffn_b2, ln_p = [], [], [], [], [], [], []
    for (sa_w, sa_b, sa_ow, sa_ob, ca_w, ca_b, ca_ow, ca_ob,
         ln1_w, ln1_b, ln2_w, ln2_b, ln3_w, ln3_b,
         ff1_w, ff1_b, ff2_w, ff2_b) in layers_params:
        # (in, out) order: transpose the PyTorch (out, in) weights once at pack time.
        attn_w.append(jnp.stack([jnp.concatenate([sa_w.T, sa_ow.T], axis=1),
                                 jnp.concatenate([ca_w.T, ca_ow.T], axis=1)]))   # (2, D, 4D)
        attn_b.append(jnp.stack([jnp.concatenate([sa_b, sa_ob]),
                                 jnp.concatenate([ca_b, ca_ob])]))               # (2, 4D)
        ffn_w1.append(ff1_w.T)                                                   # (D, FF)
        ffn_w2.append(ff2_w.T)                                                   # (FF, D)
        ffn_b1.append(ff1_b)
        ffn_b2.append(ff2_b)
        ln_p.append(jnp.stack([ln1_w, ln1_b, ln2_w, ln2_b, ln3_w, ln3_b]))       # (6, D)
    return (jnp.stack(attn_w).astype(MM_DTYPE),
            jnp.stack(attn_b).astype(jnp.float32),
            jnp.stack(ffn_w1).astype(MM_DTYPE),
            jnp.stack(ffn_w2).astype(MM_DTYPE),
            jnp.stack(ffn_b1).astype(jnp.float32),
            jnp.stack(ffn_b2).astype(jnp.float32),
            jnp.stack(ln_p).astype(jnp.float32))


# ----------------------------- full decoder forward -----------------------------
def custom_transformer_decoder_forward(tgt_tbd, mem_sbd, layers_params, norm_params,
                                       return_hidden_outputs=False):
    """tgt: (T, B, D), memory: (S, B, D) — PyTorch batch_first=False layout.

    Causal tgt masking (tgt_is_causal) is generated inside the kernel.
    """
    T, B, D = tgt_tbd.shape
    S = mem_sbd.shape[0]
    # flatten to lane-dense row blocks: (B*T, D) / (B*S, D)
    x2d = jnp.transpose(tgt_tbd, (1, 0, 2)).reshape(B * T, D)
    mem2d = jnp.transpose(mem_sbd, (1, 0, 2)).reshape(B * S, D)

    packed = pack_params(layers_params)
    L = packed[0].shape[0]
    has_final_norm = norm_params is not None

    inputs = [x2d, mem2d, *packed]
    if has_final_norm:
        inputs.append(jnp.stack([norm_params[0], norm_params[1]]).astype(jnp.float32))

    out_shape = [jax.ShapeDtypeStruct((B * T, D), tgt_tbd.dtype)]
    if return_hidden_outputs:
        out_shape.append(jax.ShapeDtypeStruct((L, B * T, D), tgt_tbd.dtype))
    out_shape = tuple(out_shape)

    vmem = pl.BlockSpec(memory_space=pltpu.MemorySpace.VMEM)
    kernel = functools.partial(fused_decoder_kernel, nhead=NHEAD, t_len=T, s_len=S,
                               has_final_norm=has_final_norm,
                               return_hidden=return_hidden_outputs)
    results = pl.pallas_call(
        kernel,
        out_shape=out_shape,
        in_specs=[vmem] * len(inputs),
        out_specs=tuple(vmem for _ in out_shape),
    )(*inputs)

    out = results[0].reshape(B, T, D).transpose(1, 0, 2)      # back to (T, B, D)
    hidden = []
    if return_hidden_outputs:
        hid = results[1].reshape(L, B, T, D)
        hidden = [jnp.transpose(hid[i], (1, 0, 2)) for i in range(L)]
    return out, hidden


# ----------------------------- parameter construction ----------------------------
def init_layer_params(key, d_model, dim_ff):
    ks = jax.random.split(key, 8)
    scale = 0.05
    sa_w = jax.random.normal(ks[0], (3 * d_model, d_model), jnp.float32) * scale
    sa_b = jnp.zeros((3 * d_model,), jnp.float32)
    sa_ow = jax.random.normal(ks[1], (d_model, d_model), jnp.float32) * scale
    sa_ob = jnp.zeros((d_model,), jnp.float32)
    ca_w = jax.random.normal(ks[2], (3 * d_model, d_model), jnp.float32) * scale
    ca_b = jnp.zeros((3 * d_model,), jnp.float32)
    ca_ow = jax.random.normal(ks[3], (d_model, d_model), jnp.float32) * scale
    ca_ob = jnp.zeros((d_model,), jnp.float32)
    ln1_w = jnp.ones((d_model,), jnp.float32)
    ln1_b = jnp.zeros((d_model,), jnp.float32)
    ln2_w = jnp.ones((d_model,), jnp.float32)
    ln2_b = jnp.zeros((d_model,), jnp.float32)
    ln3_w = jnp.ones((d_model,), jnp.float32)
    ln3_b = jnp.zeros((d_model,), jnp.float32)
    ff1_w = jax.random.normal(ks[4], (dim_ff, d_model), jnp.float32) * scale
    ff1_b = jnp.zeros((dim_ff,), jnp.float32)
    ff2_w = jax.random.normal(ks[5], (d_model, dim_ff), jnp.float32) * scale
    ff2_b = jnp.zeros((d_model,), jnp.float32)
    return (sa_w, sa_b, sa_ow, sa_ob,
            ca_w, ca_b, ca_ow, ca_ob,
            ln1_w, ln1_b, ln2_w, ln2_b, ln3_w, ln3_b,
            ff1_w, ff1_b, ff2_w, ff2_b)


# ----------------------------- pure-JAX reference (sanity) -----------------------
def reference_forward(tgt, memory, layers_params, norm_params):
    x = jnp.transpose(tgt, (1, 0, 2)).astype(jnp.float32)
    mem = jnp.transpose(memory, (1, 0, 2)).astype(jnp.float32)
    T = x.shape[1]
    mask = jnp.where(jnp.arange(T)[None, :] > jnp.arange(T)[:, None],
                     -jnp.inf, 0.0).astype(jnp.float32)

    def ln(v, g, b):
        mu = v.mean(-1, keepdims=True)
        var = ((v - mu) ** 2).mean(-1, keepdims=True)
        return (v - mu) / jnp.sqrt(var + EPS) * g + b

    def mha(qi, kvi, in_w, in_b, ow, ob, msk):
        d = qi.shape[-1]
        hd = d // NHEAD
        q = qi @ in_w[:d].T + in_b[:d]
        k = kvi @ in_w[d:2 * d].T + in_b[d:2 * d]
        v = kvi @ in_w[2 * d:].T + in_b[2 * d:]
        B_, Tq, _ = q.shape
        S_ = k.shape[1]
        q = q.reshape(B_, Tq, NHEAD, hd).transpose(0, 2, 1, 3)
        k = k.reshape(B_, S_, NHEAD, hd).transpose(0, 2, 1, 3)
        v = v.reshape(B_, S_, NHEAD, hd).transpose(0, 2, 1, 3)
        s = (q @ k.transpose(0, 1, 3, 2)) / jnp.sqrt(jnp.float32(hd))
        if msk is not None:
            s = s + msk
        p = jax.nn.softmax(s, axis=-1)
        o = (p @ v).transpose(0, 2, 1, 3).reshape(B_, Tq, d)
        return o @ ow.T + ob

    for (sa_w, sa_b, sa_ow, sa_ob, ca_w, ca_b, ca_ow, ca_ob,
         ln1_w, ln1_b, ln2_w, ln2_b, ln3_w, ln3_b,
         ff1_w, ff1_b, ff2_w, ff2_b) in layers_params:
        x = ln(x + mha(x, x, sa_w, sa_b, sa_ow, sa_ob, mask), ln1_w, ln1_b)
        x = ln(x + mha(x, mem, ca_w, ca_b, ca_ow, ca_ob, None), ln2_w, ln2_b)
        h = jnp.maximum(x @ ff1_w.T + ff1_b, 0.0)
        x = ln(x + (h @ ff2_w.T + ff2_b), ln3_w, ln3_b)
    if norm_params is not None:
        x = ln(x, norm_params[0], norm_params[1])
    return jnp.transpose(x, (1, 0, 2))


# ----------------------------------- main ---------------------------------------
if __name__ == "__main__":
    key = jax.random.PRNGKey(0)
    k_tgt, k_mem, k_layers = jax.random.split(key, 3)

    # inputs in PyTorch layout (seq, batch, d_model)
    tgt = jax.random.normal(k_tgt, (T_LEN, BATCH, D_MODEL), jnp.float32)
    memory = jax.random.normal(k_mem, (S_LEN, BATCH, D_MODEL), jnp.float32)

    layer_keys = jax.random.split(k_layers, NUM_LAYERS)
    layers_params = [init_layer_params(layer_keys[i], D_MODEL, DIM_FF)
                     for i in range(NUM_LAYERS)]
    final_norm_params = (jnp.ones((D_MODEL,), jnp.float32),
                         jnp.zeros((D_MODEL,), jnp.float32))

    out, hidden = custom_transformer_decoder_forward(
        tgt, memory, layers_params, final_norm_params,
        return_hidden_outputs=False)
    out = jax.block_until_ready(out)

    assert out.shape == (T_LEN, BATCH, D_MODEL)
    assert hidden == []
    assert bool(jnp.all(jnp.isfinite(out)))

    # sanity check against a pure-JAX (XLA, full-f32) implementation of the same math;
    # tolerance accounts for bf16 MXU operands + approx-reciprocal softmax.
    ref = reference_forward(tgt, memory, layers_params, final_norm_params)
    max_err = float(jnp.max(jnp.abs(out - ref)))
    assert bool(jnp.allclose(out, ref, atol=2e-2, rtol=2e-2)), max_err

    # exercise the return_hidden_outputs path: output must match and shapes must be right
    out2, hidden2 = custom_transformer_decoder_forward(
        tgt, memory, layers_params, final_norm_params,
        return_hidden_outputs=True)
    out2 = jax.block_until_ready(out2)
    assert len(hidden2) == NUM_LAYERS
    assert all(h.shape == (T_LEN, BATCH, D_MODEL) for h in hidden2)
    assert all(bool(jnp.all(jnp.isfinite(h))) for h in hidden2)
    assert bool(jnp.allclose(out2, out, atol=1e-5, rtol=1e-5))

    print("KERNEL_OK")
</pallas_src>

<mosaic_0001>
module attributes {stable_mosaic.version = 11 : i64} {
  func.func @fused_decoder_kernel(%arg0: memref<16x32xf32, #tpu.memory_space<vmem>>, %arg1: memref<16x32xf32, #tpu.memory_space<vmem>>, %arg2: memref<2x2x32x128xbf16, #tpu.memory_space<vmem>>, %arg3: memref<2x2x128xf32, #tpu.memory_space<vmem>>, %arg4: memref<2x32x64xbf16, #tpu.memory_space<vmem>>, %arg5: memref<2x64x32xbf16, #tpu.memory_space<vmem>>, %arg6: memref<2x64xf32, #tpu.memory_space<vmem>>, %arg7: memref<2x32xf32, #tpu.memory_space<vmem>>, %arg8: memref<2x6x32xf32, #tpu.memory_space<vmem>>, %arg9: memref<2x32xf32, #tpu.memory_space<vmem>>, %arg10: memref<16x32xf32, #tpu.memory_space<vmem>>) attributes {dimension_semantics = [], scalar_prefetch = 0 : i64, scratch_operands = 0 : i64, tpu.core_type = #tpu.core_type<tc>} {
    %c0 = arith.constant 0 : index
    %c0_0 = arith.constant 0 : index
    %0 = vector.load %arg0[%c0, %c0_0] : memref<16x32xf32, #tpu.memory_space<vmem>>, vector<16x32xf32>
    %c0_1 = arith.constant 0 : index
    %c0_2 = arith.constant 0 : index
    %1 = vector.load %arg1[%c0_1, %c0_2] : memref<16x32xf32, #tpu.memory_space<vmem>>, vector<16x32xf32>
    %2 = tpu.iota {dimensions = array<i32: 0>} : vector<16x16xi32>
    %3 = tpu.iota {dimensions = array<i32: 1>} : vector<16x16xi32>
    %4 = tpu.iota {dimensions = array<i32: 0>} : vector<16x16xi32>
    %5 = tpu.iota {dimensions = array<i32: 1>} : vector<16x16xi32>
    %c0_i32 = arith.constant 0 : i32
    %6 = vector.broadcast %c0_i32 : i32 to vector<16x16xi32>
    %7 = arith.cmpi sge, %2, %6 : vector<16x16xi32>
    %c8_i32 = arith.constant 8 : i32
    %8 = vector.broadcast %c8_i32 : i32 to vector<16x16xi32>
    %9 = arith.cmpi slt, %2, %8 : vector<16x16xi32>
    %10 = arith.andi %7, %9 : vector<16x16xi1>
    %c0_i32_3 = arith.constant 0 : i32
    %11 = vector.broadcast %c0_i32_3 : i32 to vector<16x16xi32>
    %12 = arith.cmpi sge, %3, %11 : vector<16x16xi32>
    %c8_i32_4 = arith.constant 8 : i32
    %13 = vector.broadcast %c8_i32_4 : i32 to vector<16x16xi32>
    %14 = arith.cmpi slt, %3, %13 : vector<16x16xi32>
    %15 = arith.andi %12, %14 : vector<16x16xi1>
    %16 = arith.andi %10, %15 : vector<16x16xi1>
    %c0_i32_5 = arith.constant 0 : i32
    %17 = vector.broadcast %c0_i32_5 : i32 to vector<16x16xi32>
    %18 = arith.cmpi sge, %4, %17 : vector<16x16xi32>
    %c8_i32_6 = arith.constant 8 : i32
    %19 = vector.broadcast %c8_i32_6 : i32 to vector<16x16xi32>
    %20 = arith.cmpi slt, %4, %19 : vector<16x16xi32>
    %21 = arith.andi %18, %20 : vector<16x16xi1>
    %c0_i32_7 = arith.constant 0 : i32
    %22 = vector.broadcast %c0_i32_7 : i32 to vector<16x16xi32>
    %23 = arith.cmpi sge, %5, %22 : vector<16x16xi32>
    %c8_i32_8 = arith.constant 8 : i32
    %24 = vector.broadcast %c8_i32_8 : i32 to vector<16x16xi32>
    %25 = arith.cmpi slt, %5, %24 : vector<16x16xi32>
    %26 = arith.andi %23, %25 : vector<16x16xi1>
    %27 = arith.andi %21, %26 : vector<16x16xi1>
    %c8_i32_9 = arith.constant 8 : i32
    %28 = vector.broadcast %c8_i32_9 : i32 to vector<16x16xi32>
    %29 = arith.cmpi sge, %2, %28 : vector<16x16xi32>
    %c16_i32 = arith.constant 16 : i32
    %30 = vector.broadcast %c16_i32 : i32 to vector<16x16xi32>
    %31 = arith.cmpi slt, %2, %30 : vector<16x16xi32>
    %32 = arith.andi %29, %31 : vector<16x16xi1>
    %c8_i32_10 = arith.constant 8 : i32
    %33 = vector.broadcast %c8_i32_10 : i32 to vector<16x16xi32>
    %34 = arith.cmpi sge, %3, %33 : vector<16x16xi32>
    %c16_i32_11 = arith.constant 16 : i32
    %35 = vector.broadcast %c16_i32_11 : i32 to vector<16x16xi32>
    %36 = arith.cmpi slt, %3, %35 : vector<16x16xi32>
    %37 = arith.andi %34, %36 : vector<16x16xi1>
    %38 = arith.andi %32, %37 : vector<16x16xi1>
    %c8_i32_12 = arith.constant 8 : i32
    %39 = vector.broadcast %c8_i32_12 : i32 to vector<16x16xi32>
    %40 = arith.cmpi sge, %4, %39 : vector<16x16xi32>
    %c16_i32_13 = arith.constant 16 : i32
    %41 = vector.broadcast %c16_i32_13 : i32 to vector<16x16xi32>
    %42 = arith.cmpi slt, %4, %41 : vector<16x16xi32>
    %43 = arith.andi %40, %42 : vector<16x16xi1>
    %c8_i32_14 = arith.constant 8 : i32
    %44 = vector.broadcast %c8_i32_14 : i32 to vector<16x16xi32>
    %45 = arith.cmpi sge, %5, %44 : vector<16x16xi32>
    %c16_i32_15 = arith.constant 16 : i32
    %46 = vector.broadcast %c16_i32_15 : i32 to vector<16x16xi32>
    %47 = arith.cmpi slt, %5, %46 : vector<16x16xi32>
    %48 = arith.andi %45, %47 : vector<16x16xi1>
    %49 = arith.andi %43, %48 : vector<16x16xi1>
    %50 = arith.ori %16, %38 : vector<16x16xi1>
    %51 = arith.ori %27, %49 : vector<16x16xi1>
    %52 = arith.cmpi sle, %3, %2 : vector<16x16xi32>
    %53 = arith.andi %50, %52 : vector<16x16xi1>
    %cst = arith.constant 0.000000e+00 : f32
    %cst_16 = arith.constant -1.000000e+30 : f32
    %54 = vector.broadcast %cst : f32 to vector<16x16xf32>
    %55 = vector.broadcast %cst_16 : f32 to vector<16x16xf32>
    %56 = arith.select %53, %54, %55 : vector<16x16xi1>, vector<16x16xf32>
    %cst_17 = arith.constant 0.000000e+00 : f32
    %cst_18 = arith.constant -1.000000e+30 : f32
    %57 = vector.broadcast %cst_17 : f32 to vector<16x16xf32>
    %58 = vector.broadcast %cst_18 : f32 to vector<16x16xf32>
    %59 = arith.select %51, %57, %58 : vector<16x16xi1>, vector<16x16xf32>
    %60 = tpu.iota {dimensions = array<i32: 1>} : vector<1x32xi32>
    %c0_i32_19 = arith.constant 0 : i32
    %61 = vector.broadcast %c0_i32_19 : i32 to vector<1x32xi32>
    %62 = arith.cmpi sge, %60, %61 : vector<1x32xi32>
    %c8_i32_20 = arith.constant 8 : i32
    %63 = vector.broadcast %c8_i32_20 : i32 to vector<1x32xi32>
    %64 = arith.cmpi slt, %60, %63 : vector<1x32xi32>
    %65 = arith.andi %62, %64 : vector<1x32xi1>
    %cst_21 = arith.constant 0.353553385 : f32
    %cst_22 = arith.constant 0.000000e+00 : f32
    %66 = vector.broadcast %cst_21 : f32 to vector<1x32xf32>
    %67 = vector.broadcast %cst_22 : f32 to vector<1x32xf32>
    %68 = arith.select %65, %66, %67 : vector<1x32xi1>, vector<1x32xf32>
    %cst_23 = arith.constant 1.000000e+00 : f32
    %cst_24 = arith.constant 0.000000e+00 : f32
    %69 = vector.broadcast %cst_23 : f32 to vector<1x32xf32>
    %70 = vector.broadcast %cst_24 : f32 to vector<1x32xf32>
    %71 = arith.select %65, %69, %70 : vector<1x32xi1>, vector<1x32xf32>
    %c8_i32_25 = arith.constant 8 : i32
    %72 = vector.broadcast %c8_i32_25 : i32 to vector<1x32xi32>
    %73 = arith.cmpi sge, %60, %72 : vector<1x32xi32>
    %c16_i32_26 = arith.constant 16 : i32
    %74 = vector.broadcast %c16_i32_26 : i32 to vector<1x32xi32>
    %75 = arith.cmpi slt, %60, %74 : vector<1x32xi32>
    %76 = arith.andi %73, %75 : vector<1x32xi1>
    %cst_27 = arith.constant 0.353553385 : f32
    %cst_28 = arith.constant 0.000000e+00 : f32
    %77 = vector.broadcast %cst_27 : f32 to vector<1x32xf32>
    %78 = vector.broadcast %cst_28 : f32 to vector<1x32xf32>
    %79 = arith.select %76, %77, %78 : vector<1x32xi1>, vector<1x32xf32>
    %cst_29 = arith.constant 1.000000e+00 : f32
    %cst_30 = arith.constant 0.000000e+00 : f32
    %80 = vector.broadcast %cst_29 : f32 to vector<1x32xf32>
    %81 = vector.broadcast %cst_30 : f32 to vector<1x32xf32>
    %82 = arith.select %76, %80, %81 : vector<1x32xi1>, vector<1x32xf32>
    %c16_i32_31 = arith.constant 16 : i32
    %83 = vector.broadcast %c16_i32_31 : i32 to vector<1x32xi32>
    %84 = arith.cmpi sge, %60, %83 : vector<1x32xi32>
    %c24_i32 = arith.constant 24 : i32
    %85 = vector.broadcast %c24_i32 : i32 to vector<1x32xi32>
    %86 = arith.cmpi slt, %60, %85 : vector<1x32xi32>
    %87 = arith.andi %84, %86 : vector<1x32xi1>
    %cst_32 = arith.constant 0.353553385 : f32
    %cst_33 = arith.constant 0.000000e+00 : f32
    %88 = vector.broadcast %cst_32 : f32 to vector<1x32xf32>
    %89 = vector.broadcast %cst_33 : f32 to vector<1x32xf32>
    %90 = arith.select %87, %88, %89 : vector<1x32xi1>, vector<1x32xf32>
    %cst_34 = arith.constant 1.000000e+00 : f32
    %cst_35 = arith.constant 0.000000e+00 : f32
    %91 = vector.broadcast %cst_34 : f32 to vector<1x32xf32>
    %92 = vector.broadcast %cst_35 : f32 to vector<1x32xf32>
    %93 = arith.select %87, %91, %92 : vector<1x32xi1>, vector<1x32xf32>
    %c24_i32_36 = arith.constant 24 : i32
    %94 = vector.broadcast %c24_i32_36 : i32 to vector<1x32xi32>
    %95 = arith.cmpi sge, %60, %94 : vector<1x32xi32>
    %c32_i32 = arith.constant 32 : i32
    %96 = vector.broadcast %c32_i32 : i32 to vector<1x32xi32>
    %97 = arith.cmpi slt, %60, %96 : vector<1x32xi32>
    %98 = arith.andi %95, %97 : vector<1x32xi1>
    %cst_37 = arith.constant 0.353553385 : f32
    %cst_38 = arith.constant 0.000000e+00 : f32
    %99 = vector.broadcast %cst_37 : f32 to vector<1x32xf32>
    %100 = vector.broadcast %cst_38 : f32 to vector<1x32xf32>
    %101 = arith.select %98, %99, %100 : vector<1x32xi1>, vector<1x32xf32>
    %cst_39 = arith.constant 1.000000e+00 : f32
    %cst_40 = arith.constant 0.000000e+00 : f32
    %102 = vector.broadcast %cst_39 : f32 to vector<1x32xf32>
    %103 = vector.broadcast %cst_40 : f32 to vector<1x32xf32>
    %104 = arith.select %98, %102, %103 : vector<1x32xi1>, vector<1x32xf32>
    %cst_41 = arith.constant 1.000000e+00 : f32
    %105 = vector.broadcast %cst_41 : f32 to vector<32x1xf32>
    %cst_42 = arith.constant 1.000000e+00 : f32
    %106 = vector.broadcast %cst_42 : f32 to vector<16x1xf32>
    %cst_43 = arith.constant 1.000000e+00 : f32
    %107 = vector.broadcast %cst_43 : f32 to vector<16x1xf32>
    %c0_44 = arith.constant 0 : index
    %c0_45 = arith.constant 0 : index
    %c0_46 = arith.constant 0 : index
    %c0_47 = arith.constant 0 : index
    %108 = vector.load %arg2[%c0_44, %c0_45, %c0_46, %c0_47] : memref<2x2x32x128xbf16, #tpu.memory_space<vmem>>, vector<1x1x32x128xbf16>
    %109 = vector.shape_cast %108 : vector<1x1x32x128xbf16> to vector<32x128xbf16>
    %c0_48 = arith.constant 0 : index
    %c0_49 = arith.constant 0 : index
    %c0_50 = arith.constant 0 : index
    %110 = vector.load %arg3[%c0_48, %c0_49, %c0_50] : memref<2x2x128xf32, #tpu.memory_space<vmem>>, vector<1x1x128xf32>
    %111 = vector.shape_cast %110 : vector<1x1x128xf32> to vector<128xf32>
    %112 = arith.truncf %0 : vector<16x32xf32> to vector<16x32xbf16>
    %113 = vector.extract_strided_slice %109 {offsets = [0, 0], sizes = [32, 96], strides = [1, 1]} : vector<32x128xbf16> to vector<32x96xbf16>
    %cst_51 = arith.constant dense<0.000000e+00> : vector<16x96xf32>
    %114 = tpu.matmul %112, %113, %cst_51 {dimension_numbers = #tpu.dot_dimension_numbers<[1], [0], [0], [1], [0, 0, 1, 1], [], []>} : vector<16x32xbf16>, vector<32x96xbf16>, vector<16x96xf32> -> vector<16x96xf32>
    %115 = vector.extract_strided_slice %111 {offsets = [0], sizes = [96], strides = [1]} : vector<128xf32> to vector<96xf32>
    %116 = vector.shape_cast %115 : vector<96xf32> to vector<1x96xf32>
    %117 = vector.broadcast %116 : vector<1x96xf32> to vector<16x96xf32>
    %118 = arith.addf %114, %117 : vector<16x96xf32>
    %119 = vector.extract_strided_slice %118 {offsets = [0, 0], sizes = [16, 32], strides = [1, 1]} : vector<16x96xf32> to vector<16x32xf32>
    %120 = vector.extract_strided_slice %118 {offsets = [0, 32], sizes = [16, 32], strides = [1, 1]} : vector<16x96xf32> to vector<16x32xf32>
    %121 = vector.extract_strided_slice %118 {offsets = [0, 64], sizes = [16, 32], strides = [1, 1]} : vector<16x96xf32> to vector<16x32xf32>
    %122 = arith.truncf %120 : vector<16x32xf32> to vector<16x32xbf16>
    %123 = vector.broadcast %68 : vector<1x32xf32> to vector<16x32xf32>
    %124 = arith.mulf %119, %123 : vector<16x32xf32>
    %125 = arith.truncf %124 : vector<16x32xf32> to vector<16x32xbf16>
    %cst_52 = arith.constant dense<0.000000e+00> : vector<16x16xf32>
    %126 = tpu.matmul %125, %122, %cst_52 {dimension_numbers = #tpu.dot_dimension_numbers<[1], [1], [0], [0], [0, 0, 1, 0], [], []>} : vector<16x32xbf16>, vector<16x32xbf16>, vector<16x16xf32> -> vector<16x16xf32>
    %127 = arith.addf %126, %56 : vector<16x16xf32>
    %cst_53 = arith.constant dense<0xFF800000> : vector<16xf32>
    %128 = vector.multi_reduction <maximumf>, %127, %cst_53 [1] : vector<16x16xf32> to vector<16xf32>
    %129 = vector.shape_cast %128 : vector<16xf32> to vector<16x1xf32>
    %130 = vector.broadcast %129 : vector<16x1xf32> to vector<16x16xf32>
    %131 = arith.subf %127, %130 : vector<16x16xf32>
    %132 = math.exp %131 : vector<16x16xf32>
    %cst_54 = arith.constant dense<0.000000e+00> : vector<16x1xf32>
    %133 = tpu.matmul %132, %106, %cst_54 {dimension_numbers = #tpu.dot_dimension_numbers<[1], [0], [0], [1], [0, 0, 1, 1], [], []>} : vector<16x16xf32>, vector<16x1xf32>, vector<16x1xf32> -> vector<16x1xf32>
    %134 = vector.broadcast %71 : vector<1x32xf32> to vector<16x32xf32>
    %135 = arith.mulf %121, %134 : vector<16x32xf32>
    %136 = arith.truncf %135 : vector<16x32xf32> to vector<16x32xbf16>
    %137 = arith.truncf %132 : vector<16x16xf32> to vector<16x16xbf16>
    %cst_55 = arith.constant dense<0.000000e+00> : vector<16x32xf32>
    %138 = tpu.matmul %137, %136, %cst_55 {dimension_numbers = #tpu.dot_dimension_numbers<[1], [0], [0], [1], [0, 0, 1, 1], [], []>} : vector<16x16xbf16>, vector<16x32xbf16>, vector<16x32xf32> -> vector<16x32xf32>
    %139 = tpu.reciprocal %133 {approx = true} : vector<16x1xf32> -> vector<16x1xf32>
    %140 = vector.broadcast %139 : vector<16x1xf32> to vector<16x32xf32>
    %141 = arith.mulf %138, %140 : vector<16x32xf32>
    %142 = vector.broadcast %79 : vector<1x32xf32> to vector<16x32xf32>
    %143 = arith.mulf %119, %142 : vector<16x32xf32>
    %144 = arith.truncf %143 : vector<16x32xf32> to vector<16x32xbf16>
    %cst_56 = arith.constant dense<0.000000e+00> : vector<16x16xf32>
    %145 = tpu.matmul %144, %122, %cst_56 {dimension_numbers = #tpu.dot_dimension_numbers<[1], [1], [0], [0], [0, 0, 1, 0], [], []>} : vector<16x32xbf16>, vector<16x32xbf16>, vector<16x16xf32> -> vector<16x16xf32>
    %146 = arith.addf %145, %56 : vector<16x16xf32>
    %cst_57 = arith.constant dense<0xFF800000> : vector<16xf32>
    %147 = vector.multi_reduction <maximumf>, %146, %cst_57 [1] : vector<16x16xf32> to vector<16xf32>
    %148 = vector.shape_cast %147 : vector<16xf32> to vector<16x1xf32>
    %149 = vector.broadcast %148 : vector<16x1xf32> to vector<16x16xf32>
    %150 = arith.subf %146, %149 : vector<16x16xf32>
    %151 = math.exp %150 : vector<16x16xf32>
    %cst_58 = arith.constant dense<0.000000e+00> : vector<16x1xf32>
    %152 = tpu.matmul %151, %106, %cst_58 {dimension_numbers = #tpu.dot_dimension_numbers<[1], [0], [0], [1], [0, 0, 1, 1], [], []>} : vector<16x16xf32>, vector<16x1xf32>, vector<16x1xf32> -> vector<16x1xf32>
    %153 = vector.broadcast %82 : vector<1x32xf32> to vector<16x32xf32>
    %154 = arith.mulf %121, %153 : vector<16x32xf32>
    %155 = arith.truncf %154 : vector<16x32xf32> to vector<16x32xbf16>
    %156 = arith.truncf %151 : vector<16x16xf32> to vector<16x16xbf16>
    %cst_59 = arith.constant dense<0.000000e+00> : vector<16x32xf32>
    %157 = tpu.matmul %156, %155, %cst_59 {dimension_numbers = #tpu.dot_dimension_numbers<[1], [0], [0], [1], [0, 0, 1, 1], [], []>} : vector<16x16xbf16>, vector<16x32xbf16>, vector<16x32xf32> -> vector<16x32xf32>
    %158 = tpu.reciprocal %152 {approx = true} : vector<16x1xf32> -> vector<16x1xf32>
    %159 = vector.broadcast %158 : vector<16x1xf32> to vector<16x32xf32>
    %160 = arith.mulf %157, %159 : vector<16x32xf32>
    %161 = arith.addf %141, %160 : vector<16x32xf32>
    %162 = vector.broadcast %90 : vector<1x32xf32> to vector<16x32xf32>
    %163 = arith.mulf %119, %162 : vector<16x32xf32>
    %164 = arith.truncf %163 : vector<16x32xf32> to vector<16x32xbf16>
    %cst_60 = arith.constant dense<0.000000e+00> : vector<16x16xf32>
    %165 = tpu.matmul %164, %122, %cst_60 {dimension_numbers = #tpu.dot_dimension_numbers<[1], [1], [0], [0], [0, 0, 1, 0], [], []>} : vector<16x32xbf16>, vector<16x32xbf16>, vector<16x16xf32> -> vector<16x16xf32>
    %166 = arith.addf %165, %56 : vector<16x16xf32>
    %cst_61 = arith.constant dense<0xFF800000> : vector<16xf32>
    %167 = vector.multi_reduction <maximumf>, %166, %cst_61 [1] : vector<16x16xf32> to vector<16xf32>
    %168 = vector.shape_cast %167 : vector<16xf32> to vector<16x1xf32>
    %169 = vector.broadcast %168 : vector<16x1xf32> to vector<16x16xf32>
    %170 = arith.subf %166, %169 : vector<16x16xf32>
    %171 = math.exp %170 : vector<16x16xf32>
    %cst_62 = arith.constant dense<0.000000e+00> : vector<16x1xf32>
    %172 = tpu.matmul %171, %106, %cst_62 {dimension_numbers = #tpu.dot_dimension_numbers<[1], [0], [0], [1], [0, 0, 1, 1], [], []>} : vector<16x16xf32>, vector<16x1xf32>, vector<16x1xf32> -> vector<16x1xf32>
    %173 = vector.broadcast %93 : vector<1x32xf32> to vector<16x32xf32>
    %174 = arith.mulf %121, %173 : vector<16x32xf32>
    %175 = arith.truncf %174 : vector<16x32xf32> to vector<16x32xbf16>
    %176 = arith.truncf %171 : vector<16x16xf32> to vector<16x16xbf16>
    %cst_63 = arith.constant dense<0.000000e+00> : vector<16x32xf32>
    %177 = tpu.matmul %176, %175, %cst_63 {dimension_numbers = #tpu.dot_dimension_numbers<[1], [0], [0], [1], [0, 0, 1, 1], [], []>} : vector<16x16xbf16>, vector<16x32xbf16>, vector<16x32xf32> -> vector<16x32xf32>
    %178 = tpu.reciprocal %172 {approx = true} : vector<16x1xf32> -> vector<16x1xf32>
    %179 = vector.broadcast %178 : vector<16x1xf32> to vector<16x32xf32>
    %180 = arith.mulf %177, %179 : vector<16x32xf32>
    %181 = arith.addf %161, %180 : vector<16x32xf32>
    %182 = vector.broadcast %101 : vector<1x32xf32> to vector<16x32xf32>
    %183 = arith.mulf %119, %182 : vector<16x32xf32>
    %184 = arith.truncf %183 : vector<16x32xf32> to vector<16x32xbf16>
    %cst_64 = arith.constant dense<0.000000e+00> : vector<16x16xf32>
    %185 = tpu.matmul %184, %122, %cst_64 {dimension_numbers = #tpu.dot_dimension_numbers<[1], [1], [0], [0], [0, 0, 1, 0], [], []>} : vector<16x32xbf16>, vector<16x32xbf16>, vector<16x16xf32> -> vector<16x16xf32>
    %186 = arith.addf %185, %56 : vector<16x16xf32>
    %cst_65 = arith.constant dense<0xFF800000> : vector<16xf32>
    %187 = vector.multi_reduction <maximumf>, %186, %cst_65 [1] : vector<16x16xf32> to vector<16xf32>
    %188 = vector.shape_cast %187 : vector<16xf32> to vector<16x1xf32>
    %189 = vector.broadcast %188 : vector<16x1xf32> to vector<16x16xf32>
    %190 = arith.subf %186, %189 : vector<16x16xf32>
    %191 = math.exp %190 : vector<16x16xf32>
    %cst_66 = arith.constant dense<0.000000e+00> : vector<16x1xf32>
    %192 = tpu.matmul %191, %106, %cst_66 {dimension_numbers = #tpu.dot_dimension_numbers<[1], [0], [0], [1], [0, 0, 1, 1], [], []>} : vector<16x16xf32>, vector<16x1xf32>, vector<16x1xf32> -> vector<16x1xf32>
    %193 = vector.broadcast %104 : vector<1x32xf32> to vector<16x32xf32>
    %194 = arith.mulf %121, %193 : vector<16x32xf32>
    %195 = arith.truncf %194 : vector<16x32xf32> to vector<16x32xbf16>
    %196 = arith.truncf %191 : vector<16x16xf32> to vector<16x16xbf16>
    %cst_67 = arith.constant dense<0.000000e+00> : vector<16x32xf32>
    %197 = tpu.matmul %196, %195, %cst_67 {dimension_numbers = #tpu.dot_dimension_numbers<[1], [0], [0], [1], [0, 0, 1, 1], [], []>} : vector<16x16xbf16>, vector<16x32xbf16>, vector<16x32xf32> -> vector<16x32xf32>
    %198 = tpu.reciprocal %192 {approx = true} : vector<16x1xf32> -> vector<16x1xf32>
    %199 = vector.broadcast %198 : vector<16x1xf32> to vector<16x32xf32>
    %200 = arith.mulf %197, %199 : vector<16x32xf32>
    %201 = arith.addf %181, %200 : vector<16x32xf32>
    %202 = arith.truncf %201 : vector<16x32xf32> to vector<16x32xbf16>
    %203 = vector.extract_strided_slice %109 {offsets = [0, 96], sizes = [32, 32], strides = [1, 1]} : vector<32x128xbf16> to vector<32x32xbf16>
    %cst_68 = arith.constant dense<0.000000e+00> : vector<16x32xf32>
    %204 = tpu.matmul %202, %203, %cst_68 {dimension_numbers = #tpu.dot_dimension_numbers<[1], [0], [0], [1], [0, 0, 1, 1], [], []>} : vector<16x32xbf16>, vector<32x32xbf16>, vector<16x32xf32> -> vector<16x32xf32>
    %205 = vector.extract_strided_slice %111 {offsets = [96], sizes = [32], strides = [1]} : vector<128xf32> to vector<32xf32>
    %206 = vector.shape_cast %205 : vector<32xf32> to vector<1x32xf32>
    %207 = vector.broadcast %206 : vector<1x32xf32> to vector<16x32xf32>
    %208 = arith.addf %204, %207 : vector<16x32xf32>
    %209 = arith.addf %0, %208 : vector<16x32xf32>
    %c0_69 = arith.constant 0 : index
    %c0_70 = arith.constant 0 : index
    %c0_71 = arith.constant 0 : index
    %210 = vector.load %arg8[%c0_69, %c0_70, %c0_71] : memref<2x6x32xf32, #tpu.memory_space<vmem>>, vector<1x1x32xf32>
    %211 = vector.shape_cast %210 : vector<1x1x32xf32> to vector<32xf32>
    %c0_72 = arith.constant 0 : index
    %c1 = arith.constant 1 : index
    %c0_73 = arith.constant 0 : index
    %212 = vector.load %arg8[%c0_72, %c1, %c0_73] : memref<2x6x32xf32, #tpu.memory_space<vmem>>, vector<1x1x32xf32>
    %213 = vector.shape_cast %212 : vector<1x1x32xf32> to vector<32xf32>
    %cst_74 = arith.constant dense<0.000000e+00> : vector<16x1xf32>
    %214 = tpu.matmul %209, %105, %cst_74 {dimension_numbers = #tpu.dot_dimension_numbers<[1], [0], [0], [1], [0, 0, 1, 1], [], []>} : vector<16x32xf32>, vector<32x1xf32>, vector<16x1xf32> -> vector<16x1xf32>
    %cst_75 = arith.constant 3.125000e-02 : f32
    %215 = vector.broadcast %cst_75 : f32 to vector<16x1xf32>
    %216 = arith.mulf %214, %215 : vector<16x1xf32>
    %217 = vector.broadcast %216 : vector<16x1xf32> to vector<16x32xf32>
    %218 = arith.subf %209, %217 : vector<16x32xf32>
    %219 = arith.mulf %218, %218 : vector<16x32xf32>
    %cst_76 = arith.constant dense<0.000000e+00> : vector<16x1xf32>
    %220 = tpu.matmul %219, %105, %cst_76 {dimension_numbers = #tpu.dot_dimension_numbers<[1], [0], [0], [1], [0, 0, 1, 1], [], []>} : vector<16x32xf32>, vector<32x1xf32>, vector<16x1xf32> -> vector<16x1xf32>
    %cst_77 = arith.constant 3.125000e-02 : f32
    %221 = vector.broadcast %cst_77 : f32 to vector<16x1xf32>
    %222 = arith.mulf %220, %221 : vector<16x1xf32>
    %cst_78 = arith.constant 9.99999974E-6 : f32
    %223 = vector.broadcast %cst_78 : f32 to vector<16x1xf32>
    %224 = arith.addf %222, %223 : vector<16x1xf32>
    %225 = math.rsqrt %224 : vector<16x1xf32>
    %226 = vector.broadcast %225 : vector<16x1xf32> to vector<16x32xf32>
    %227 = arith.mulf %218, %226 : vector<16x32xf32>
    %228 = vector.shape_cast %211 : vector<32xf32> to vector<1x32xf32>
    %229 = vector.broadcast %228 : vector<1x32xf32> to vector<16x32xf32>
    %230 = arith.mulf %227, %229 : vector<16x32xf32>
    %231 = vector.shape_cast %213 : vector<32xf32> to vector<1x32xf32>
    %232 = vector.broadcast %231 : vector<1x32xf32> to vector<16x32xf32>
    %233 = arith.addf %230, %232 : vector<16x32xf32>
    %c0_79 = arith.constant 0 : index
    %c1_80 = arith.constant 1 : index
    %c0_81 = arith.constant 0 : index
    %c0_82 = arith.constant 0 : index
    %234 = vector.load %arg2[%c0_79, %c1_80, %c0_81, %c0_82] : memref<2x2x32x128xbf16, #tpu.memory_space<vmem>>, vector<1x1x32x128xbf16>
    %235 = vector.shape_cast %234 : vector<1x1x32x128xbf16> to vector<32x128xbf16>
    %c0_83 = arith.constant 0 : index
    %c1_84 = arith.constant 1 : index
    %c0_85 = arith.constant 0 : index
    %236 = vector.load %arg3[%c0_83, %c1_84, %c0_85] : memref<2x2x128xf32, #tpu.memory_space<vmem>>, vector<1x1x128xf32>
    %237 = vector.shape_cast %236 : vector<1x1x128xf32> to vector<128xf32>
    %238 = arith.truncf %233 : vector<16x32xf32> to vector<16x32xbf16>
    %239 = vector.extract_strided_slice %235 {offsets = [0, 0], sizes = [32, 32], strides = [1, 1]} : vector<32x128xbf16> to vector<32x32xbf16>
    %cst_86 = arith.constant dense<0.000000e+00> : vector<16x32xf32>
    %240 = tpu.matmul %238, %239, %cst_86 {dimension_numbers = #tpu.dot_dimension_numbers<[1], [0], [0], [1], [0, 0, 1, 1], [], []>} : vector<16x32xbf16>, vector<32x32xbf16>, vector<16x32xf32> -> vector<16x32xf32>
    %241 = vector.extract_strided_slice %237 {offsets = [0], sizes = [32], strides = [1]} : vector<128xf32> to vector<32xf32>
    %242 = vector.shape_cast %241 : vector<32xf32> to vector<1x32xf32>
    %243 = vector.broadcast %242 : vector<1x32xf32> to vector<16x32xf32>
    %244 = arith.addf %240, %243 : vector<16x32xf32>
    %245 = arith.truncf %1 : vector<16x32xf32> to vector<16x32xbf16>
    %246 = vector.extract_strided_slice %235 {offsets = [0, 32], sizes = [32, 64], strides = [1, 1]} : vector<32x128xbf16> to vector<32x64xbf16>
    %cst_87 = arith.constant dense<0.000000e+00> : vector<16x64xf32>
    %247 = tpu.matmul %245, %246, %cst_87 {dimension_numbers = #tpu.dot_dimension_numbers<[1], [0], [0], [1], [0, 0, 1, 1], [], []>} : vector<16x32xbf16>, vector<32x64xbf16>, vector<16x64xf32> -> vector<16x64xf32>
    %248 = vector.extract_strided_slice %237 {offsets = [32], sizes = [64], strides = [1]} : vector<128xf32> to vector<64xf32>
    %249 = vector.shape_cast %248 : vector<64xf32> to vector<1x64xf32>
    %250 = vector.broadcast %249 : vector<1x64xf32> to vector<16x64xf32>
    %251 = arith.addf %247, %250 : vector<16x64xf32>
    %252 = vector.extract_strided_slice %251 {offsets = [0, 0], sizes = [16, 32], strides = [1, 1]} : vector<16x64xf32> to vector<16x32xf32>
    %253 = vector.extract_strided_slice %251 {offsets = [0, 32], sizes = [16, 32], strides = [1, 1]} : vector<16x64xf32> to vector<16x32xf32>
    %254 = arith.truncf %252 : vector<16x32xf32> to vector<16x32xbf16>
    %255 = vector.broadcast %68 : vector<1x32xf32> to vector<16x32xf32>
    %256 = arith.mulf %244, %255 : vector<16x32xf32>
    %257 = arith.truncf %256 : vector<16x32xf32> to vector<16x32xbf16>
    %cst_88 = arith.constant dense<0.000000e+00> : vector<16x16xf32>
    %258 = tpu.matmul %257, %254, %cst_88 {dimension_numbers = #tpu.dot_dimension_numbers<[1], [1], [0], [0], [0, 0, 1, 0], [], []>} : vector<16x32xbf16>, vector<16x32xbf16>, vector<16x16xf32> -> vector<16x16xf32>
    %259 = arith.addf %258, %59 : vector<16x16xf32>
    %cst_89 = arith.constant dense<0xFF800000> : vector<16xf32>
    %260 = vector.multi_reduction <maximumf>, %259, %cst_89 [1] : vector<16x16xf32> to vector<16xf32>
    %261 = vector.shape_cast %260 : vector<16xf32> to vector<16x1xf32>
    %262 = vector.broadcast %261 : vector<16x1xf32> to vector<16x16xf32>
    %263 = arith.subf %259, %262 : vector<16x16xf32>
    %264 = math.exp %263 : vector<16x16xf32>
    %cst_90 = arith.constant dense<0.000000e+00> : vector<16x1xf32>
    %265 = tpu.matmul %264, %107, %cst_90 {dimension_numbers = #tpu.dot_dimension_numbers<[1], [0], [0], [1], [0, 0, 1, 1], [], []>} : vector<16x16xf32>, vector<16x1xf32>, vector<16x1xf32> -> vector<16x1xf32>
    %266 = vector.broadcast %71 : vector<1x32xf32> to vector<16x32xf32>
    %267 = arith.mulf %253, %266 : vector<16x32xf32>
    %268 = arith.truncf %267 : vector<16x32xf32> to vector<16x32xbf16>
    %269 = arith.truncf %264 : vector<16x16xf32> to vector<16x16xbf16>
    %cst_91 = arith.constant dense<0.000000e+00> : vector<16x32xf32>
    %270 = tpu.matmul %269, %268, %cst_91 {dimension_numbers = #tpu.dot_dimension_numbers<[1], [0], [0], [1], [0, 0, 1, 1], [], []>} : vector<16x16xbf16>, vector<16x32xbf16>, vector<16x32xf32> -> vector<16x32xf32>
    %271 = tpu.reciprocal %265 {approx = true} : vector<16x1xf32> -> vector<16x1xf32>
    %272 = vector.broadcast %271 : vector<16x1xf32> to vector<16x32xf32>
    %273 = arith.mulf %270, %272 : vector<16x32xf32>
    %274 = vector.broadcast %79 : vector<1x32xf32> to vector<16x32xf32>
    %275 = arith.mulf %244, %274 : vector<16x32xf32>
    %276 = arith.truncf %275 : vector<16x32xf32> to vector<16x32xbf16>
    %cst_92 = arith.constant dense<0.000000e+00> : vector<16x16xf32>
    %277 = tpu.matmul %276, %254, %cst_92 {dimension_numbers = #tpu.dot_dimension_numbers<[1], [1], [0], [0], [0, 0, 1, 0], [], []>} : vector<16x32xbf16>, vector<16x32xbf16>, vector<16x16xf32> -> vector<16x16xf32>
    %278 = arith.addf %277, %59 : vector<16x16xf32>
    %cst_93 = arith.constant dense<0xFF800000> : vector<16xf32>
    %279 = vector.multi_reduction <maximumf>, %278, %cst_93 [1] : vector<16x16xf32> to vector<16xf32>
    %280 = vector.shape_cast %279 : vector<16xf32> to vector<16x1xf32>
    %281 = vector.broadcast %280 : vector<16x1xf32> to vector<16x16xf32>
    %282 = arith.subf %278, %281 : vector<16x16xf32>
    %283 = math.exp %282 : vector<16x16xf32>
    %cst_94 = arith.constant dense<0.000000e+00> : vector<16x1xf32>
    %284 = tpu.matmul %283, %107, %cst_94 {dimension_numbers = #tpu.dot_dimension_numbers<[1], [0], [0], [1], [0, 0, 1, 1], [], []>} : vector<16x16xf32>, vector<16x1xf32>, vector<16x1xf32> -> vector<16x1xf32>
    %285 = vector.broadcast %82 : vector<1x32xf32> to vector<16x32xf32>
    %286 = arith.mulf %253, %285 : vector<16x32xf32>
    %287 = arith.truncf %286 : vector<16x32xf32> to vector<16x32xbf16>
    %288 = arith.truncf %283 : vector<16x16xf32> to vector<16x16xbf16>
    %cst_95 = arith.constant dense<0.000000e+00> : vector<16x32xf32>
    %289 = tpu.matmul %288, %287, %cst_95 {dimension_numbers = #tpu.dot_dimension_numbers<[1], [0], [0], [1], [0, 0, 1, 1], [], []>} : vector<16x16xbf16>, vector<16x32xbf16>, vector<16x32xf32> -> vector<16x32xf32>
    %290 = tpu.reciprocal %284 {approx = true} : vector<16x1xf32> -> vector<16x1xf32>
    %291 = vector.broadcast %290 : vector<16x1xf32> to vector<16x32xf32>
    %292 = arith.mulf %289, %291 : vector<16x32xf32>
    %293 = arith.addf %273, %292 : vector<16x32xf32>
    %294 = vector.broadcast %90 : vector<1x32xf32> to vector<16x32xf32>
    %295 = arith.mulf %244, %294 : vector<16x32xf32>
    %296 = arith.truncf %295 : vector<16x32xf32> to vector<16x32xbf16>
    %cst_96 = arith.constant dense<0.000000e+00> : vector<16x16xf32>
    %297 = tpu.matmul %296, %254, %cst_96 {dimension_numbers = #tpu.dot_dimension_numbers<[1], [1], [0], [0], [0, 0, 1, 0], [], []>} : vector<16x32xbf16>, vector<16x32xbf16>, vector<16x16xf32> -> vector<16x16xf32>
    %298 = arith.addf %297, %59 : vector<16x16xf32>
    %cst_97 = arith.constant dense<0xFF800000> : vector<16xf32>
    %299 = vector.multi_reduction <maximumf>, %298, %cst_97 [1] : vector<16x16xf32> to vector<16xf32>
    %300 = vector.shape_cast %299 : vector<16xf32> to vector<16x1xf32>
    %301 = vector.broadcast %300 : vector<16x1xf32> to vector<16x16xf32>
    %302 = arith.subf %298, %301 : vector<16x16xf32>
    %303 = math.exp %302 : vector<16x16xf32>
    %cst_98 = arith.constant dense<0.000000e+00> : vector<16x1xf32>
    %304 = tpu.matmul %303, %107, %cst_98 {dimension_numbers = #tpu.dot_dimension_numbers<[1], [0], [0], [1], [0, 0, 1, 1], [], []>} : vector<16x16xf32>, vector<16x1xf32>, vector<16x1xf32> -> vector<16x1xf32>
    %305 = vector.broadcast %93 : vector<1x32xf32> to vector<16x32xf32>
    %306 = arith.mulf %253, %305 : vector<16x32xf32>
    %307 = arith.truncf %306 : vector<16x32xf32> to vector<16x32xbf16>
    %308 = arith.truncf %303 : vector<16x16xf32> to vector<16x16xbf16>
    %cst_99 = arith.constant dense<0.000000e+00> : vector<16x32xf32>
    %309 = tpu.matmul %308, %307, %cst_99 {dimension_numbers = #tpu.dot_dimension_numbers<[1], [0], [0], [1], [0, 0, 1, 1], [], []>} : vector<16x16xbf16>, vector<16x32xbf16>, vector<16x32xf32> -> vector<16x32xf32>
    %310 = tpu.reciprocal %304 {approx = true} : vector<16x1xf32> -> vector<16x1xf32>
    %311 = vector.broadcast %310 : vector<16x1xf32> to vector<16x32xf32>
    %312 = arith.mulf %309, %311 : vector<16x32xf32>
    %313 = arith.addf %293, %312 : vector<16x32xf32>
    %314 = vector.broadcast %101 : vector<1x32xf32> to vector<16x32xf32>
    %315 = arith.mulf %244, %314 : vector<16x32xf32>
    %316 = arith.truncf %315 : vector<16x32xf32> to vector<16x32xbf16>
    %cst_100 = arith.constant dense<0.000000e+00> : vector<16x16xf32>
    %317 = tpu.matmul %316, %254, %cst_100 {dimension_numbers = #tpu.dot_dimension_numbers<[1], [1], [0], [0], [0, 0, 1, 0], [], []>} : vector<16x32xbf16>, vector<16x32xbf16>, vector<16x16xf32> -> vector<16x16xf32>
    %318 = arith.addf %317, %59 : vector<16x16xf32>
    %cst_101 = arith.constant dense<0xFF800000> : vector<16xf32>
    %319 = vector.multi_reduction <maximumf>, %318, %cst_101 [1] : vector<16x16xf32> to vector<16xf32>
    %320 = vector.shape_cast %319 : vector<16xf32> to vector<16x1xf32>
    %321 = vector.broadcast %320 : vector<16x1xf32> to vector<16x16xf32>
    %322 = arith.subf %318, %321 : vector<16x16xf32>
    %323 = math.exp %322 : vector<16x16xf32>
    %cst_102 = arith.constant dense<0.000000e+00> : vector<16x1xf32>
    %324 = tpu.matmul %323, %107, %cst_102 {dimension_numbers = #tpu.dot_dimension_numbers<[1], [0], [0], [1], [0, 0, 1, 1], [], []>} : vector<16x16xf32>, vector<16x1xf32>, vector<16x1xf32> -> vector<16x1xf32>
    %325 = vector.broadcast %104 : vector<1x32xf32> to vector<16x32xf32>
    %326 = arith.mulf %253, %325 : vector<16x32xf32>
    %327 = arith.truncf %326 : vector<16x32xf32> to vector<16x32xbf16>
    %328 = arith.truncf %323 : vector<16x16xf32> to vector<16x16xbf16>
    %cst_103 = arith.constant dense<0.000000e+00> : vector<16x32xf32>
    %329 = tpu.matmul %328, %327, %cst_103 {dimension_numbers = #tpu.dot_dimension_numbers<[1], [0], [0], [1], [0, 0, 1, 1], [], []>} : vector<16x16xbf16>, vector<16x32xbf16>, vector<16x32xf32> -> vector<16x32xf32>
    %330 = tpu.reciprocal %324 {approx = true} : vector<16x1xf32> -> vector<16x1xf32>
    %331 = vector.broadcast %330 : vector<16x1xf32> to vector<16x32xf32>
    %332 = arith.mulf %329, %331 : vector<16x32xf32>
    %333 = arith.addf %313, %332 : vector<16x32xf32>
    %334 = arith.truncf %333 : vector<16x32xf32> to vector<16x32xbf16>
    %335 = vector.extract_strided_slice %235 {offsets = [0, 96], sizes = [32, 32], strides = [1, 1]} : vector<32x128xbf16> to vector<32x32xbf16>
    %cst_104 = arith.constant dense<0.000000e+00> : vector<16x32xf32>
    %336 = tpu.matmul %334, %335, %cst_104 {dimension_numbers = #tpu.dot_dimension_numbers<[1], [0], [0], [1], [0, 0, 1, 1], [], []>} : vector<16x32xbf16>, vector<32x32xbf16>, vector<16x32xf32> -> vector<16x32xf32>
    %337 = vector.extract_strided_slice %237 {offsets = [96], sizes = [32], strides = [1]} : vector<128xf32> to vector<32xf32>
    %338 = vector.shape_cast %337 : vector<32xf32> to vector<1x32xf32>
    %339 = vector.broadcast %338 : vector<1x32xf32> to vector<16x32xf32>
    %340 = arith.addf %336, %339 : vector<16x32xf32>
    %341 = arith.addf %233, %340 : vector<16x32xf32>
    %c0_105 = arith.constant 0 : index
    %c2 = arith.constant 2 : index
    %c0_106 = arith.constant 0 : index
    %342 = vector.load %arg8[%c0_105, %c2, %c0_106] : memref<2x6x32xf32, #tpu.memory_space<vmem>>, vector<1x1x32xf32>
    %343 = vector.shape_cast %342 : vector<1x1x32xf32> to vector<32xf32>
    %c0_107 = arith.constant 0 : index
    %c3 = arith.constant 3 : index
    %c0_108 = arith.constant 0 : index
    %344 = vector.load %arg8[%c0_107, %c3, %c0_108] : memref<2x6x32xf32, #tpu.memory_space<vmem>>, vector<1x1x32xf32>
    %345 = vector.shape_cast %344 : vector<1x1x32xf32> to vector<32xf32>
    %cst_109 = arith.constant dense<0.000000e+00> : vector<16x1xf32>
    %346 = tpu.matmul %341, %105, %cst_109 {dimension_numbers = #tpu.dot_dimension_numbers<[1], [0], [0], [1], [0, 0, 1, 1], [], []>} : vector<16x32xf32>, vector<32x1xf32>, vector<16x1xf32> -> vector<16x1xf32>
    %cst_110 = arith.constant 3.125000e-02 : f32
    %347 = vector.broadcast %cst_110 : f32 to vector<16x1xf32>
    %348 = arith.mulf %346, %347 : vector<16x1xf32>
    %349 = vector.broadcast %348 : vector<16x1xf32> to vector<16x32xf32>
    %350 = arith.subf %341, %349 : vector<16x32xf32>
    %351 = arith.mulf %350, %350 : vector<16x32xf32>
    %cst_111 = arith.constant dense<0.000000e+00> : vector<16x1xf32>
    %352 = tpu.matmul %351, %105, %cst_111 {dimension_numbers = #tpu.dot_dimension_numbers<[1], [0], [0], [1], [0, 0, 1, 1], [], []>} : vector<16x32xf32>, vector<32x1xf32>, vector<16x1xf32> -> vector<16x1xf32>
    %cst_112 = arith.constant 3.125000e-02 : f32
    %353 = vector.broadcast %cst_112 : f32 to vector<16x1xf32>
    %354 = arith.mulf %352, %353 : vector<16x1xf32>
    %cst_113 = arith.constant 9.99999974E-6 : f32
    %355 = vector.broadcast %cst_113 : f32 to vector<16x1xf32>
    %356 = arith.addf %354, %355 : vector<16x1xf32>
    %357 = math.rsqrt %356 : vector<16x1xf32>
    %358 = vector.broadcast %357 : vector<16x1xf32> to vector<16x32xf32>
    %359 = arith.mulf %350, %358 : vector<16x32xf32>
    %360 = vector.shape_cast %343 : vector<32xf32> to vector<1x32xf32>
    %361 = vector.broadcast %360 : vector<1x32xf32> to vector<16x32xf32>
    %362 = arith.mulf %359, %361 : vector<16x32xf32>
    %363 = vector.shape_cast %345 : vector<32xf32> to vector<1x32xf32>
    %364 = vector.broadcast %363 : vector<1x32xf32> to vector<16x32xf32>
    %365 = arith.addf %362, %364 : vector<16x32xf32>
    %366 = arith.truncf %365 : vector<16x32xf32> to vector<16x32xbf16>
    %c0_114 = arith.constant 0 : index
    %c0_115 = arith.constant 0 : index
    %c0_116 = arith.constant 0 : index
    %367 = vector.load %arg4[%c0_114, %c0_115, %c0_116] : memref<2x32x64xbf16, #tpu.memory_space<vmem>>, vector<1x32x64xbf16>
    %368 = vector.shape_cast %367 : vector<1x32x64xbf16> to vector<32x64xbf16>
    %cst_117 = arith.constant dense<0.000000e+00> : vector<16x64xf32>
    %369 = tpu.matmul %366, %368, %cst_117 {dimension_numbers = #tpu.dot_dimension_numbers<[1], [0], [0], [1], [0, 0, 1, 1], [], []>} : vector<16x32xbf16>, vector<32x64xbf16>, vector<16x64xf32> -> vector<16x64xf32>
    %c0_118 = arith.constant 0 : index
    %c0_119 = arith.constant 0 : index
    %370 = vector.load %arg6[%c0_118, %c0_119] : memref<2x64xf32, #tpu.memory_space<vmem>>, vector<1x64xf32>
    %371 = vector.shape_cast %370 : vector<1x64xf32> to vector<64xf32>
    %372 = vector.shape_cast %371 : vector<64xf32> to vector<1x64xf32>
    %373 = vector.broadcast %372 : vector<1x64xf32> to vector<16x64xf32>
    %374 = arith.addf %369, %373 : vector<16x64xf32>
    %cst_120 = arith.constant 0.000000e+00 : f32
    %375 = vector.broadcast %cst_120 : f32 to vector<16x64xf32>
    %376 = arith.maximumf %374, %375 : vector<16x64xf32>
    %377 = arith.truncf %376 : vector<16x64xf32> to vector<16x64xbf16>
    %c0_121 = arith.constant 0 : index
    %c0_122 = arith.constant 0 : index
    %c0_123 = arith.constant 0 : index
    %378 = vector.load %arg5[%c0_121, %c0_122, %c0_123] : memref<2x64x32xbf16, #tpu.memory_space<vmem>>, vector<1x64x32xbf16>
    %379 = vector.shape_cast %378 : vector<1x64x32xbf16> to vector<64x32xbf16>
    %cst_124 = arith.constant dense<0.000000e+00> : vector<16x32xf32>
    %380 = tpu.matmul %377, %379, %cst_124 {dimension_numbers = #tpu.dot_dimension_numbers<[1], [0], [0], [1], [0, 0, 1, 1], [], []>} : vector<16x64xbf16>, vector<64x32xbf16>, vector<16x32xf32> -> vector<16x32xf32>
    %c0_125 = arith.constant 0 : index
    %c0_126 = arith.constant 0 : index
    %381 = vector.load %arg7[%c0_125, %c0_126] : memref<2x32xf32, #tpu.memory_space<vmem>>, vector<1x32xf32>
    %382 = vector.shape_cast %381 : vector<1x32xf32> to vector<32xf32>
    %383 = vector.shape_cast %382 : vector<32xf32> to vector<1x32xf32>
    %384 = vector.broadcast %383 : vector<1x32xf32> to vector<16x32xf32>
    %385 = arith.addf %380, %384 : vector<16x32xf32>
    %386 = arith.addf %365, %385 : vector<16x32xf32>
    %c0_127 = arith.constant 0 : index
    %c4 = arith.constant 4 : index
    %c0_128 = arith.constant 0 : index
    %387 = vector.load %arg8[%c0_127, %c4, %c0_128] : memref<2x6x32xf32, #tpu.memory_space<vmem>>, vector<1x1x32xf32>
    %388 = vector.shape_cast %387 : vector<1x1x32xf32> to vector<32xf32>
    %c0_129 = arith.constant 0 : index
    %c5 = arith.constant 5 : index
    %c0_130 = arith.constant 0 : index
    %389 = vector.load %arg8[%c0_129, %c5, %c0_130] : memref<2x6x32xf32, #tpu.memory_space<vmem>>, vector<1x1x32xf32>
    %390 = vector.shape_cast %389 : vector<1x1x32xf32> to vector<32xf32>
    %cst_131 = arith.constant dense<0.000000e+00> : vector<16x1xf32>
    %391 = tpu.matmul %386, %105, %cst_131 {dimension_numbers = #tpu.dot_dimension_numbers<[1], [0], [0], [1], [0, 0, 1, 1], [], []>} : vector<16x32xf32>, vector<32x1xf32>, vector<16x1xf32> -> vector<16x1xf32>
    %cst_132 = arith.constant 3.125000e-02 : f32
    %392 = vector.broadcast %cst_132 : f32 to vector<16x1xf32>
    %393 = arith.mulf %391, %392 : vector<16x1xf32>
    %394 = vector.broadcast %393 : vector<16x1xf32> to vector<16x32xf32>
    %395 = arith.subf %386, %394 : vector<16x32xf32>
    %396 = arith.mulf %395, %395 : vector<16x32xf32>
    %cst_133 = arith.constant dense<0.000000e+00> : vector<16x1xf32>
    %397 = tpu.matmul %396, %105, %cst_133 {dimension_numbers = #tpu.dot_dimension_numbers<[1], [0], [0], [1], [0, 0, 1, 1], [], []>} : vector<16x32xf32>, vector<32x1xf32>, vector<16x1xf32> -> vector<16x1xf32>
    %cst_134 = arith.constant 3.125000e-02 : f32
    %398 = vector.broadcast %cst_134 : f32 to vector<16x1xf32>
    %399 = arith.mulf %397, %398 : vector<16x1xf32>
    %cst_135 = arith.constant 9.99999974E-6 : f32
    %400 = vector.broadcast %cst_135 : f32 to vector<16x1xf32>
    %401 = arith.addf %399, %400 : vector<16x1xf32>
    %402 = math.rsqrt %401 : vector<16x1xf32>
    %403 = vector.broadcast %402 : vector<16x1xf32> to vector<16x32xf32>
    %404 = arith.mulf %395, %403 : vector<16x32xf32>
    %405 = vector.shape_cast %388 : vector<32xf32> to vector<1x32xf32>
    %406 = vector.broadcast %405 : vector<1x32xf32> to vector<16x32xf32>
    %407 = arith.mulf %404, %406 : vector<16x32xf32>
    %408 = vector.shape_cast %390 : vector<32xf32> to vector<1x32xf32>
    %409 = vector.broadcast %408 : vector<1x32xf32> to vector<16x32xf32>
    %410 = arith.addf %407, %409 : vector<16x32xf32>
    %c1_136 = arith.constant 1 : index
    %c0_137 = arith.constant 0 : index
    %c0_138 = arith.constant 0 : index
    %c0_139 = arith.constant 0 : index
    %411 = vector.load %arg2[%c1_136, %c0_137, %c0_138, %c0_139] : memref<2x2x32x128xbf16, #tpu.memory_space<vmem>>, vector<1x1x32x128xbf16>
    %412 = vector.shape_cast %411 : vector<1x1x32x128xbf16> to vector<32x128xbf16>
    %c1_140 = arith.constant 1 : index
    %c0_141 = arith.constant 0 : index
    %c0_142 = arith.constant 0 : index
    %413 = vector.load %arg3[%c1_140, %c0_141, %c0_142] : memref<2x2x128xf32, #tpu.memory_space<vmem>>, vector<1x1x128xf32>
    %414 = vector.shape_cast %413 : vector<1x1x128xf32> to vector<128xf32>
    %415 = arith.truncf %410 : vector<16x32xf32> to vector<16x32xbf16>
    %416 = vector.extract_strided_slice %412 {offsets = [0, 0], sizes = [32, 96], strides = [1, 1]} : vector<32x128xbf16> to vector<32x96xbf16>
    %cst_143 = arith.constant dense<0.000000e+00> : vector<16x96xf32>
    %417 = tpu.matmul %415, %416, %cst_143 {dimension_numbers = #tpu.dot_dimension_numbers<[1], [0], [0], [1], [0, 0, 1, 1], [], []>} : vector<16x32xbf16>, vector<32x96xbf16>, vector<16x96xf32> -> vector<16x96xf32>
    %418 = vector.extract_strided_slice %414 {offsets = [0], sizes = [96], strides = [1]} : vector<128xf32> to vector<96xf32>
    %419 = vector.shape_cast %418 : vector<96xf32> to vector<1x96xf32>
    %420 = vector.broadcast %419 : vector<1x96xf32> to vector<16x96xf32>
    %421 = arith.addf %417, %420 : vector<16x96xf32>
    %422 = vector.extract_strided_slice %421 {offsets = [0, 0], sizes = [16, 32], strides = [1, 1]} : vector<16x96xf32> to vector<16x32xf32>
    %423 = vector.extract_strided_slice %421 {offsets = [0, 32], sizes = [16, 32], strides = [1, 1]} : vector<16x96xf32> to vector<16x32xf32>
    %424 = vector.extract_strided_slice %421 {offsets = [0, 64], sizes = [16, 32], strides = [1, 1]} : vector<16x96xf32> to vector<16x32xf32>
    %425 = arith.truncf %423 : vector<16x32xf32> to vector<16x32xbf16>
    %426 = vector.broadcast %68 : vector<1x32xf32> to vector<16x32xf32>
    %427 = arith.mulf %422, %426 : vector<16x32xf32>
    %428 = arith.truncf %427 : vector<16x32xf32> to vector<16x32xbf16>
    %cst_144 = arith.constant dense<0.000000e+00> : vector<16x16xf32>
    %429 = tpu.matmul %428, %425, %cst_144 {dimension_numbers = #tpu.dot_dimension_numbers<[1], [1], [0], [0], [0, 0, 1, 0], [], []>} : vector<16x32xbf16>, vector<16x32xbf16>, vector<16x16xf32> -> vector<16x16xf32>
    %430 = arith.addf %429, %56 : vector<16x16xf32>
    %cst_145 = arith.constant dense<0xFF800000> : vector<16xf32>
    %431 = vector.multi_reduction <maximumf>, %430, %cst_145 [1] : vector<16x16xf32> to vector<16xf32>
    %432 = vector.shape_cast %431 : vector<16xf32> to vector<16x1xf32>
    %433 = vector.broadcast %432 : vector<16x1xf32> to vector<16x16xf32>
    %434 = arith.subf %430, %433 : vector<16x16xf32>
    %435 = math.exp %434 : vector<16x16xf32>
    %cst_146 = arith.constant dense<0.000000e+00> : vector<16x1xf32>
    %436 = tpu.matmul %435, %106, %cst_146 {dimension_numbers = #tpu.dot_dimension_numbers<[1], [0], [0], [1], [0, 0, 1, 1], [], []>} : vector<16x16xf32>, vector<16x1xf32>, vector<16x1xf32> -> vector<16x1xf32>
    %437 = vector.broadcast %71 : vector<1x32xf32> to vector<16x32xf32>
    %438 = arith.mulf %424, %437 : vector<16x32xf32>
    %439 = arith.truncf %438 : vector<16x32xf32> to vector<16x32xbf16>
    %440 = arith.truncf %435 : vector<16x16xf32> to vector<16x16xbf16>
    %cst_147 = arith.constant dense<0.000000e+00> : vector<16x32xf32>
    %441 = tpu.matmul %440, %439, %cst_147 {dimension_numbers = #tpu.dot_dimension_numbers<[1], [0], [0], [1], [0, 0, 1, 1], [], []>} : vector<16x16xbf16>, vector<16x32xbf16>, vector<16x32xf32> -> vector<16x32xf32>
    %442 = tpu.reciprocal %436 {approx = true} : vector<16x1xf32> -> vector<16x1xf32>
    %443 = vector.broadcast %442 : vector<16x1xf32> to vector<16x32xf32>
    %444 = arith.mulf %441, %443 : vector<16x32xf32>
    %445 = vector.broadcast %79 : vector<1x32xf32> to vector<16x32xf32>
    %446 = arith.mulf %422, %445 : vector<16x32xf32>
    %447 = arith.truncf %446 : vector<16x32xf32> to vector<16x32xbf16>
    %cst_148 = arith.constant dense<0.000000e+00> : vector<16x16xf32>
    %448 = tpu.matmul %447, %425, %cst_148 {dimension_numbers = #tpu.dot_dimension_numbers<[1], [1], [0], [0], [0, 0, 1, 0], [], []>} : vector<16x32xbf16>, vector<16x32xbf16>, vector<16x16xf32> -> vector<16x16xf32>
    %449 = arith.addf %448, %56 : vector<16x16xf32>
    %cst_149 = arith.constant dense<0xFF800000> : vector<16xf32>
    %450 = vector.multi_reduction <maximumf>, %449, %cst_149 [1] : vector<16x16xf32> to vector<16xf32>
    %451 = vector.shape_cast %450 : vector<16xf32> to vector<16x1xf32>
    %452 = vector.broadcast %451 : vector<16x1xf32> to vector<16x16xf32>
    %453 = arith.subf %449, %452 : vector<16x16xf32>
    %454 = math.exp %453 : vector<16x16xf32>
    %cst_150 = arith.constant dense<0.000000e+00> : vector<16x1xf32>
    %455 = tpu.matmul %454, %106, %cst_150 {dimension_numbers = #tpu.dot_dimension_numbers<[1], [0], [0], [1], [0, 0, 1, 1], [], []>} : vector<16x16xf32>, vector<16x1xf32>, vector<16x1xf32> -> vector<16x1xf32>
    %456 = vector.broadcast %82 : vector<1x32xf32> to vector<16x32xf32>
    %457 = arith.mulf %424, %456 : vector<16x32xf32>
    %458 = arith.truncf %457 : vector<16x32xf32> to vector<16x32xbf16>
    %459 = arith.truncf %454 : vector<16x16xf32> to vector<16x16xbf16>
    %cst_151 = arith.constant dense<0.000000e+00> : vector<16x32xf32>
    %460 = tpu.matmul %459, %458, %cst_151 {dimension_numbers = #tpu.dot_dimension_numbers<[1], [0], [0], [1], [0, 0, 1, 1], [], []>} : vector<16x16xbf16>, vector<16x32xbf16>, vector<16x32xf32> -> vector<16x32xf32>
    %461 = tpu.reciprocal %455 {approx = true} : vector<16x1xf32> -> vector<16x1xf32>
    %462 = vector.broadcast %461 : vector<16x1xf32> to vector<16x32xf32>
    %463 = arith.mulf %460, %462 : vector<16x32xf32>
    %464 = arith.addf %444, %463 : vector<16x32xf32>
    %465 = vector.broadcast %90 : vector<1x32xf32> to vector<16x32xf32>
    %466 = arith.mulf %422, %465 : vector<16x32xf32>
    %467 = arith.truncf %466 : vector<16x32xf32> to vector<16x32xbf16>
    %cst_152 = arith.constant dense<0.000000e+00> : vector<16x16xf32>
    %468 = tpu.matmul %467, %425, %cst_152 {dimension_numbers = #tpu.dot_dimension_numbers<[1], [1], [0], [0], [0, 0, 1, 0], [], []>} : vector<16x32xbf16>, vector<16x32xbf16>, vector<16x16xf32> -> vector<16x16xf32>
    %469 = arith.addf %468, %56 : vector<16x16xf32>
    %cst_153 = arith.constant dense<0xFF800000> : vector<16xf32>
    %470 = vector.multi_reduction <maximumf>, %469, %cst_153 [1] : vector<16x16xf32> to vector<16xf32>
    %471 = vector.shape_cast %470 : vector<16xf32> to vector<16x1xf32>
    %472 = vector.broadcast %471 : vector<16x1xf32> to vector<16x16xf32>
    %473 = arith.subf %469, %472 : vector<16x16xf32>
    %474 = math.exp %473 : vector<16x16xf32>
    %cst_154 = arith.constant dense<0.000000e+00> : vector<16x1xf32>
    %475 = tpu.matmul %474, %106, %cst_154 {dimension_numbers = #tpu.dot_dimension_numbers<[1], [0], [0], [1], [0, 0, 1, 1], [], []>} : vector<16x16xf32>, vector<16x1xf32>, vector<16x1xf32> -> vector<16x1xf32>
    %476 = vector.broadcast %93 : vector<1x32xf32> to vector<16x32xf32>
    %477 = arith.mulf %424, %476 : vector<16x32xf32>
    %478 = arith.truncf %477 : vector<16x32xf32> to vector<16x32xbf16>
    %479 = arith.truncf %474 : vector<16x16xf32> to vector<16x16xbf16>
    %cst_155 = arith.constant dense<0.000000e+00> : vector<16x32xf32>
    %480 = tpu.matmul %479, %478, %cst_155 {dimension_numbers = #tpu.dot_dimension_numbers<[1], [0], [0], [1], [0, 0, 1, 1], [], []>} : vector<16x16xbf16>, vector<16x32xbf16>, vector<16x32xf32> -> vector<16x32xf32>
    %481 = tpu.reciprocal %475 {approx = true} : vector<16x1xf32> -> vector<16x1xf32>
    %482 = vector.broadcast %481 : vector<16x1xf32> to vector<16x32xf32>
    %483 = arith.mulf %480, %482 : vector<16x32xf32>
    %484 = arith.addf %464, %483 : vector<16x32xf32>
    %485 = vector.broadcast %101 : vector<1x32xf32> to vector<16x32xf32>
    %486 = arith.mulf %422, %485 : vector<16x32xf32>
    %487 = arith.truncf %486 : vector<16x32xf32> to vector<16x32xbf16>
    %cst_156 = arith.constant dense<0.000000e+00> : vector<16x16xf32>
    %488 = tpu.matmul %487, %425, %cst_156 {dimension_numbers = #tpu.dot_dimension_numbers<[1], [1], [0], [0], [0, 0, 1, 0], [], []>} : vector<16x32xbf16>, vector<16x32xbf16>, vector<16x16xf32> -> vector<16x16xf32>
    %489 = arith.addf %488, %56 : vector<16x16xf32>
    %cst_157 = arith.constant dense<0xFF800000> : vector<16xf32>
    %490 = vector.multi_reduction <maximumf>, %489, %cst_157 [1] : vector<16x16xf32> to vector<16xf32>
    %491 = vector.shape_cast %490 : vector<16xf32> to vector<16x1xf32>
    %492 = vector.broadcast %491 : vector<16x1xf32> to vector<16x16xf32>
    %493 = arith.subf %489, %492 : vector<16x16xf32>
    %494 = math.exp %493 : vector<16x16xf32>
    %cst_158 = arith.constant dense<0.000000e+00> : vector<16x1xf32>
    %495 = tpu.matmul %494, %106, %cst_158 {dimension_numbers = #tpu.dot_dimension_numbers<[1], [0], [0], [1], [0, 0, 1, 1], [], []>} : vector<16x16xf32>, vector<16x1xf32>, vector<16x1xf32> -> vector<16x1xf32>
    %496 = vector.broadcast %104 : vector<1x32xf32> to vector<16x32xf32>
    %497 = arith.mulf %424, %496 : vector<16x32xf32>
    %498 = arith.truncf %497 : vector<16x32xf32> to vector<16x32xbf16>
    %499 = arith.truncf %494 : vector<16x16xf32> to vector<16x16xbf16>
    %cst_159 = arith.constant dense<0.000000e+00> : vector<16x32xf32>
    %500 = tpu.matmul %499, %498, %cst_159 {dimension_numbers = #tpu.dot_dimension_numbers<[1], [0], [0], [1], [0, 0, 1, 1], [], []>} : vector<16x16xbf16>, vector<16x32xbf16>, vector<16x32xf32> -> vector<16x32xf32>
    %501 = tpu.reciprocal %495 {approx = true} : vector<16x1xf32> -> vector<16x1xf32>
    %502 = vector.broadcast %501 : vector<16x1xf32> to vector<16x32xf32>
    %503 = arith.mulf %500, %502 : vector<16x32xf32>
    %504 = arith.addf %484, %503 : vector<16x32xf32>
    %505 = arith.truncf %504 : vector<16x32xf32> to vector<16x32xbf16>
    %506 = vector.extract_strided_slice %412 {offsets = [0, 96], sizes = [32, 32], strides = [1, 1]} : vector<32x128xbf16> to vector<32x32xbf16>
    %cst_160 = arith.constant dense<0.000000e+00> : vector<16x32xf32>
    %507 = tpu.matmul %505, %506, %cst_160 {dimension_numbers = #tpu.dot_dimension_numbers<[1], [0], [0], [1], [0, 0, 1, 1], [], []>} : vector<16x32xbf16>, vector<32x32xbf16>, vector<16x32xf32> -> vector<16x32xf32>
    %508 = vector.extract_strided_slice %414 {offsets = [96], sizes = [32], strides = [1]} : vector<128xf32> to vector<32xf32>
    %509 = vector.shape_cast %508 : vector<32xf32> to vector<1x32xf32>
    %510 = vector.broadcast %509 : vector<1x32xf32> to vector<16x32xf32>
    %511 = arith.addf %507, %510 : vector<16x32xf32>
    %512 = arith.addf %410, %511 : vector<16x32xf32>
    %c1_161 = arith.constant 1 : index
    %c0_162 = arith.constant 0 : index
    %c0_163 = arith.constant 0 : index
    %513 = vector.load %arg8[%c1_161, %c0_162, %c0_163] : memref<2x6x32xf32, #tpu.memory_space<vmem>>, vector<1x1x32xf32>
    %514 = vector.shape_cast %513 : vector<1x1x32xf32> to vector<32xf32>
    %c1_164 = arith.constant 1 : index
    %c1_165 = arith.constant 1 : index
    %c0_166 = arith.constant 0 : index
    %515 = vector.load %arg8[%c1_164, %c1_165, %c0_166] : memref<2x6x32xf32, #tpu.memory_space<vmem>>, vector<1x1x32xf32>
    %516 = vector.shape_cast %515 : vector<1x1x32xf32> to vector<32xf32>
    %cst_167 = arith.constant dense<0.000000e+00> : vector<16x1xf32>
    %517 = tpu.matmul %512, %105, %cst_167 {dimension_numbers = #tpu.dot_dimension_numbers<[1], [0], [0], [1], [0, 0, 1, 1], [], []>} : vector<16x32xf32>, vector<32x1xf32>, vector<16x1xf32> -> vector<16x1xf32>
    %cst_168 = arith.constant 3.125000e-02 : f32
    %518 = vector.broadcast %cst_168 : f32 to vector<16x1xf32>
    %519 = arith.mulf %517, %518 : vector<16x1xf32>
    %520 = vector.broadcast %519 : vector<16x1xf32> to vector<16x32xf32>
    %521 = arith.subf %512, %520 : vector<16x32xf32>
    %522 = arith.mulf %521, %521 : vector<16x32xf32>
    %cst_169 = arith.constant dense<0.000000e+00> : vector<16x1xf32>
    %523 = tpu.matmul %522, %105, %cst_169 {dimension_numbers = #tpu.dot_dimension_numbers<[1], [0], [0], [1], [0, 0, 1, 1], [], []>} : vector<16x32xf32>, vector<32x1xf32>, vector<16x1xf32> -> vector<16x1xf32>
    %cst_170 = arith.constant 3.125000e-02 : f32
    %524 = vector.broadcast %cst_170 : f32 to vector<16x1xf32>
    %525 = arith.mulf %523, %524 : vector<16x1xf32>
    %cst_171 = arith.constant 9.99999974E-6 : f32
    %526 = vector.broadcast %cst_171 : f32 to vector<16x1xf32>
    %527 = arith.addf %525, %526 : vector<16x1xf32>
    %528 = math.rsqrt %527 : vector<16x1xf32>
    %529 = vector.broadcast %528 : vector<16x1xf32> to vector<16x32xf32>
    %530 = arith.mulf %521, %529 : vector<16x32xf32>
    %531 = vector.shape_cast %514 : vector<32xf32> to vector<1x32xf32>
    %532 = vector.broadcast %531 : vector<1x32xf32> to vector<16x32xf32>
    %533 = arith.mulf %530, %532 : vector<16x32xf32>
    %534 = vector.shape_cast %516 : vector<32xf32> to vector<1x32xf32>
    %535 = vector.broadcast %534 : vector<1x32xf32> to vector<16x32xf32>
    %536 = arith.addf %533, %535 : vector<16x32xf32>
    %c1_172 = arith.constant 1 : index
    %c1_173 = arith.constant 1 : index
    %c0_174 = arith.constant 0 : index
    %c0_175 = arith.constant 0 : index
    %537 = vector.load %arg2[%c1_172, %c1_173, %c0_174, %c0_175] : memref<2x2x32x128xbf16, #tpu.memory_space<vmem>>, vector<1x1x32x128xbf16>
    %538 = vector.shape_cast %537 : vector<1x1x32x128xbf16> to vector<32x128xbf16>
    %c1_176 = arith.constant 1 : index
    %c1_177 = arith.constant 1 : index
    %c0_178 = arith.constant 0 : index
    %539 = vector.load %arg3[%c1_176, %c1_177, %c0_178] : memref<2x2x128xf32, #tpu.memory_space<vmem>>, vector<1x1x128xf32>
    %540 = vector.shape_cast %539 : vector<1x1x128xf32> to vector<128xf32>
    %541 = arith.truncf %536 : vector<16x32xf32> to vector<16x32xbf16>
    %542 = vector.extract_strided_slice %538 {offsets = [0, 0], sizes = [32, 32], strides = [1, 1]} : vector<32x128xbf16> to vector<32x32xbf16>
    %cst_179 = arith.constant dense<0.000000e+00> : vector<16x32xf32>
    %543 = tpu.matmul %541, %542, %cst_179 {dimension_numbers = #tpu.dot_dimension_numbers<[1], [0], [0], [1], [0, 0, 1, 1], [], []>} : vector<16x32xbf16>, vector<32x32xbf16>, vector<16x32xf32> -> vector<16x32xf32>
    %544 = vector.extract_strided_slice %540 {offsets = [0], sizes = [32], strides = [1]} : vector<128xf32> to vector<32xf32>
    %545 = vector.shape_cast %544 : vector<32xf32> to vector<1x32xf32>
    %546 = vector.broadcast %545 : vector<1x32xf32> to vector<16x32xf32>
    %547 = arith.addf %543, %546 : vector<16x32xf32>
    %548 = arith.truncf %1 : vector<16x32xf32> to vector<16x32xbf16>
    %549 = vector.extract_strided_slice %538 {offsets = [0, 32], sizes = [32, 64], strides = [1, 1]} : vector<32x128xbf16> to vector<32x64xbf16>
    %cst_180 = arith.constant dense<0.000000e+00> : vector<16x64xf32>
    %550 = tpu.matmul %548, %549, %cst_180 {dimension_numbers = #tpu.dot_dimension_numbers<[1], [0], [0], [1], [0, 0, 1, 1], [], []>} : vector<16x32xbf16>, vector<32x64xbf16>, vector<16x64xf32> -> vector<16x64xf32>
    %551 = vector.extract_strided_slice %540 {offsets = [32], sizes = [64], strides = [1]} : vector<128xf32> to vector<64xf32>
    %552 = vector.shape_cast %551 : vector<64xf32> to vector<1x64xf32>
    %553 = vector.broadcast %552 : vector<1x64xf32> to vector<16x64xf32>
    %554 = arith.addf %550, %553 : vector<16x64xf32>
    %555 = vector.extract_strided_slice %554 {offsets = [0, 0], sizes = [16, 32], strides = [1, 1]} : vector<16x64xf32> to vector<16x32xf32>
    %556 = vector.extract_strided_slice %554 {offsets = [0, 32], sizes = [16, 32], strides = [1, 1]} : vector<16x64xf32> to vector<16x32xf32>
    %557 = arith.truncf %555 : vector<16x32xf32> to vector<16x32xbf16>
    %558 = vector.broadcast %68 : vector<1x32xf32> to vector<16x32xf32>
    %559 = arith.mulf %547, %558 : vector<16x32xf32>
    %560 = arith.truncf %559 : vector<16x32xf32> to vector<16x32xbf16>
    %cst_181 = arith.constant dense<0.000000e+00> : vector<16x16xf32>
    %561 = tpu.matmul %560, %557, %cst_181 {dimension_numbers = #tpu.dot_dimension_numbers<[1], [1], [0], [0], [0, 0, 1, 0], [], []>} : vector<16x32xbf16>, vector<16x32xbf16>, vector<16x16xf32> -> vector<16x16xf32>
    %562 = arith.addf %561, %59 : vector<16x16xf32>
    %cst_182 = arith.constant dense<0xFF800000> : vector<16xf32>
    %563 = vector.multi_reduction <maximumf>, %562, %cst_182 [1] : vector<16x16xf32> to vector<16xf32>
    %564 = vector.shape_cast %563 : vector<16xf32> to vector<16x1xf32>
    %565 = vector.broadcast %564 : vector<16x1xf32> to vector<16x16xf32>
    %566 = arith.subf %562, %565 : vector<16x16xf32>
    %567 = math.exp %566 : vector<16x16xf32>
    %cst_183 = arith.constant dense<0.000000e+00> : vector<16x1xf32>
    %568 = tpu.matmul %567, %107, %cst_183 {dimension_numbers = #tpu.dot_dimension_numbers<[1], [0], [0], [1], [0, 0, 1, 1], [], []>} : vector<16x16xf32>, vector<16x1xf32>, vector<16x1xf32> -> vector<16x1xf32>
    %569 = vector.broadcast %71 : vector<1x32xf32> to vector<16x32xf32>
    %570 = arith.mulf %556, %569 : vector<16x32xf32>
    %571 = arith.truncf %570 : vector<16x32xf32> to vector<16x32xbf16>
    %572 = arith.truncf %567 : vector<16x16xf32> to vector<16x16xbf16>
    %cst_184 = arith.constant dense<0.000000e+00> : vector<16x32xf32>
    %573 = tpu.matmul %572, %571, %cst_184 {dimension_numbers = #tpu.dot_dimension_numbers<[1], [0], [0], [1], [0, 0, 1, 1], [], []>} : vector<16x16xbf16>, vector<16x32xbf16>, vector<16x32xf32> -> vector<16x32xf32>
    %574 = tpu.reciprocal %568 {approx = true} : vector<16x1xf32> -> vector<16x1xf32>
    %575 = vector.broadcast %574 : vector<16x1xf32> to vector<16x32xf32>
    %576 = arith.mulf %573, %575 : vector<16x32xf32>
    %577 = vector.broadcast %79 : vector<1x32xf32> to vector<16x32xf32>
    %578 = arith.mulf %547, %577 : vector<16x32xf32>
    %579 = arith.truncf %578 : vector<16x32xf32> to vector<16x32xbf16>
    %cst_185 = arith.constant dense<0.000000e+00> : vector<16x16xf32>
    %580 = tpu.matmul %579, %557, %cst_185 {dimension_numbers = #tpu.dot_dimension_numbers<[1], [1], [0], [0], [0, 0, 1, 0], [], []>} : vector<16x32xbf16>, vector<16x32xbf16>, vector<16x16xf32> -> vector<16x16xf32>
    %581 = arith.addf %580, %59 : vector<16x16xf32>
    %cst_186 = arith.constant dense<0xFF800000> : vector<16xf32>
    %582 = vector.multi_reduction <maximumf>, %581, %cst_186 [1] : vector<16x16xf32> to vector<16xf32>
    %583 = vector.shape_cast %582 : vector<16xf32> to vector<16x1xf32>
    %584 = vector.broadcast %583 : vector<16x1xf32> to vector<16x16xf32>
    %585 = arith.subf %581, %584 : vector<16x16xf32>
    %586 = math.exp %585 : vector<16x16xf32>
    %cst_187 = arith.constant dense<0.000000e+00> : vector<16x1xf32>
    %587 = tpu.matmul %586, %107, %cst_187 {dimension_numbers = #tpu.dot_dimension_numbers<[1], [0], [0], [1], [0, 0, 1, 1], [], []>} : vector<16x16xf32>, vector<16x1xf32>, vector<16x1xf32> -> vector<16x1xf32>
    %588 = vector.broadcast %82 : vector<1x32xf32> to vector<16x32xf32>
    %589 = arith.mulf %556, %588 : vector<16x32xf32>
    %590 = arith.truncf %589 : vector<16x32xf32> to vector<16x32xbf16>
    %591 = arith.truncf %586 : vector<16x16xf32> to vector<16x16xbf16>
    %cst_188 = arith.constant dense<0.000000e+00> : vector<16x32xf32>
    %592 = tpu.matmul %591, %590, %cst_188 {dimension_numbers = #tpu.dot_dimension_numbers<[1], [0], [0], [1], [0, 0, 1, 1], [], []>} : vector<16x16xbf16>, vector<16x32xbf16>, vector<16x32xf32> -> vector<16x32xf32>
    %593 = tpu.reciprocal %587 {approx = true} : vector<16x1xf32> -> vector<16x1xf32>
    %594 = vector.broadcast %593 : vector<16x1xf32> to vector<16x32xf32>
    %595 = arith.mulf %592, %594 : vector<16x32xf32>
    %596 = arith.addf %576, %595 : vector<16x32xf32>
    %597 = vector.broadcast %90 : vector<1x32xf32> to vector<16x32xf32>
    %598 = arith.mulf %547, %597 : vector<16x32xf32>
    %599 = arith.truncf %598 : vector<16x32xf32> to vector<16x32xbf16>
    %cst_189 = arith.constant dense<0.000000e+00> : vector<16x16xf32>
    %600 = tpu.matmul %599, %557, %cst_189 {dimension_numbers = #tpu.dot_dimension_numbers<[1], [1], [0], [0], [0, 0, 1, 0], [], []>} : vector<16x32xbf16>, vector<16x32xbf16>, vector<16x16xf32> -> vector<16x16xf32>
    %601 = arith.addf %600, %59 : vector<16x16xf32>
    %cst_190 = arith.constant dense<0xFF800000> : vector<16xf32>
    %602 = vector.multi_reduction <maximumf>, %601, %cst_190 [1] : vector<16x16xf32> to vector<16xf32>
    %603 = vector.shape_cast %602 : vector<16xf32> to vector<16x1xf32>
    %604 = vector.broadcast %603 : vector<16x1xf32> to vector<16x16xf32>
    %605 = arith.subf %601, %604 : vector<16x16xf32>
    %606 = math.exp %605 : vector<16x16xf32>
    %cst_191 = arith.constant dense<0.000000e+00> : vector<16x1xf32>
    %607 = tpu.matmul %606, %107, %cst_191 {dimension_numbers = #tpu.dot_dimension_numbers<[1], [0], [0], [1], [0, 0, 1, 1], [], []>} : vector<16x16xf32>, vector<16x1xf32>, vector<16x1xf32> -> vector<16x1xf32>
    %608 = vector.broadcast %93 : vector<1x32xf32> to vector<16x32xf32>
    %609 = arith.mulf %556, %608 : vector<16x32xf32>
    %610 = arith.truncf %609 : vector<16x32xf32> to vector<16x32xbf16>
    %611 = arith.truncf %606 : vector<16x16xf32> to vector<16x16xbf16>
    %cst_192 = arith.constant dense<0.000000e+00> : vector<16x32xf32>
    %612 = tpu.matmul %611, %610, %cst_192 {dimension_numbers = #tpu.dot_dimension_numbers<[1], [0], [0], [1], [0, 0, 1, 1], [], []>} : vector<16x16xbf16>, vector<16x32xbf16>, vector<16x32xf32> -> vector<16x32xf32>
    %613 = tpu.reciprocal %607 {approx = true} : vector<16x1xf32> -> vector<16x1xf32>
    %614 = vector.broadcast %613 : vector<16x1xf32> to vector<16x32xf32>
    %615 = arith.mulf %612, %614 : vector<16x32xf32>
    %616 = arith.addf %596, %615 : vector<16x32xf32>
    %617 = vector.broadcast %101 : vector<1x32xf32> to vector<16x32xf32>
    %618 = arith.mulf %547, %617 : vector<16x32xf32>
    %619 = arith.truncf %618 : vector<16x32xf32> to vector<16x32xbf16>
    %cst_193 = arith.constant dense<0.000000e+00> : vector<16x16xf32>
    %620 = tpu.matmul %619, %557, %cst_193 {dimension_numbers = #tpu.dot_dimension_numbers<[1], [1], [0], [0], [0, 0, 1, 0], [], []>} : vector<16x32xbf16>, vector<16x32xbf16>, vector<16x16xf32> -> vector<16x16xf32>
    %621 = arith.addf %620, %59 : vector<16x16xf32>
    %cst_194 = arith.constant dense<0xFF800000> : vector<16xf32>
    %622 = vector.multi_reduction <maximumf>, %621, %cst_194 [1] : vector<16x16xf32> to vector<16xf32>
    %623 = vector.shape_cast %622 : vector<16xf32> to vector<16x1xf32>
    %624 = vector.broadcast %623 : vector<16x1xf32> to vector<16x16xf32>
    %625 = arith.subf %621, %624 : vector<16x16xf32>
    %626 = math.exp %625 : vector<16x16xf32>
    %cst_195 = arith.constant dense<0.000000e+00> : vector<16x1xf32>
    %627 = tpu.matmul %626, %107, %cst_195 {dimension_numbers = #tpu.dot_dimension_numbers<[1], [0], [0], [1], [0, 0, 1, 1], [], []>} : vector<16x16xf32>, vector<16x1xf32>, vector<16x1xf32> -> vector<16x1xf32>
    %628 = vector.broadcast %104 : vector<1x32xf32> to vector<16x32xf32>
    %629 = arith.mulf %556, %628 : vector<16x32xf32>
    %630 = arith.truncf %629 : vector<16x32xf32> to vector<16x32xbf16>
    %631 = arith.truncf %626 : vector<16x16xf32> to vector<16x16xbf16>
    %cst_196 = arith.constant dense<0.000000e+00> : vector<16x32xf32>
    %632 = tpu.matmul %631, %630, %cst_196 {dimension_numbers = #tpu.dot_dimension_numbers<[1], [0], [0], [1], [0, 0, 1, 1], [], []>} : vector<16x16xbf16>, vector<16x32xbf16>, vector<16x32xf32> -> vector<16x32xf32>
    %633 = tpu.reciprocal %627 {approx = true} : vector<16x1xf32> -> vector<16x1xf32>
    %634 = vector.broadcast %633 : vector<16x1xf32> to vector<16x32xf32>
    %635 = arith.mulf %632, %634 : vector<16x32xf32>
    %636 = arith.addf %616, %635 : vector<16x32xf32>
    %637 = arith.truncf %636 : vector<16x32xf32> to vector<16x32xbf16>
    %638 = vector.extract_strided_slice %538 {offsets = [0, 96], sizes = [32, 32], strides = [1, 1]} : vector<32x128xbf16> to vector<32x32xbf16>
    %cst_197 = arith.constant dense<0.000000e+00> : vector<16x32xf32>
    %639 = tpu.matmul %637, %638, %cst_197 {dimension_numbers = #tpu.dot_dimension_numbers<[1], [0], [0], [1], [0, 0, 1, 1], [], []>} : vector<16x32xbf16>, vector<32x32xbf16>, vector<16x32xf32> -> vector<16x32xf32>
    %640 = vector.extract_strided_slice %540 {offsets = [96], sizes = [32], strides = [1]} : vector<128xf32> to vector<32xf32>
    %641 = vector.shape_cast %640 : vector<32xf32> to vector<1x32xf32>
    %642 = vector.broadcast %641 : vector<1x32xf32> to vector<16x32xf32>
    %643 = arith.addf %639, %642 : vector<16x32xf32>
    %644 = arith.addf %536, %643 : vector<16x32xf32>
    %c1_198 = arith.constant 1 : index
    %c2_199 = arith.constant 2 : index
    %c0_200 = arith.constant 0 : index
    %645 = vector.load %arg8[%c1_198, %c2_199, %c0_200] : memref<2x6x32xf32, #tpu.memory_space<vmem>>, vector<1x1x32xf32>
    %646 = vector.shape_cast %645 : vector<1x1x32xf32> to vector<32xf32>
    %c1_201 = arith.constant 1 : index
    %c3_202 = arith.constant 3 : index
    %c0_203 = arith.constant 0 : index
    %647 = vector.load %arg8[%c1_201, %c3_202, %c0_203] : memref<2x6x32xf32, #tpu.memory_space<vmem>>, vector<1x1x32xf32>
    %648 = vector.shape_cast %647 : vector<1x1x32xf32> to vector<32xf32>
    %cst_204 = arith.constant dense<0.000000e+00> : vector<16x1xf32>
    %649 = tpu.matmul %644, %105, %cst_204 {dimension_numbers = #tpu.dot_dimension_numbers<[1], [0], [0], [1], [0, 0, 1, 1], [], []>} : vector<16x32xf32>, vector<32x1xf32>, vector<16x1xf32> -> vector<16x1xf32>
    %cst_205 = arith.constant 3.125000e-02 : f32
    %650 = vector.broadcast %cst_205 : f32 to vector<16x1xf32>
    %651 = arith.mulf %649, %650 : vector<16x1xf32>
    %652 = vector.broadcast %651 : vector<16x1xf32> to vector<16x32xf32>
    %653 = arith.subf %644, %652 : vector<16x32xf32>
    %654 = arith.mulf %653, %653 : vector<16x32xf32>
    %cst_206 = arith.constant dense<0.000000e+00> : vector<16x1xf32>
    %655 = tpu.matmul %654, %105, %cst_206 {dimension_numbers = #tpu.dot_dimension_numbers<[1], [0], [0], [1], [0, 0, 1, 1], [], []>} : vector<16x32xf32>, vector<32x1xf32>, vector<16x1xf32> -> vector<16x1xf32>
    %cst_207 = arith.constant 3.125000e-02 : f32
    %656 = vector.broadcast %cst_207 : f32 to vector<16x1xf32>
    %657 = arith.mulf %655, %656 : vector<16x1xf32>
    %cst_208 = arith.constant 9.99999974E-6 : f32
    %658 = vector.broadcast %cst_208 : f32 to vector<16x1xf32>
    %659 = arith.addf %657, %658 : vector<16x1xf32>
    %660 = math.rsqrt %659 : vector<16x1xf32>
    %661 = vector.broadcast %660 : vector<16x1xf32> to vector<16x32xf32>
    %662 = arith.mulf %653, %661 : vector<16x32xf32>
    %663 = vector.shape_cast %646 : vector<32xf32> to vector<1x32xf32>
    %664 = vector.broadcast %663 : vector<1x32xf32> to vector<16x32xf32>
    %665 = arith.mulf %662, %664 : vector<16x32xf32>
    %666 = vector.shape_cast %648 : vector<32xf32> to vector<1x32xf32>
    %667 = vector.broadcast %666 : vector<1x32xf32> to vector<16x32xf32>
    %668 = arith.addf %665, %667 : vector<16x32xf32>
    %669 = arith.truncf %668 : vector<16x32xf32> to vector<16x32xbf16>
    %c1_209 = arith.constant 1 : index
    %c0_210 = arith.constant 0 : index
    %c0_211 = arith.constant 0 : index
    %670 = vector.load %arg4[%c1_209, %c0_210, %c0_211] : memref<2x32x64xbf16, #tpu.memory_space<vmem>>, vector<1x32x64xbf16>
    %671 = vector.shape_cast %670 : vector<1x32x64xbf16> to vector<32x64xbf16>
    %cst_212 = arith.constant dense<0.000000e+00> : vector<16x64xf32>
    %672 = tpu.matmul %669, %671, %cst_212 {dimension_numbers = #tpu.dot_dimension_numbers<[1], [0], [0], [1], [0, 0, 1, 1], [], []>} : vector<16x32xbf16>, vector<32x64xbf16>, vector<16x64xf32> -> vector<16x64xf32>
    %c1_213 = arith.constant 1 : index
    %c0_214 = arith.constant 0 : index
    %673 = vector.load %arg6[%c1_213, %c0_214] : memref<2x64xf32, #tpu.memory_space<vmem>>, vector<1x64xf32>
    %674 = vector.shape_cast %673 : vector<1x64xf32> to vector<64xf32>
    %675 = vector.shape_cast %674 : vector<64xf32> to vector<1x64xf32>
    %676 = vector.broadcast %675 : vector<1x64xf32> to vector<16x64xf32>
    %677 = arith.addf %672, %676 : vector<16x64xf32>
    %cst_215 = arith.constant 0.000000e+00 : f32
    %678 = vector.broadcast %cst_215 : f32 to vector<16x64xf32>
    %679 = arith.maximumf %677, %678 : vector<16x64xf32>
    %680 = arith.truncf %679 : vector<16x64xf32> to vector<16x64xbf16>
    %c1_216 = arith.constant 1 : index
    %c0_217 = arith.constant 0 : index
    %c0_218 = arith.constant 0 : index
    %681 = vector.load %arg5[%c1_216, %c0_217, %c0_218] : memref<2x64x32xbf16, #tpu.memory_space<vmem>>, vector<1x64x32xbf16>
    %682 = vector.shape_cast %681 : vector<1x64x32xbf16> to vector<64x32xbf16>
    %cst_219 = arith.constant dense<0.000000e+00> : vector<16x32xf32>
    %683 = tpu.matmul %680, %682, %cst_219 {dimension_numbers = #tpu.dot_dimension_numbers<[1], [0], [0], [1], [0, 0, 1, 1], [], []>} : vector<16x64xbf16>, vector<64x32xbf16>, vector<16x32xf32> -> vector<16x32xf32>
    %c1_220 = arith.constant 1 : index
    %c0_221 = arith.constant 0 : index
    %684 = vector.load %arg7[%c1_220, %c0_221] : memref<2x32xf32, #tpu.memory_space<vmem>>, vector<1x32xf32>
    %685 = vector.shape_cast %684 : vector<1x32xf32> to vector<32xf32>
    %686 = vector.shape_cast %685 : vector<32xf32> to vector<1x32xf32>
    %687 = vector.broadcast %686 : vector<1x32xf32> to vector<16x32xf32>
    %688 = arith.addf %683, %687 : vector<16x32xf32>
    %689 = arith.addf %668, %688 : vector<16x32xf32>
    %c1_222 = arith.constant 1 : index
    %c4_223 = arith.constant 4 : index
    %c0_224 = arith.constant 0 : index
    %690 = vector.load %arg8[%c1_222, %c4_223, %c0_224] : memref<2x6x32xf32, #tpu.memory_space<vmem>>, vector<1x1x32xf32>
    %691 = vector.shape_cast %690 : vector<1x1x32xf32> to vector<32xf32>
    %c1_225 = arith.constant 1 : index
    %c5_226 = arith.constant 5 : index
    %c0_227 = arith.constant 0 : index
    %692 = vector.load %arg8[%c1_225, %c5_226, %c0_227] : memref<2x6x32xf32, #tpu.memory_space<vmem>>, vector<1x1x32xf32>
    %693 = vector.shape_cast %692 : vector<1x1x32xf32> to vector<32xf32>
    %cst_228 = arith.constant dense<0.000000e+00> : vector<16x1xf32>
    %694 = tpu.matmul %689, %105, %cst_228 {dimension_numbers = #tpu.dot_dimension_numbers<[1], [0], [0], [1], [0, 0, 1, 1], [], []>} : vector<16x32xf32>, vector<32x1xf32>, vector<16x1xf32> -> vector<16x1xf32>
    %cst_229 = arith.constant 3.125000e-02 : f32
    %695 = vector.broadcast %cst_229 : f32 to vector<16x1xf32>
    %696 = arith.mulf %694, %695 : vector<16x1xf32>
    %697 = vector.broadcast %696 : vector<16x1xf32> to vector<16x32xf32>
    %698 = arith.subf %689, %697 : vector<16x32xf32>
    %699 = arith.mulf %698, %698 : vector<16x32xf32>
    %cst_230 = arith.constant dense<0.000000e+00> : vector<16x1xf32>
    %700 = tpu.matmul %699, %105, %cst_230 {dimension_numbers = #tpu.dot_dimension_numbers<[1], [0], [0], [1], [0, 0, 1, 1], [], []>} : vector<16x32xf32>, vector<32x1xf32>, vector<16x1xf32> -> vector<16x1xf32>
    %cst_231 = arith.constant 3.125000e-02 : f32
    %701 = vector.broadcast %cst_231 : f32 to vector<16x1xf32>
    %702 = arith.mulf %700, %701 : vector<16x1xf32>
    %cst_232 = arith.constant 9.99999974E-6 : f32
    %703 = vector.broadcast %cst_232 : f32 to vector<16x1xf32>
    %704 = arith.addf %702, %703 : vector<16x1xf32>
    %705 = math.rsqrt %704 : vector<16x1xf32>
    %706 = vector.broadcast %705 : vector<16x1xf32> to vector<16x32xf32>
    %707 = arith.mulf %698, %706 : vector<16x32xf32>
    %708 = vector.shape_cast %691 : vector<32xf32> to vector<1x32xf32>
    %709 = vector.broadcast %708 : vector<1x32xf32> to vector<16x32xf32>
    %710 = arith.mulf %707, %709 : vector<16x32xf32>
    %711 = vector.shape_cast %693 : vector<32xf32> to vector<1x32xf32>
    %712 = vector.broadcast %711 : vector<1x32xf32> to vector<16x32xf32>
    %713 = arith.addf %710, %712 : vector<16x32xf32>
    %c0_233 = arith.constant 0 : index
    %c0_234 = arith.constant 0 : index
    %714 = vector.load %arg9[%c0_233, %c0_234] : memref<2x32xf32, #tpu.memory_space<vmem>>, vector<2x32xf32>
    %715 = vector.extract_strided_slice %714 {offsets = [0, 0], sizes = [1, 32], strides = [1, 1]} : vector<2x32xf32> to vector<1x32xf32>
    %716 = vector.shape_cast %715 : vector<1x32xf32> to vector<32xf32>
    %717 = vector.extract_strided_slice %714 {offsets = [1, 0], sizes = [1, 32], strides = [1, 1]} : vector<2x32xf32> to vector<1x32xf32>
    %718 = vector.shape_cast %717 : vector<1x32xf32> to vector<32xf32>
    %cst_235 = arith.constant dense<0.000000e+00> : vector<16x1xf32>
    %719 = tpu.matmul %713, %105, %cst_235 {dimension_numbers = #tpu.dot_dimension_numbers<[1], [0], [0], [1], [0, 0, 1, 1], [], []>} : vector<16x32xf32>, vector<32x1xf32>, vector<16x1xf32> -> vector<16x1xf32>
    %cst_236 = arith.constant 3.125000e-02 : f32
    %720 = vector.broadcast %cst_236 : f32 to vector<16x1xf32>
    %721 = arith.mulf %719, %720 : vector<16x1xf32>
    %722 = vector.broadcast %721 : vector<16x1xf32> to vector<16x32xf32>
    %723 = arith.subf %713, %722 : vector<16x32xf32>
    %724 = arith.mulf %723, %723 : vector<16x32xf32>
    %cst_237 = arith.constant dense<0.000000e+00> : vector<16x1xf32>
    %725 = tpu.matmul %724, %105, %cst_237 {dimension_numbers = #tpu.dot_dimension_numbers<[1], [0], [0], [1], [0, 0, 1, 1], [], []>} : vector<16x32xf32>, vector<32x1xf32>, vector<16x1xf32> -> vector<16x1xf32>
    %cst_238 = arith.constant 3.125000e-02 : f32
    %726 = vector.broadcast %cst_238 : f32 to vector<16x1xf32>
    %727 = arith.mulf %725, %726 : vector<16x1xf32>
    %cst_239 = arith.constant 9.99999974E-6 : f32
    %728 = vector.broadcast %cst_239 : f32 to vector<16x1xf32>
    %729 = arith.addf %727, %728 : vector<16x1xf32>
    %730 = math.rsqrt %729 : vector<16x1xf32>
    %731 = vector.broadcast %730 : vector<16x1xf32> to vector<16x32xf32>
    %732 = arith.mulf %723, %731 : vector<16x32xf32>
    %733 = vector.shape_cast %716 : vector<32xf32> to vector<1x32xf32>
    %734 = vector.broadcast %733 : vector<1x32xf32> to vector<16x32xf32>
    %735 = arith.mulf %732, %734 : vector<16x32xf32>
    %736 = vector.shape_cast %718 : vector<32xf32> to vector<1x32xf32>
    %737 = vector.broadcast %736 : vector<1x32xf32> to vector<16x32xf32>
    %738 = arith.addf %735, %737 : vector<16x32xf32>
    %c0_240 = arith.constant 0 : index
    %c0_241 = arith.constant 0 : index
    %739 = vector.load %arg10[%c0_240, %c0_241] : memref<16x32xf32, #tpu.memory_space<vmem>>, vector<16x32xf32>
    tpu.vector_store %arg10[%c0_240, %c0_241], %738 {strides = array<i32>} : memref<16x32xf32, #tpu.memory_space<vmem>>, vector<16x32xf32>,
    return
  }
}

</mosaic_0001>

<bundles_post_ra>
// kernel: tpu_custom_call.1
= control target key start
LH: loop header
LB: loop body
LE: loop exit
PB: predicated region body
PF: predicated region fallthrough
CT: control target
= control target key end

     0   :  { %15 = vsyncpa [#allocation3], 0  ;;  %s4735_s0 = inlined_call_operand.hbm [shape: f32[16,32], index: 0, kind: input, shape index: {}]   ;;  %s4736_s1 = inlined_call_operand.hbm [shape: f32[16,32], index: 1, kind: input, shape index: {}]   ;;  %s4737_s2 = inlined_call_operand.vmem [shape: bf16[2,2,32,128], index: 2, kind: input, shape index: {}]   ;;  %s4738_s3 = inlined_call_operand.hbm [shape: f32[2,2,128], index: 3, kind: input, shape index: {}]   ;;  %s4739_s4 = inlined_call_operand.vmem [shape: bf16[2,32,64], index: 4, kind: input, shape index: {}]   ;;  %s4740_s5 = inlined_call_operand.vmem [shape: bf16[2,64,32], index: 5, kind: input, shape index: {}]   ;;  %s4741_s6 = inlined_call_operand.hbm [shape: f32[2,64], index: 6, kind: input, shape index: {}]   ;;  %s4742_s7 = inlined_call_operand.hbm [shape: f32[2,32], index: 7, kind: input, shape index: {}]   ;;  %s4743_s8 = inlined_call_operand.vmem [shape: f32[2,6,32], index: 8, kind: input, shape index: {}]   ;;  %s4744_s9 = inlined_call_operand.vmem [shape: f32[2,32], index: 9, kind: input, shape index: {}]   ;;  %s4745_s10 = inlined_call_operand.hbm [shape: f32[16,32], index: 10, kind: output, shape index: {}]  }
   0x1   :  { %16 = vsyncpa [#allocation6], 0 }
   0x2   :  { %17 = vsyncpa [#allocation9], 0 }
   0x3   :  { %18 = vsyncpa [#allocation4], 0  ;;  %s36_s15 = sshll.u32 %s4736_s1, 4  ;;  %s3784_s16 = smov [#allocation5]   ;;  %s37_s15 = int_to_ptr.hbm [resolvable:$true] %s36_s15 }
   0x4   :  { %s38_s17 = sshll.u32 %s3784_s16, 4  ;;  %s69_s20 = sshll.u32 %s4741_s6, 4  ;;  %s39_s17 = int_to_ptr.vmem [resolvable:$true] %s38_s17  ;;  %s70_s20 = int_to_ptr.hbm [resolvable:$true] %s69_s20 }
   0x5   :  { %s3785_s21 = smov 128   ;;  %s3786_s22 = smov 8  }
   0x6   :  { %44 = dma.hbm_to_vmem [thread:$0]  %s37_s15, 256, %s39_s17, [#allocation6], %s3785_s21, %s3785_s21, %s3786_s22  }
   0x7   :  { %s3787_s23 = smov [#allocation8]   ;;  %s23_s1 = sshll.u32 %s4735_s0, 4  ;;  %s24_s1 = int_to_ptr.hbm [resolvable:$true] %s23_s1 }
   0x8   :  { %s71_s24 = sshll.u32 %s3787_s23, 4  ;;  %s51_s6 = sshll.u32 %s4738_s3, 4  ;;  %s72_s24 = int_to_ptr.vmem [resolvable:$true] %s71_s24  ;;  %s52_s6 = int_to_ptr.hbm [resolvable:$true] %s51_s6 }
   0x9   :  { %74 = dma.hbm_to_vmem [thread:$0]  %s70_s20, 32, %s72_s24, [#allocation9]  }
   0xa   :  { %s3788_s29 = smov [#allocation2]   ;;  %s3789_s11 = smov [#allocation7]  }
   0xb   :  { %s25_s30 = sshll.u32 %s3788_s29, 4  ;;  %s53_s12 = sshll.u32 %s3789_s11, 4  ;;  %s26_s30 = int_to_ptr.vmem [resolvable:$true] %s25_s30  ;;  %s54_s12 = int_to_ptr.vmem [resolvable:$true] %s53_s12 }
   0xc   :  { %31 = dma.hbm_to_vmem [thread:$0]  %s24_s1, 256, %s26_s30, [#allocation3], %s3785_s21, %s3785_s21, %s3786_s22  }
   0xd   :  { %s3790_s13 = smov 32   ;;  %s3791_s0 = smov 2  }
   0xe   :  { %59 = dma.hbm_to_vmem [thread:$0]  %s52_s6, 64, %s54_s12, [#allocation6], %s3790_s13, %s3790_s13, %s3791_s0  }
   0xf   :  { %s80_s3 = sshll.u32 %s4742_s7, 4  ;;  %s3792_s16 = smov [#allocation10]   ;;  %s81_s3 = int_to_ptr.hbm [resolvable:$true] %s80_s3 }
  0x10   :  { %s82_s17 = sshll.u32 %s3792_s16, 4  ;;  %s83_s17 = int_to_ptr.vmem [resolvable:$true] %s82_s17 }
  0x11   :  { %85 = dma.hbm_to_vmem [thread:$0]  %s81_s3, 32, %s83_s17, [#allocation9]  }
  0x12   :  { %3776 = dma.done.wait [#allocation3], 256  }
  0x13   :  { %3777 = vsyncadd [#allocation3], 4294967040 }
  0x14   :  { %3778 = dma.done.wait [#allocation6], 320  }
  0x15   :  { %3779 = vsyncadd [#allocation6], 4294966976 }
  0x16   :  { %3780 = dma.done.wait [#allocation9], 64  }
  0x17   :  { %3781 = vsyncadd [#allocation9], 4294967232  ;;  %v3881_v0 = vld [vmem:[%s4737_s2 + $0x8] sm:$0xff]  ;;  %v3886_v1 = vld [vmem:[%s4737_s2] sm:$0xff]  ;;  %vm185_vm0 = vcmask 261120   ;;  %v3793_v5 = vmov 1.0   ;;  %v115_v12 = vlaneseq }
  0x18   :  { %v3888_v2 = vld [vmem:[#allocation2] sm:$0xff]  ;;  %v3890_v3 = vld [vmem:[#allocation2 + $0x8] sm:$0xff]  ;;  %195 = vmatpush.bf16.msra.mxu0 %v3881_v0  ;;  %263 = vmatpush.msra.mxu2 %v3793_v5  ;;  %s3794_s7 = smov 96   ;;  %v3795_v16 = vmov 0.0   ;;  %v3796_v28 = vmov -1e+30  }
  0x19   :  { %v171_v4 = vpack.c.bf16 %v3890_v3, %v3888_v2  ;;  %v3899_v7 = vld [vmem:[#allocation7] ss:$0 sm:$0xff]  ;;  %v3910_v13 = vand.u32 127, %v115_v12  ;;  %v116_v26 = vshrl.u32 %v115_v12, 7  ;;  %vm230_vm9 = vcmask 130048   ;;  %s3797_s24 = smov 64  }
  0x1a   :  { %264 = vmatpush.msra.mxu2 %v3793_v5  ;;  %s3799_s16 = smov [#allocation11]   ;;  %s3181_s19 = sshll.u32 %s4745_s10, 4  ;;  %s3182_s19 = int_to_ptr.hbm [resolvable:$true] %s3181_s19 }
  0x1b   :  { %vm127_vm1 = vcmp.lt.s32.totalorder %v3910_v13, 8  ;;  %vm156_vm2 = vcmp.ge.s32.totalorder %v3910_v13, 16  ;;  %vm157_vm3 = vcmp.lt.s32.totalorder %v3910_v13, 24  ;;  %vm144_vm5 = vcmp.le.s32.totalorder %v3910_v13, %v116_v26 }
  0x1c   :  { %196 = vmatpush.bf16.msra.mxu0 %v3886_v1  ;;  %v3921_v17 = vsel %vm127_vm1, 0.35355338, %v3795_v16  ;;  %vm3933_vm4 = vmand %vm156_vm2, %vm157_vm3  ;;  %v117_v27 = vadd.s32 8, %v116_v26  ;;  %vm137_vm7 = vcmp.ge.s32.totalorder %v3910_v13, 8  ;;  %vm138_vm8 = vcmp.lt.s32.totalorder %v3910_v13, 16 }
  0x1d   :  { %v3940_v22 = vsel %vm3933_vm4, 0.35355338, %v3795_v16  ;;  %vm146_vm6 = vmand %vm127_vm1, %vm144_vm5  ;;  %vm161_vm13 = vcmp.ge.s32.totalorder %v3910_v13, 24  ;;  %vm162_vm14 = vcmp.lt.s32.totalorder %v3910_v13, 32  ;;  %v3982_v39 = vsel %vm3933_vm4, 1.0, %v3795_v16 }
  0x1e   :  { %v3955_v29 = vsel %vm146_vm6, 0.0, %v3796_v28  ;;  %vm145_vm10 = vcmp.le.s32.totalorder %v3910_v13, %v117_v27  ;;  %vm3961_vm11 = vmand %vm137_vm7, %vm138_vm8  ;;  %v4002_v43 = vsel %vm127_vm1, 1.0, %v3795_v16 }
  0x1f   :  { %3204 = vmatmul.msk.bf16.vlgmr.msra.gmra.mxu0 %vm185_vm0, %v171_v4  ;;  %vm147_vm12 = vmand %vm3961_vm11, %vm145_vm10  ;;  %v3995_v42 = vsel %vm3961_vm11, 1.0, %v3795_v16  ;;  %v4025_v58 = vsel %vm3961_vm11, 0.35355338, %v3795_v16 }
  0x20   :  { %v3969_v34 = vsel %vm147_vm12, 0.0, %v3796_v28  ;;  %vm3975_vm15 = vmand %vm161_vm13, %vm162_vm14  ;;  %vm1488_vm14 = vcmask 523264  }
  0x21   :  { %v3987_v40 = vsel %vm3975_vm15, 1.0, %v3795_v16 }
  0x22   :  { %v3448_v41 = vpack.i.bf16 %v3987_v40, %v3982_v39 }
  0x9c   :  { %v198_v6 = vpop.f32.mrf.mxu0 }
  0x9d   :  { %v3902_v9 = vadd.f32 %v3899_v7, %v198_v6 }
  0x9f   :  { %v204_v19 = vmul.f32 %v3902_v9, %v3921_v17  ;;  %v421_v24 = vmul.f32 %v3902_v9, %v3940_v22  ;;  %v315_v63 = vmul.f32 %v3902_v9, %v4025_v58 }
  0xa4   :  { %v200_v8 = vpop.f32.mrf.mxu0 }
  0xa5   :  { %v3905_v10 = vadd.f32 %v3899_v7, %v200_v8 }
  0xa7   :  { %v203_v11 = vpack.c.bf16 %v3905_v10, %v3902_v9  ;;  %v205_v18 = vmul.f32 %v3905_v10, %v3921_v17  ;;  %v422_v23 = vmul.f32 %v3905_v10, %v3940_v22  ;;  %v316_v61 = vmul.f32 %v3905_v10, %v4025_v58 }
  0xa9   :  { %208 = vrot.lane.b32.xlu0 %v203_v11, %s3794_s7  ;;  %v206_v20 = vpack.c.bf16 %v205_v18, %v204_v19  ;;  %v423_v25 = vpack.c.bf16 %v422_v23, %v421_v24  ;;  %v317_v4 = vpack.c.bf16 %v316_v61, %v315_v63  ;;  %v3798_v19 = vmov 0  }
  0xaa   :  { %3453 = vset.pattern.permute.xlu1 %v3798_v19  ;;  %3454 = vset.pattern.permute.xlu2 %v3798_v19 }
  0xab   :  { %3455 = vset.pattern.permute.xlu0 %v3798_v19 }
 0x11b   :  { %v209_v14 = vpop.permute.xlu0 %208 }
 0x11c   :  { %v3914_v15 = vsel %vm185_vm0, %v209_v14, 0 }
 0x11d   :  { %223 = vmatpush.bf16.xpose.msra.mxu1 %v3914_v15  ;;  %328 = vmatpush.bf16.xpose.msrb.mxu2 %v3914_v15 }
 0x124   :  { %3205 = vmatmul.msk.bf16.vlgmr.msra.gmra.mxu1 %vm185_vm0, %v206_v20 }
 0x125   :  { %434 = vmatpush.bf16.xpose.msrb.mxu1 %v3914_v15 }
 0x12d   :  { %579 = vmatpush.msra.mxu1 %v3793_v5 }
 0x12f   :  { %580 = vmatpush.msra.mxu1 %v3793_v5 }
 0x134   :  { %3213 = vmatmul.msk.bf16.vlgmr.msrb.gmra.mxu1 %vm185_vm0, %v423_v25 }
 0x135   :  { %728 = vmatpush.msrb.mxu1 %v3793_v5 }
 0x137   :  { %729 = vmatpush.msrb.mxu1 %v3793_v5 }
 0x139   :  { %730 = vmatpush.msrb.mxu1 %v3793_v5 }
 0x13b   :  { %731 = vmatpush.msrb.mxu1 %v3793_v5 }
 0x1a1   :  { %v225_v30 = vpop.f32.mrf.mxu1 }
 0x1a2   :  { %v226_v31 = vadd.f32 %v225_v30, %v3955_v29 }
 0x1a4   :  { %v231_v33 = vsel %vm230_vm9, %v226_v31, -inf }
 0x1a5   :  { %232 = vmax.xlane.f32.xlu0 %v231_v33 }
 0x1a9   :  { %v227_v35 = vpop.f32.mrf.mxu1 }
 0x1aa   :  { %v228_v36 = vadd.f32 %v227_v35, %v3969_v34 }
 0x1ac   :  { %v234_v37 = vsel %vm230_vm9, %v228_v36, -inf }
 0x1ad   :  { %235 = vmax.xlane.f32.xlu1 %v234_v37 }
 0x1b1   :  { %v436_v44 = vpop.f32.mrf.mxu1 }
 0x1b2   :  { %v437_v45 = vadd.f32 %v436_v44, %v3955_v29 }
 0x1b4   :  { %v441_v46 = vsel %vm230_vm9, %v437_v45, -inf }
 0x1b9   :  { %3449 = vrot.lane.b32.xlu0 %v3448_v41, %s3797_s24 }
 0x1c6   :  { %377 = vrot.lane.b32.xlu1 %v3995_v42, %s3797_s24 }
 0x1ce   :  { %273 = vrot.lane.b32.xlu1 %v4002_v43, %s3797_s24 }
 0x1f8   :  { %442 = vmax.xlane.f32.xlu1 %v441_v46 }
 0x218   :  { %v233_v47 = vpop.xlane.xlu0 %232 }
 0x219   :  { %v237_v48 = vsub.f32 %v226_v31, %v233_v47 }
 0x21b   :  { %v239_v49 = vmul.f32 1.442695, %v237_v48 }
 0x21d   :  { %3476 = vpow2.f32 %v239_v49 }
 0x220   :  { %v236_v50 = vpop.xlane.xlu1 %235 }
 0x221   :  { %v238_v51 = vsub.f32 %v228_v36, %v236_v50 }
 0x223   :  { %v4008_v52 = vpop.eup %3476  ;;  %v241_v53 = vmul.f32 1.442695, %v238_v51 }
 0x224   :  { %3206 = vmatmul.msk.f32.vlgmr.msra.gmra.mxu2 %vm230_vm9, %v4008_v52 }
 0x225   :  { %3478 = vpow2.f32 %v241_v53  ;;  %473 = vmatpush.msra.mxu2 %v3793_v5 }
 0x227   :  { %474 = vmatpush.msra.mxu2 %v3793_v5 }
 0x22b   :  { %v4014_v54 = vpop.eup %3478  ;;  %v3450_v55 = vpop.permute.xlu0 %3449 }
 0x22c   :  { %v4016_v56 = vunpack.i.l.bf16 %v3450_v55  ;;  %3207 = vmatmul.msk.f32.gmra.mxu2 %vm230_vm9, %v4014_v54  ;;  %v279_v57 = vpack.c.bf16 %v4014_v54, %v4008_v52  ;;  %v4061_v48 = vunpack.i.h.bf16 %v3450_v55 }
 0x22e   :  { %v486_v59 = vmul.f32 %v4016_v56, %v3902_v9  ;;  %v487_v60 = vmul.f32 %v4016_v56, %v3905_v10  ;;  %v592_v49 = vmul.f32 %v4061_v48, %v3902_v9  ;;  %v593_v50 = vmul.f32 %v4061_v48, %v3905_v10 }
 0x230   :  { %v488_v62 = vpack.c.bf16 %v487_v60, %v486_v59  ;;  %v594_v51 = vpack.c.bf16 %v593_v50, %v592_v49 }
 0x232   :  { %491 = vrot.lane.b32.xlu1 %v488_v62, %s3797_s24 }
 0x234   :  { %3209 = vmatmul.msk.bf16.vlgmr.msrb.gmra.mxu2 %vm185_vm0, %v317_v4 }
 0x238   :  { %v4037_v6 = vpop.permute.xlu1 %377 }
 0x239   :  { %v380_v33 = vmul.f32 %v4037_v6, %v3902_v9  ;;  %v381_v35 = vmul.f32 %v4037_v6, %v3905_v10 }
 0x23b   :  { %v382_v36 = vpack.c.bf16 %v381_v35, %v380_v33 }
 0x240   :  { %v4039_v8 = vpop.permute.xlu1 %273 }
 0x241   :  { %v276_v37 = vmul.f32 %v4039_v8, %v3902_v9  ;;  %v277_v41 = vmul.f32 %v4039_v8, %v3905_v10 }
 0x243   :  { %v278_v44 = vpack.c.bf16 %v277_v41, %v276_v37 }
 0x26b   :  { %v443_v11 = vpop.xlane.xlu1 %442 }
 0x26c   :  { %v447_v12 = vsub.f32 %v437_v45, %v443_v11  ;;  %v438_v45 = vpop.f32.mrf.mxu1 }
 0x26d   :  { %v439_v46 = vadd.f32 %v438_v45, %v3969_v34 }
 0x26e   :  { %v449_v14 = vmul.f32 1.442695, %v447_v12 }
 0x26f   :  { %v444_v47 = vsel %vm230_vm9, %v439_v46, -inf }
 0x270   :  { %3480 = vpow2.f32 %v449_v14 }
 0x276   :  { %v4041_v18 = vpop.eup %3480 }
 0x277   :  { %3214 = vmatmul.msk.f32.vlgmr.msra.gmra.mxu2 %vm230_vm9, %v4041_v18 }
 0x2a7   :  { %v266_v20 = vpop.f32.mrf.mxu2 }
 0x2a8   :  { %3482 = vrcp.f32 %v266_v20 }
 0x2ae   :  { %v3483_v21 = vpop.eup %3482 }
 0x2af   :  { %v269_v23 = vpop.f32.mrf.mxu2  ;;  %305 = vperm.xlu1 %3453, %v3483_v21  }
 0x2b0   :  { %3484 = vrcp.f32 %v269_v23 }
 0x2b6   :  { %v3485_v59 = vpop.eup %3484 }
 0x2b7   :  { %v330_v24 = vpop.f32.mrf.mxu2 }
 0x2b8   :  { %v331_v25 = vadd.f32 %v330_v24, %v3955_v29 }
 0x2ba   :  { %v335_v26 = vsel %vm230_vm9, %v331_v25, -inf }
 0x2bb   :  { %336 = vmax.xlane.f32.xlu2 %v335_v26 }
 0x2bf   :  { %v332_v27 = vpop.f32.mrf.mxu2 }
 0x2c0   :  { %v333_v30 = vadd.f32 %v332_v27, %v3969_v34 }
 0x2c2   :  { %v338_v31 = vsel %vm230_vm9, %v333_v30, -inf }
 0x2c3   :  { %339 = vmax.xlane.f32.xlu2 %v338_v31 }
 0x2db   :  { %385 = vrot.lane.b32.xlu2 %v382_v36, %s3797_s24 }
 0x2e3   :  { %281 = vrot.lane.b32.xlu2 %v278_v44, %s3797_s24 }
 0x2fa   :  { %v476_v53 = vpop.f32.mrf.mxu2 }
 0x2fb   :  { %3486 = vrcp.f32 %v476_v53 }
 0x301   :  { %v3487_v62 = vpop.eup %3486 }
 0x30c   :  { %445 = vmax.xlane.f32.xlu2 %v444_v47 }
 0x324   :  { %597 = vrot.lane.b32.xlu2 %v594_v51, %s3797_s24 }
 0x32c   :  { %310 = vperm.xlu2 %3454, %v3485_v59  }
 0x32e   :  { %v337_v60 = vpop.xlane.xlu2 %336 }
 0x32f   :  { %v341_v61 = vsub.f32 %v331_v25, %v337_v60 }
 0x331   :  { %v343_v55 = vmul.f32 1.442695, %v341_v61 }
 0x333   :  { %3488 = vpow2.f32 %v343_v55 }
 0x334   :  { %515 = vperm.xlu2 %3454, %v3487_v62  }
 0x336   :  { %v340_v63 = vpop.xlane.xlu2 %339 }
 0x337   :  { %v342_v4 = vsub.f32 %v333_v30, %v340_v63 }
 0x339   :  { %v345_v11 = vmul.f32 1.442695, %v342_v4  ;;  %v3489_v14 = vpop.eup %3488 }
 0x33b   :  { %3490 = vpow2.f32 %v345_v11 }
 0x33c   :  { %636 = vrot.lane.b32.xlu2 %v3881_v0, %s3790_s13  ;;  %v492_v0 = vpop.permute.xlu1 %491 }
 0x33e   :  { %v386_v12 = vpop.permute.xlu2 %385 }
 0x33f   :  { %398 = vmatpush.bf16.msrb.mxu0 %v386_v12 }
 0x341   :  { %v3491_v19 = vpop.eup %3490 }
 0x342   :  { %v383_v20 = vpack.c.bf16 %v3491_v19, %v3489_v14 }
 0x343   :  { %540 = vmatpush.bf16.xpose.msra.mxu0 %v3914_v15  ;;  %v4085_v15 = vsel %vm3975_vm15, 0.35355338, %v3795_v16 }
 0x344   :  { %3212 = vmatmul.msk.bf16.vlgmr.msrb.gmra.mxu0 %vm230_vm9, %v383_v20  ;;  %v528_v23 = vmul.f32 %v3905_v10, %v4085_v15  ;;  %v527_v24 = vmul.f32 %v3902_v9, %v4085_v15 }
 0x346   :  { %v282_v21 = vpop.permute.xlu2 %281  ;;  %v529_v52 = vpack.c.bf16 %v528_v23, %v527_v24 }
 0x347   :  { %294 = vmatpush.bf16.msra.mxu3 %v282_v21 }
 0x34a   :  { %3208 = vmatmul.msk.bf16.vlgmr.msra.gmra.mxu3 %vm230_vm9, %v279_v57 }
 0x34b   :  { %683 = vmatpush.msrb.mxu0 %v3793_v5  ;;  %367 = vmatpush.msrb.mxu3 %v3793_v5 }
 0x34d   :  { %684 = vmatpush.msrb.mxu0 %v3793_v5  ;;  %368 = vmatpush.msrb.mxu3 %v3793_v5 }
 0x34f   :  { %685 = vmatpush.msrb.mxu0 %v3793_v5  ;;  %504 = vmatpush.bf16.msra.mxu3 %v492_v0  ;;  %v306_v0 = vpop.permute.xlu1 %305 }
 0x351   :  { %686 = vmatpush.msrb.mxu0 %v3793_v5 }
 0x354   :  { %3217 = vmatmul.msk.bf16.vlgmr.msra.gmra.mxu0 %vm185_vm0, %v529_v52 }
 0x35a   :  { %3210 = vmatmul.msk.f32.vlgmr.msrb.gmra.mxu3 %vm230_vm9, %v3489_v14 }
 0x362   :  { %3211 = vmatmul.msk.f32.gmra.mxu3 %vm230_vm9, %v3491_v19 }
 0x37f   :  { %v446_v54 = vpop.xlane.xlu2 %445 }
 0x380   :  { %v448_v57 = vsub.f32 %v439_v46, %v446_v54 }
 0x382   :  { %v451_v25 = vmul.f32 1.442695, %v448_v57 }
 0x384   :  { %3492 = vpow2.f32 %v451_v25 }
 0x387   :  { %v598_v38 = vpop.permute.xlu2 %597 }
 0x388   :  { %610 = vmatpush.bf16.msrb.mxu2 %v598_v38 }
 0x38a   :  { %v3493_v16 = vpop.eup %3492 }
 0x38b   :  { %v489_v26 = vpack.c.bf16 %v3493_v16, %v4041_v18  ;;  %3215 = vmatmul.msk.f32.gmra.mxu2 %vm230_vm9, %v3493_v16 }
 0x38d   :  { %3216 = vmatmul.msk.bf16.vlgmr.msra.gmra.mxu3 %vm230_vm9, %v489_v26 }
 0x38f   :  { %v311_v4 = vpop.permute.xlu2 %310 }
 0x397   :  { %v516_v11 = vpop.permute.xlu2 %515 }
 0x39f   :  { %v637_v12 = vpop.permute.xlu2 %636 }
 0x3a0   :  { %653 = vmatpush.bf16.msrb.mxu3 %v637_v12 }
 0x3c1   :  { %v400_v9 = vpop.f32.mrf.mxu0 }
 0x3c9   :  { %v402_v10 = vpop.f32.mrf.mxu0 }
 0x3cd   :  { %v296_v27 = vpop.f32.mrf.mxu3 }
 0x3ce   :  { %v313_v38 = vmul.f32 %v306_v0, %v296_v27 }
 0x3d1   :  { %v542_v30 = vpop.f32.mrf.mxu0 }
 0x3d2   :  { %v543_v31 = vadd.f32 %v542_v30, %v3955_v29 }
 0x3d4   :  { %v547_v33 = vsel %vm230_vm9, %v543_v31, -inf }
 0x3d5   :  { %548 = vmax.xlane.f32.xlu0 %v547_v33  ;;  %v298_v35 = vpop.f32.mrf.mxu3 }
 0x3d9   :  { %v544_v36 = vpop.f32.mrf.mxu0 }
 0x3da   :  { %v545_v37 = vadd.f32 %v544_v36, %v3969_v34 }
 0x3dc   :  { %v550_v41 = vsel %vm230_vm9, %v545_v37, -inf }
 0x3dd   :  { %551 = vmax.xlane.f32.xlu0 %v550_v41  ;;  %v370_v18 = vpop.f32.mrf.mxu3 }
 0x3de   :  { %3494 = vrcp.f32 %v370_v18 }
 0x3e4   :  { %v3495_v44 = vpop.eup %3494 }
 0x3e5   :  { %409 = vperm.xlu1 %3453, %v3495_v44   ;;  %v373_v45 = vpop.f32.mrf.mxu3 }
 0x3e6   :  { %3496 = vrcp.f32 %v373_v45 }
 0x3ec   :  { %v3497_v46 = vpop.eup %3496 }
 0x3f1   :  { %414 = vperm.xlu0 %3455, %v3497_v46  }
 0x40e   :  { %v479_v47 = vpop.f32.mrf.mxu2 }
 0x40f   :  { %3498 = vrcp.f32 %v479_v47 }
 0x410   :  { %v506_v24 = vpop.f32.mrf.mxu3 }
 0x411   :  { %v523_v41 = vmul.f32 %v516_v11, %v506_v24 }
 0x415   :  { %v3499_v49 = vpop.eup %3498 }
 0x416   :  { %520 = vperm.xlu1 %3453, %v3499_v49  }
 0x418   :  { %v508_v26 = vpop.f32.mrf.mxu3 }
 0x448   :  { %v549_v50 = vpop.xlane.xlu0 %548 }
 0x449   :  { %v553_v51 = vsub.f32 %v543_v31, %v549_v50  ;;  %v314_v31 = vmul.f32 %v311_v4, %v298_v35 }
 0x44b   :  { %v555_v53 = vmul.f32 1.442695, %v553_v51 }
 0x44d   :  { %3500 = vpow2.f32 %v555_v53 }
 0x450   :  { %v552_v59 = vpop.xlane.xlu0 %551 }
 0x451   :  { %v554_v60 = vsub.f32 %v545_v37, %v552_v59 }
 0x453   :  { %v3501_v61 = vpop.eup %3500  ;;  %v557_v62 = vmul.f32 1.442695, %v554_v60 }
 0x454   :  { %3218 = vmatmul.msk.f32.vlgmr.msra.gmra.mxu1 %vm230_vm9, %v3501_v61 }
 0x455   :  { %3502 = vpow2.f32 %v557_v62  ;;  %902 = vmatpush.msra.mxu1 %v3793_v5 }
 0x457   :  { %903 = vmatpush.msra.mxu1 %v3793_v5  ;;  %v410_v23 = vpop.permute.xlu1 %409 }
 0x458   :  { %v417_v25 = vmul.f32 %v410_v23, %v400_v9 }
 0x45a   :  { %v419_v33 = vadd.f32 %v417_v25, %v313_v38 }
 0x45b   :  { %v3503_v55 = vpop.eup %3502 }
 0x45c   :  { %v595_v63 = vpack.c.bf16 %v3503_v55, %v3501_v61  ;;  %3219 = vmatmul.msk.f32.gmra.mxu1 %vm230_vm9, %v3503_v55  ;;  %v525_v45 = vadd.f32 %v523_v41, %v419_v33 }
 0x45e   :  { %3220 = vmatmul.msk.bf16.vlgmr.msrb.gmra.mxu2 %vm230_vm9, %v595_v63 }
 0x463   :  { %v415_v54 = vpop.permute.xlu0 %414 }
 0x464   :  { %v418_v16 = vmul.f32 %v415_v54, %v402_v10 }
 0x488   :  { %v521_v57 = vpop.permute.xlu1 %520 }
 0x489   :  { %v524_v36 = vmul.f32 %v521_v57, %v508_v26 }
 0x4d1   :  { %v582_v14 = vpop.f32.mrf.mxu1 }
 0x4d2   :  { %3504 = vrcp.f32 %v582_v14 }
 0x4d8   :  { %v3505_v19 = vpop.eup %3504 }
 0x4d9   :  { %v585_v20 = vpop.f32.mrf.mxu1  ;;  %621 = vperm.xlu1 %3453, %v3505_v19  }
 0x4da   :  { %3506 = vrcp.f32 %v585_v20  ;;  %v4128_v20 = vld [vmem:[%s4737_s2 + $0x10] sm:$0xff] }
 0x4db   :  { %819 = vrot.lane.b32.xlu0 %v4128_v20, %s3794_s7 }
 0x4e0   :  { %v3507_v21 = vpop.eup %3506 }
 0x4e1   :  { %626 = vperm.xlu2 %3454, %v3507_v21   ;;  %634 = vrot.lane.b32.xlu1 %v3886_v1, %s3790_s13  ;;  %v612_v52 = vpop.f32.mrf.mxu2  ;;  %v420_v1 = vadd.f32 %v418_v16, %v314_v31 }
 0x4e9   :  { %641 = vrot.lane.b32.xlu2 %v3899_v7, %s3790_s13  ;;  %v614_v37 = vpop.f32.mrf.mxu2  ;;  %v526_v7 = vadd.f32 %v524_v36, %v420_v1 }
 0x53b   :  { %v627_v30 = vpop.permute.xlu2 %626 }
 0x53c   :  { %v630_v18 = vmul.f32 %v627_v30, %v614_v37 }
 0x53e   :  { %v632_v47 = vadd.f32 %v630_v18, %v526_v7 }
 0x543   :  { %v642_v9 = vpop.permute.xlu2 %641 }
 0x54b   :  { %v622_v44 = vpop.permute.xlu1 %621 }
 0x54c   :  { %v629_v46 = vmul.f32 %v622_v44, %v612_v52 }
 0x54e   :  { %v631_v49 = vadd.f32 %v629_v46, %v525_v45  ;;  %v113_v45 = vld [vmem:[#allocation5] sm:$0xff]  ;;  %v114_v46 = vld [vmem:[#allocation5 + $0x8] sm:$0xff] }
 0x550   :  { %v633_v50 = vpack.c.bf16 %v632_v47, %v631_v49  ;;  %v820_v47 = vpop.permute.xlu0 %819  ;;  %v4137_v49 = vpack.c.bf16 %v114_v46, %v113_v45 }
 0x553   :  { %v635_v51 = vpop.permute.xlu1 %634 }
 0x554   :  { %654 = vmatpush.bf16.msrb.mxu3 %v635_v51 }
 0x557   :  { %3221 = vmatmul.msk.bf16.vlgmr.msrb.gmra.mxu3 %vm185_vm0, %v633_v50  ;;  %v4141_v50 = vld [vmem:[#allocation7 + $0x1] ss:$0 sm:$0xff] }
 0x558   :  { %826 = vrot.lane.b32.xlu0 %v4141_v50, %s3794_s7 }
 0x5da   :  { %v656_v10 = vpop.f32.mrf.mxu3 }
 0x5db   :  { %v657_v27 = vadd.f32 %v656_v10, %v642_v9  ;;  %v3458_v10 = vld [vmem:[%s4743_s8 + $0x1] ss:$0 sm:$0xff] }
 0x5dd   :  { %v661_v35 = vadd.f32 %v657_v27, %v3888_v2 }
 0x5df   :  { %3222 = vmatmul.msk.f32.vlgmr.msrb.gmra.mxu0 %vm185_vm0, %v661_v35 }
 0x5e2   :  { %v658_v53 = vpop.f32.mrf.mxu3 }
 0x5e3   :  { %v659_v59 = vadd.f32 %v658_v53, %v642_v9 }
 0x5e5   :  { %v662_v60 = vadd.f32 %v659_v59, %v3890_v3  ;;  %v4120_v3 = vld [vmem:[%s4737_s2 + $0x18] sm:$0xff] }
 0x5e6   :  { %810 = vmatpush.bf16.msra.mxu2 %v4120_v3 }
 0x5e7   :  { %3223 = vmatmul.msk.f32.gmra.mxu0 %vm185_vm0, %v662_v60 }
 0x5ea   :  { %811 = vmatpush.bf16.msra.mxu2 %v4128_v20 }
 0x65c   :  { %v688_v61 = vpop.f32.mrf.mxu0 }
 0x65d   :  { %v694_v62 = vmul.f32 0.03125, %v688_v61 }
 0x65f   :  { %698 = vperm.xlu1 %3453, %v694_v62  }
 0x664   :  { %v691_v55 = vpop.f32.mrf.mxu0 }
 0x665   :  { %v695_v63 = vmul.f32 0.03125, %v691_v55  ;;  %v827_v55 = vpop.permute.xlu0 %826 }
 0x667   :  { %703 = vperm.xlu2 %3454, %v695_v63   ;;  %821 = vrot.lane.b32.xlu1 %v4120_v3, %s3794_s7 }
 0x6c1   :  { %v704_v14 = vpop.permute.xlu2 %703 }
 0x6c2   :  { %v707_v2 = vsub.f32 %v662_v60, %v704_v14 }
 0x6c4   :  { %v709_v19 = vmul.f32 %v707_v2, %v707_v2 }
 0x6d1   :  { %v699_v4 = vpop.permute.xlu1 %698 }
 0x6d2   :  { %v706_v11 = vsub.f32 %v661_v35, %v699_v4 }
 0x6d4   :  { %v708_v12 = vmul.f32 %v706_v11, %v706_v11 }
 0x6d6   :  { %3224 = vmatmul.msk.f32.vlgmr.msrb.gmra.mxu1 %vm185_vm0, %v708_v12 }
 0x6d9   :  { %v822_v7 = vpop.permute.xlu1 %821 }
 0x6da   :  { %838 = vmatpush.bf16.msra.mxu3 %v822_v7 }
 0x6de   :  { %3225 = vmatmul.msk.f32.gmra.mxu1 %vm185_vm0, %v709_v19  ;;  %839 = vmatpush.bf16.msra.mxu3 %v820_v47 }
 0x6e1   :  { %3239 = vmatmul.msk.bf16.vlgmr.msra.gmra.mxu3 %vm185_vm0, %v4137_v49 }
 0x753   :  { %v733_v21 = vpop.f32.mrf.mxu1 }
 0x754   :  { %v739_v0 = vmul.f32 0.03125, %v733_v21 }
 0x756   :  { %v741_v23 = vadd.f32 1e-05, %v739_v0 }
 0x758   :  { %3508 = vrsqrt.f32 %v741_v23  ;;  %vm749_vm3 = vweird.f32 %v741_v23 }
 0x75b   :  { %v736_v24 = vpop.f32.mrf.mxu1 }
 0x75c   :  { %v740_v52 = vmul.f32 0.03125, %v736_v24 }
 0x75e   :  { %v3509_v54 = vpop.eup %3508  ;;  %v742_v57 = vadd.f32 1e-05, %v740_v52 }
 0x75f   :  { %v744_v25 = vmul.f32 %v3509_v54, %v741_v23  ;;  %vm750_vm2 = vweird.f32 %v3509_v54 }
 0x760   :  { %3510 = vrsqrt.f32 %v742_v57  ;;  %vm751_vm4 = vmor %vm749_vm3, %vm750_vm2  ;;  %vm759_vm6 = vweird.f32 %v742_v57 }
 0x761   :  { %v745_v38 = vmul.f32 %v3509_v54, %v744_v25 }
 0x763   :  { %v746_v16 = vmul.f32 0.5, %v745_v38 }
 0x764   :  { %v841_v62 = vpop.f32.mrf.mxu3 }
 0x765   :  { %v747_v26 = vsub.f32 1.5, %v746_v16  ;;  %v4158_v63 = vadd.f32 %v841_v62, %v827_v55 }
 0x766   :  { %v3511_v30 = vpop.eup %3510 }
 0x767   :  { %v754_v31 = vmul.f32 %v3511_v30, %v742_v57  ;;  %v748_v33 = vmul.f32 %v3509_v54, %v747_v26  ;;  %vm760_vm5 = vweird.f32 %v3511_v30 }
 0x768   :  { %vm761_vm7 = vmor %vm759_vm6, %vm760_vm5 }
 0x769   :  { %v755_v36 = vmul.f32 %v3511_v30, %v754_v31  ;;  %v752_v37 = vsel %vm751_vm4, %v3509_v54, %v748_v33 }
 0x76a   :  { %765 = vperm.xlu2 %3454, %v752_v37  }
 0x76b   :  { %v756_v41 = vmul.f32 0.5, %v755_v36  ;;  %v4200_v36 = vsel %vm127_vm1, 0.0, %v3796_v28 }
 0x76c   :  { %v843_v4 = vpop.f32.mrf.mxu3 }
 0x76d   :  { %v757_v1 = vsub.f32 1.5, %v756_v41 }
 0x76f   :  { %v758_v18 = vmul.f32 %v3511_v30, %v757_v1 }
 0x771   :  { %v762_v44 = vsel %vm761_vm7, %v3511_v30, %v758_v18 }
 0x772   :  { %770 = vperm.xlu1 %3453, %v762_v44   ;;  %911 = vrot.lane.b32.xlu2 %v4002_v43, %s3790_s13  ;;  %v4207_v44 = vsel %vm3961_vm11, 0.0, %v3796_v28 }
 0x77a   :  { %1014 = vrot.lane.b32.xlu1 %v3995_v42, %s3790_s13  ;;  %v3457_v42 = vld [vmem:[%s4743_s8] ss:$0 sm:$0xff] }
 0x7c4   :  { %v766_v43 = vpop.permute.xlu2 %765 }
 0x7c5   :  { %v773_v51 = vmul.f32 %v766_v43, %v706_v11  ;;  %v4160_v11 = vadd.f32 %v843_v4, %v827_v55 }
 0x7c7   :  { %v776_v27 = vmul.f32 %v3457_v42, %v773_v51  ;;  %v846_v12 = vpack.c.bf16 %v4160_v11, %v4158_v63 }
 0x7c9   :  { %v4151_v59 = vadd.f32 %v3458_v10, %v776_v27  ;;  %v4165_v14 = vsel %vm185_vm0, %v846_v12, 0 }
 0x7ca   :  { %863 = vmatpush.bf16.xpose.msra.mxu0 %v4165_v14  ;;  %966 = vmatpush.bf16.xpose.msrb.mxu3 %v4165_v14 }
 0x7cc   :  { %v4217_v28 = vpop.permute.xlu2 %911 }
 0x7cd   :  { %v914_v27 = vmul.f32 %v4217_v28, %v4158_v63 }
 0x7d2   :  { %1005 = vmatpush.msrb.mxu0 %v3793_v5  ;;  %1110 = vmatpush.msra.mxu3 %v3793_v5 }
 0x7d4   :  { %1006 = vmatpush.msrb.mxu0 %v3793_v5  ;;  %1111 = vmatpush.msra.mxu3 %v3793_v5 }
 0x7e4   :  { %v771_v9 = vpop.permute.xlu1 %770 }
 0x7e5   :  { %v774_v35 = vmul.f32 %v771_v9, %v707_v2 }
 0x7e7   :  { %v777_v53 = vmul.f32 %v3457_v42, %v774_v35  ;;  %v915_v35 = vmul.f32 %v4217_v28, %v4160_v11 }
 0x7e9   :  { %v4153_v60 = vadd.f32 %v3458_v10, %v777_v53 }
 0x7eb   :  { %v787_v61 = vpack.c.bf16 %v4153_v60, %v4151_v59 }
 0x7ec   :  { %v4215_v32 = vpop.permute.xlu1 %1014 }
 0x7ed   :  { %3238 = vmatmul.msk.bf16.vlgmr.msra.gmra.mxu2 %vm185_vm0, %v787_v61  ;;  %v1017_v9 = vmul.f32 %v4215_v32, %v4158_v63  ;;  %v1018_v10 = vmul.f32 %v4215_v32, %v4160_v11  ;;  %v916_v61 = vpack.c.bf16 %v915_v35, %v914_v27 }
 0x7ef   :  { %v1019_v53 = vpack.c.bf16 %v1018_v10, %v1017_v9 }
 0x870   :  { %v813_v2 = vpop.f32.mrf.mxu2 }
 0x871   :  { %v814_v19 = vadd.f32 %v4141_v50, %v813_v2 }
 0x873   :  { %v847_v23 = vmul.f32 %v814_v19, %v3921_v17  ;;  %v953_v24 = vmul.f32 %v814_v19, %v4025_v58  ;;  %v4178_v52 = vmul.f32 %v814_v19, %v3940_v22  ;;  %v4181_v54 = vmul.f32 %v814_v19, %v4085_v15 }
 0x878   :  { %v815_v21 = vpop.f32.mrf.mxu2 }
 0x879   :  { %v816_v0 = vadd.f32 %v4141_v50, %v815_v21 }
 0x87b   :  { %v848_v57 = vmul.f32 %v816_v0, %v3921_v17  ;;  %v954_v25 = vmul.f32 %v816_v0, %v4025_v58  ;;  %v4186_v38 = vmul.f32 %v816_v0, %v3940_v22  ;;  %v4189_v16 = vmul.f32 %v816_v0, %v4085_v15 }
 0x87d   :  { %v849_v26 = vpack.c.bf16 %v848_v57, %v847_v23  ;;  %v955_v30 = vpack.c.bf16 %v954_v25, %v953_v24  ;;  %v1060_v31 = vpack.c.bf16 %v4186_v38, %v4178_v52  ;;  %v1165_v33 = vpack.c.bf16 %v4189_v16, %v4181_v54 }
 0x87f   :  { %3240 = vmatmul.msk.bf16.vlgmr.msra.gmra.mxu0 %vm185_vm0, %v849_v26  ;;  %3244 = vmatmul.msk.bf16.vlgmr.msrb.gmra.mxu3 %vm185_vm0, %v955_v30 }
 0x8fc   :  { %v865_v37 = vpop.f32.mrf.mxu0 }
 0x8fd   :  { %v866_v41 = vadd.f32 %v865_v37, %v4200_v36 }
 0x8ff   :  { %v870_v1 = vsel %vm230_vm9, %v866_v41, -inf }
 0x900   :  { %871 = vmax.xlane.f32.xlu0 %v870_v1 }
 0x902   :  { %v968_v18 = vpop.f32.mrf.mxu3 }
 0x903   :  { %v969_v7 = vadd.f32 %v968_v18, %v4200_v36 }
 0x904   :  { %v867_v45 = vpop.f32.mrf.mxu0 }
 0x905   :  { %v868_v46 = vadd.f32 %v867_v45, %v4207_v44  ;;  %v973_v13 = vsel %vm230_vm9, %v969_v7, -inf }
 0x906   :  { %974 = vmax.xlane.f32.xlu1 %v973_v13 }
 0x907   :  { %v873_v47 = vsel %vm230_vm9, %v868_v46, -inf }
 0x908   :  { %874 = vmax.xlane.f32.xlu2 %v873_v47 }
 0x90a   :  { %v970_v43 = vpop.f32.mrf.mxu3 }
 0x90b   :  { %v971_v42 = vadd.f32 %v970_v43, %v4207_v44 }
 0x90d   :  { %v976_v51 = vsel %vm230_vm9, %v971_v42, -inf }
 0x90e   :  { %977 = vmax.xlane.f32.xlu0 %v976_v51 }
 0x91f   :  { %1022 = vrot.lane.b32.xlu1 %v1019_v53, %s3794_s7 }
 0x920   :  { %919 = vrot.lane.b32.xlu2 %v916_v61, %s3794_s7 }
 0x927   :  { %1224 = vrot.lane.b32.xlu1 %v3987_v40, %s3790_s13 }
 0x973   :  { %v872_v62 = vpop.xlane.xlu0 %871 }
 0x974   :  { %v876_v55 = vsub.f32 %v866_v41, %v872_v62 }
 0x976   :  { %v878_v4 = vmul.f32 1.442695, %v876_v55 }
 0x978   :  { %3512 = vpow2.f32 %v878_v4 }
 0x979   :  { %v975_v12 = vpop.xlane.xlu1 %974 }
 0x97a   :  { %v979_v2 = vsub.f32 %v969_v7, %v975_v12 }
 0x97b   :  { %v875_v19 = vpop.xlane.xlu2 %874 }
 0x97c   :  { %v981_v21 = vmul.f32 1.442695, %v979_v2  ;;  %v877_v0 = vsub.f32 %v868_v46, %v875_v19 }
 0x97e   :  { %v3513_v23 = vpop.eup %3512  ;;  %3514 = vpow2.f32 %v981_v21  ;;  %v880_v24 = vmul.f32 1.442695, %v877_v0 }
 0x97f   :  { %3241 = vmatmul.msk.f32.vlgmr.msra.gmra.mxu1 %vm230_vm9, %v3513_v23 }
 0x980   :  { %3516 = vpow2.f32 %v880_v24 }
 0x981   :  { %v978_v57 = vpop.xlane.xlu0 %977 }
 0x982   :  { %v980_v25 = vsub.f32 %v971_v42, %v978_v57 }
 0x983   :  { %v920_v26 = vpop.permute.xlu2 %919 }
 0x984   :  { %v3515_v30 = vpop.eup %3514  ;;  %v983_v40 = vmul.f32 1.442695, %v980_v25  ;;  %932 = vmatpush.bf16.msrb.mxu2 %v920_v26 }
 0x985   :  { %3245 = vmatmul.msk.f32.vlgmr.msrb.gmra.mxu0 %vm230_vm9, %v3515_v30 }
 0x986   :  { %v3517_v37 = vpop.eup %3516  ;;  %3518 = vpow2.f32 %v983_v40 }
 0x987   :  { %v917_v41 = vpack.c.bf16 %v3517_v37, %v3513_v23  ;;  %3242 = vmatmul.msk.f32.gmra.mxu1 %vm230_vm9, %v3517_v37 }
 0x988   :  { %1071 = vmatpush.bf16.xpose.msra.mxu2 %v4165_v14 }
 0x989   :  { %3243 = vmatmul.msk.bf16.vlgmr.msrb.gmra.mxu2 %vm230_vm9, %v917_v41 }
 0x98c   :  { %v3519_v1 = vpop.eup %3518 }
 0x98d   :  { %3246 = vmatmul.msk.f32.gmra.mxu0 %vm230_vm9, %v3519_v1  ;;  %v1020_v7 = vpack.c.bf16 %v3519_v1, %v3515_v30 }
 0x990   :  { %1215 = vmatpush.msrb.mxu2 %v3793_v5 }
 0x991   :  { %v1023_v18 = vpop.permute.xlu1 %1022 }
 0x992   :  { %1216 = vmatpush.msrb.mxu2 %v3793_v5  ;;  %1035 = vmatpush.bf16.msrb.mxu1 %v1023_v18 }
 0x995   :  { %3247 = vmatmul.msk.bf16.vlgmr.msrb.gmra.mxu1 %vm230_vm9, %v1020_v7 }
 0x996   :  { %1176 = vmatpush.bf16.xpose.msra.mxu1 %v4165_v14 }
 0x999   :  { %v4243_v45 = vpop.permute.xlu1 %1224  ;;  %3248 = vmatmul.msk.bf16.vlgmr.msra.gmra.mxu2 %vm185_vm0, %v1060_v31 }
 0x99a   :  { %v1227_v46 = vmul.f32 %v4243_v45, %v4158_v63  ;;  %v1228_v13 = vmul.f32 %v4243_v45, %v4160_v11  ;;  %1362 = vmatpush.msra.mxu2 %v3793_v5 }
 0x99c   :  { %v1229_v14 = vpack.c.bf16 %v1228_v13, %v1227_v46  ;;  %1363 = vmatpush.msra.mxu2 %v3793_v5 }
 0x99e   :  { %1317 = vmatpush.msrb.mxu1 %v3793_v5  ;;  %1232 = vrot.lane.b32.xlu1 %v1229_v14, %s3794_s7 }
 0x99f   :  { %1364 = vmatpush.msra.mxu2 %v3793_v5 }
 0x9a0   :  { %1318 = vmatpush.msrb.mxu1 %v3793_v5 }
 0x9a1   :  { %1365 = vmatpush.msra.mxu2 %v3793_v5 }
 0x9a2   :  { %1319 = vmatpush.msrb.mxu1 %v3793_v5 }
 0x9a4   :  { %1320 = vmatpush.msrb.mxu1 %v3793_v5 }
 0x9a5   :  { %3252 = vmatmul.msk.bf16.vlgmr.msra.gmra.mxu1 %vm185_vm0, %v1165_v33 }
 0x9a6   :  { %1528 = vmatpush.msra.mxu1 %v3793_v5 }
 0x9a8   :  { %1529 = vmatpush.msra.mxu1 %v3793_v5 }
 0x9aa   :  { %1530 = vmatpush.msra.mxu1 %v3793_v5 }
 0x9ac   :  { %1531 = vmatpush.msra.mxu1 %v3793_v5 }
 0x9fc   :  { %v905_v52 = vpop.f32.mrf.mxu1 }
 0x9fd   :  { %3520 = vrcp.f32 %v905_v52 }
 0xa02   :  { %v1008_v12 = vpop.f32.mrf.mxu0 }
 0xa03   :  { %v3521_v2 = vpop.eup %3520  ;;  %3522 = vrcp.f32 %v1008_v12 }
 0xa04   :  { %v4268_v38 = vpop.f32.mrf.mxu1 }
 0xa09   :  { %v3523_v19 = vpop.eup %3522 }
 0xa0c   :  { %v4270_v31 = vpop.f32.mrf.mxu2 }
 0xa10   :  { %v1233_v47 = vpop.permute.xlu1 %1232 }
 0xa11   :  { %1245 = vmatpush.bf16.msrb.mxu3 %v1233_v47 }
 0xa12   :  { %v4272_v43 = vpop.f32.mrf.mxu1 }
 0xa14   :  { %v4274_v54 = vpop.f32.mrf.mxu2 }
 0xa1a   :  { %v4276_v16 = vpop.f32.mrf.mxu1 }
 0xa1c   :  { %v1073_v33 = vpop.f32.mrf.mxu2 }
 0xa1d   :  { %v1074_v42 = vadd.f32 %v1073_v33, %v4200_v36 }
 0xa1f   :  { %v1078_v51 = vsel %vm230_vm9, %v1074_v42, -inf }
 0xa20   :  { %1079 = vmax.xlane.f32.xlu0 %v1078_v51  ;;  %v1011_v51 = vpop.f32.mrf.mxu0 }
 0xa22   :  { %v1178_v9 = vpop.f32.mrf.mxu1 }
 0xa23   :  { %v1179_v10 = vadd.f32 %v1178_v9, %v4200_v36 }
 0xa24   :  { %v1075_v35 = vpop.f32.mrf.mxu2 }
 0xa25   :  { %v1183_v27 = vsel %vm230_vm9, %v1179_v10, -inf  ;;  %v1076_v61 = vadd.f32 %v1075_v35, %v4207_v44 }
 0xa27   :  { %v1081_v4 = vsel %vm230_vm9, %v1076_v61, -inf }
 0xa28   :  { %1184 = vmax.xlane.f32.xlu0 %v1183_v27 }
 0xa2a   :  { %v1180_v53 = vpop.f32.mrf.mxu1 }
 0xa2b   :  { %v1181_v62 = vadd.f32 %v1180_v53, %v4207_v44 }
 0xa2d   :  { %v1186_v55 = vsel %vm230_vm9, %v1181_v62, -inf }
 0xa2e   :  { %1187 = vmax.xlane.f32.xlu2 %v1186_v55 }
 0xa30   :  { %1082 = vmax.xlane.f32.xlu0 %v1081_v4 }
 0xa44   :  { %1119 = vrot.lane.b32.xlu0 %v3982_v39, %s3790_s13 }
 0xa4c   :  { %943 = vperm.xlu0 %3455, %v3521_v2  }
 0xa54   :  { %1046 = vperm.xlu0 %3455, %v3523_v19  }
 0xa93   :  { %v1080_v21 = vpop.xlane.xlu0 %1079 }
 0xa94   :  { %v1084_v0 = vsub.f32 %v1074_v42, %v1080_v21 }
 0xa96   :  { %v1086_v23 = vmul.f32 1.442695, %v1084_v0 }
 0xa98   :  { %3524 = vpow2.f32 %v1086_v23 }
 0xa9b   :  { %v1185_v24 = vpop.xlane.xlu0 %1184 }
 0xa9c   :  { %v1189_v57 = vsub.f32 %v1179_v10, %v1185_v24 }
 0xa9e   :  { %v3525_v25 = vpop.eup %3524  ;;  %v1191_v26 = vmul.f32 1.442695, %v1189_v57 }
 0xa9f   :  { %3249 = vmatmul.msk.f32.vlgmr.msra.gmra.mxu3 %vm230_vm9, %v3525_v25 }
 0xaa0   :  { %3526 = vpow2.f32 %v1191_v26 }
 0xaa1   :  { %v1188_v30 = vpop.xlane.xlu2 %1187 }
 0xaa2   :  { %v1190_v39 = vsub.f32 %v1181_v62, %v1188_v30 }
 0xaa3   :  { %v1083_v40 = vpop.xlane.xlu0 %1082 }
 0xaa4   :  { %v1193_v37 = vmul.f32 1.442695, %v1190_v39  ;;  %v1085_v41 = vsub.f32 %v1076_v61, %v1083_v40 }
 0xaa6   :  { %v3527_v1 = vpop.eup %3526  ;;  %v1088_v18 = vmul.f32 1.442695, %v1085_v41  ;;  %3528 = vpow2.f32 %v1193_v37 }
 0xaa7   :  { %3253 = vmatmul.msk.f32.vlgmr.msrb.gmra.mxu2 %vm230_vm9, %v3527_v1 }
 0xaa8   :  { %3530 = vpow2.f32 %v1088_v18  ;;  %1573 = vmatpush.msrb.mxu2 %v3793_v5 }
 0xaa9   :  { %3532 = vrcp.f32 %v4268_v38 }
 0xaaa   :  { %1574 = vmatpush.msrb.mxu2 %v3793_v5  ;;  %3534 = vrcp.f32 %v1011_v51 }
 0xaac   :  { %1575 = vmatpush.msrb.mxu2 %v3793_v5  ;;  %v3529_v7 = vpop.eup %3528 }
 0xaad   :  { %v1230_v14 = vpack.c.bf16 %v3529_v7, %v3527_v1 }
 0xaae   :  { %v3531_v46 = vpop.eup %3530  ;;  %1576 = vmatpush.msrb.mxu2 %v3793_v5 }
 0xaaf   :  { %v1125_v13 = vpack.c.bf16 %v3531_v46, %v3525_v25  ;;  %3250 = vmatmul.msk.f32.gmra.mxu3 %vm230_vm9, %v3531_v46  ;;  %3254 = vmatmul.msk.f32.gmra.mxu2 %vm230_vm9, %v3529_v7  ;;  %v3533_v9 = vpop.eup %3532 }
 0xab0   :  { %v3535_v10 = vpop.eup %3534 }
 0xab6   :  { %v4296_v52 = vpop.permute.xlu0 %1119 }
 0xab7   :  { %v1122_v47 = vmul.f32 %v4296_v52, %v4158_v63  ;;  %v1123_v33 = vmul.f32 %v4296_v52, %v4160_v11  ;;  %3255 = vmatmul.msk.bf16.vlgmr.msrb.gmra.mxu3 %vm230_vm9, %v1230_v14 }
 0xab9   :  { %v1124_v42 = vpack.c.bf16 %v1123_v33, %v1122_v47 }
 0xabb   :  { %1127 = vrot.lane.b32.xlu1 %v1124_v42, %s3794_s7 }
 0xabe   :  { %v944_v0 = vpop.permute.xlu0 %943 }
 0xac3   :  { %948 = vperm.xlu1 %3453, %v3533_v9  }
 0xac6   :  { %v1047_v23 = vpop.permute.xlu0 %1046 }
 0xac7   :  { %v1054_v30 = vmul.f32 %v1047_v23, %v4272_v43 }
 0xacb   :  { %1051 = vperm.xlu1 %3453, %v3535_v10  }
 0xad3   :  { %1271 = vrot.lane.b32.xlu1 %v4120_v3, %s3790_s13 }
 0xb22   :  { %v1113_v63 = vpop.f32.mrf.mxu3 }
 0xb23   :  { %3536 = vrcp.f32 %v1113_v63 }
 0xb29   :  { %v3537_v27 = vpop.eup %3536 }
 0xb2a   :  { %1151 = vperm.xlu2 %3454, %v3537_v27   ;;  %v1218_v11 = vpop.f32.mrf.mxu2 }
 0xb2b   :  { %3538 = vrcp.f32 %v1218_v11 }
 0xb2d   :  { %v1128_v35 = vpop.permute.xlu1 %1127 }
 0xb2e   :  { %1140 = vmatpush.bf16.msra.mxu0 %v1128_v35 }
 0xb31   :  { %v3539_v53 = vpop.eup %3538  ;;  %3251 = vmatmul.msk.bf16.vlgmr.msra.gmra.mxu0 %vm230_vm9, %v1125_v13 }
 0xb32   :  { %1256 = vperm.xlu0 %3455, %v3539_v53   ;;  %v1116_v38 = vpop.f32.mrf.mxu3  ;;  %v1221_v61 = vpop.f32.mrf.mxu2 }
 0xb33   :  { %3540 = vrcp.f32 %v1116_v38 }
 0xb34   :  { %3542 = vrcp.f32 %v1221_v61 }
 0xb35   :  { %v949_v62 = vpop.permute.xlu1 %948 }
 0xb36   :  { %v952_v12 = vmul.f32 %v949_v62, %v4274_v54 }
 0xb39   :  { %v3541_v55 = vpop.eup %3540 }
 0xb3a   :  { %v3543_v4 = vpop.eup %3542  ;;  %1156 = vperm.xlu0 %3455, %v3541_v55   ;;  %v1247_v25 = vpop.f32.mrf.mxu3 }
 0xb3b   :  { %1261 = vperm.xlu1 %3453, %v3543_v4  }
 0xb3d   :  { %v1052_v3 = vpop.permute.xlu1 %1051 }
 0xb3e   :  { %v1055_v2 = vmul.f32 %v1052_v3, %v4276_v16  ;;  %v951_v16 = vmul.f32 %v944_v0, %v4270_v31 }
 0xb40   :  { %v1057_v19 = vadd.f32 %v1055_v2, %v952_v12  ;;  %v1056_v37 = vadd.f32 %v1054_v30, %v951_v16 }
 0xb42   :  { %1269 = vrot.lane.b32.xlu0 %v4128_v20, %s3790_s13  ;;  %v1249_v18 = vpop.f32.mrf.mxu3 }
 0xb43   :  { %1275 = vrot.lane.b32.xlu1 %v4141_v50, %s3790_s13 }
 0xb45   :  { %v1272_v21 = vpop.permute.xlu1 %1271 }
 0xb46   :  { %1287 = vmatpush.bf16.msrb.mxu0 %v1272_v21 }
 0xb84   :  { %v1152_v54 = vpop.permute.xlu2 %1151 }
 0xba4   :  { %v1257_v24 = vpop.permute.xlu0 %1256 }
 0xba5   :  { %v1264_v7 = vmul.f32 %v1257_v24, %v1247_v25 }
 0xbac   :  { %v1157_v57 = vpop.permute.xlu0 %1156 }
 0xbad   :  { %v1262_v20 = vpop.permute.xlu1 %1261 }
 0xbae   :  { %v1142_v26 = vpop.f32.mrf.mxu0  ;;  %v1265_v46 = vmul.f32 %v1262_v20, %v1249_v18 }
 0xbaf   :  { %v1159_v39 = vmul.f32 %v1152_v54, %v1142_v26 }
 0xbb1   :  { %v1161_v50 = vadd.f32 %v1159_v39, %v1056_v37 }
 0xbb3   :  { %v1266_v14 = vadd.f32 %v1264_v7, %v1161_v50  ;;  %v3417_v50 = vld [vmem:[%s4739_s4 + $0x8] sm:$0xff]  ;;  %v3460_v7 = vld [vmem:[%s4743_s8 + $0x2] ss:$0 sm:$0xff] }
 0xbb4   :  { %v1270_v40 = vpop.permute.xlu0 %1269  ;;  %1443 = vmatpush.bf16.msra.mxu3 %v3417_v50 }
 0xbb5   :  { %1288 = vmatpush.bf16.msrb.mxu0 %v1270_v40  ;;  %v1276_v43 = vpop.permute.xlu1 %1275 }
 0xbb6   :  { %v1144_v41 = vpop.f32.mrf.mxu0 }
 0xbb7   :  { %v1160_v1 = vmul.f32 %v1157_v57, %v1144_v41 }
 0xbb9   :  { %v1162_v13 = vadd.f32 %v1160_v1, %v1057_v19  ;;  %v3416_v1 = vld [vmem:[%s4739_s4] sm:$0xff] }
 0xbba   :  { %1444 = vmatpush.bf16.msra.mxu3 %v3416_v1 }
 0xbbb   :  { %v1267_v47 = vadd.f32 %v1265_v46, %v1162_v13 }
 0xbbd   :  { %v1268_v33 = vpack.c.bf16 %v1267_v47, %v1266_v14  ;;  %v3461_v14 = vld [vmem:[%s4743_s8 + $0x3] ss:$0 sm:$0xff] }
 0xbbf   :  { %3256 = vmatmul.msk.bf16.vlgmr.msrb.gmra.mxu0 %vm185_vm0, %v1268_v33 }
 0xc3c   :  { %v1290_v42 = vpop.f32.mrf.mxu0 }
 0xc3d   :  { %v1291_v31 = vadd.f32 %v1290_v42, %v1276_v43 }
 0xc3f   :  { %v1295_v51 = vadd.f32 %v1291_v31, %v4151_v59 }
 0xc41   :  { %3257 = vmatmul.msk.f32.vlgmr.msrb.gmra.mxu1 %vm185_vm0, %v1295_v51 }
 0xc42   :  { %1723 = vmatpush.msrb.mxu1 %v3793_v5 }
 0xc44   :  { %v1292_v9 = vpop.f32.mrf.mxu0  ;;  %1724 = vmatpush.msrb.mxu1 %v3793_v5 }
 0xc45   :  { %v1293_v10 = vadd.f32 %v1292_v9, %v1276_v43  ;;  %v3421_v9 = vld [vmem:[%s4740_s5 + $0x18] sm:$0xff] }
 0xc46   :  { %1496 = vmatpush.bf16.msra.mxu0 %v3421_v9 }
 0xc47   :  { %v1296_v63 = vadd.f32 %v1293_v10, %v4153_v60  ;;  %v3420_v10 = vld [vmem:[%s4740_s5 + $0x10] sm:$0xff] }
 0xc49   :  { %3258 = vmatmul.msk.f32.gmra.mxu1 %vm185_vm0, %v1296_v63 }
 0xc4a   :  { %1497 = vmatpush.bf16.msra.mxu0 %v3420_v10 }
 0xcbe   :  { %v1322_v27 = vpop.f32.mrf.mxu1 }
 0xcbf   :  { %v1328_v11 = vmul.f32 0.03125, %v1322_v27  ;;  %v3418_v27 = vld [vmem:[%s4740_s5] sm:$0xff] }
 0xcc1   :  { %1332 = vperm.xlu2 %3454, %v1328_v11  }
 0xcc6   :  { %v1325_v35 = vpop.f32.mrf.mxu1 }
 0xcc7   :  { %v1329_v53 = vmul.f32 0.03125, %v1325_v35  ;;  %v3462_v35 = vld [vmem:[#allocation8] ss:$0 sm:$0xff] }
 0xcc9   :  { %1337 = vperm.xlu0 %3455, %v1329_v53  }
 0xd1b   :  { %v1333_v38 = vpop.permute.xlu2 %1332 }
 0xd1c   :  { %v1340_v59 = vsub.f32 %v1295_v51, %v1333_v38 }
 0xd1e   :  { %v1342_v61 = vmul.f32 %v1340_v59, %v1340_v59 }
 0xd20   :  { %3259 = vmatmul.msk.f32.vlgmr.msra.gmra.mxu2 %vm185_vm0, %v1342_v61 }
 0xd3b   :  { %v1338_v62 = vpop.permute.xlu0 %1337 }
 0xd3c   :  { %v1341_v55 = vsub.f32 %v1296_v63, %v1338_v62  ;;  %v3419_v63 = vld [vmem:[%s4740_s5 + $0x8] sm:$0xff] }
 0xd3d   :  { %1498 = vmatpush.bf16.msra.mxu0 %v3419_v63 }
 0xd3e   :  { %v1343_v4 = vmul.f32 %v1341_v55, %v1341_v55 }
 0xd40   :  { %3260 = vmatmul.msk.f32.gmra.mxu2 %vm185_vm0, %v1343_v4  ;;  %v3463_v4 = vld [vmem:[#allocation10] ss:$0 sm:$0xff] }
 0xd41   :  { %1499 = vmatpush.bf16.msra.mxu0 %v3418_v27  ;;  %v4358_v27 = vld [vmem:[%s4737_s2 + $0x28] sm:$0xff] }
 0xd42   :  { %1656 = vmatpush.bf16.msrb.mxu3 %v4358_v27 }
 0xda3   :  { %v1367_v3 = vpop.f32.mrf.mxu2 }
 0xda4   :  { %v1373_v60 = vmul.f32 0.03125, %v1367_v3 }
 0xda6   :  { %v1375_v12 = vadd.f32 1e-05, %v1373_v60 }
 0xda8   :  { %3544 = vrsqrt.f32 %v1375_v12  ;;  %vm1383_vm8 = vweird.f32 %v1375_v12 }
 0xdae   :  { %v3545_v2 = vpop.eup %3544 }
 0xdaf   :  { %v1378_v19 = vmul.f32 %v3545_v2, %v1375_v12  ;;  %vm1384_vm1 = vweird.f32 %v3545_v2 }
 0xdb0   :  { %vm1385_vm10 = vmor %vm1383_vm8, %vm1384_vm1 }
 0xdb1   :  { %v1379_v21 = vmul.f32 %v3545_v2, %v1378_v19 }
 0xdb3   :  { %v1380_v0 = vmul.f32 0.5, %v1379_v21 }
 0xdb5   :  { %v1381_v23 = vsub.f32 1.5, %v1380_v0 }
 0xdb7   :  { %v1382_v24 = vmul.f32 %v3545_v2, %v1381_v23 }
 0xdb9   :  { %v1386_v57 = vsel %vm1385_vm10, %v3545_v2, %v1382_v24 }
 0xdba   :  { %1399 = vperm.xlu1 %3453, %v1386_v57  }
 0xdc3   :  { %v1370_v25 = vpop.f32.mrf.mxu2 }
 0xdc4   :  { %v1374_v26 = vmul.f32 0.03125, %v1370_v25 }
 0xdc6   :  { %v1376_v30 = vadd.f32 1e-05, %v1374_v26 }
 0xdc8   :  { %3546 = vrsqrt.f32 %v1376_v30  ;;  %vm1393_vm12 = vweird.f32 %v1376_v30 }
 0xdce   :  { %v3547_v54 = vpop.eup %3546 }
 0xdcf   :  { %v1388_v16 = vmul.f32 %v3547_v54, %v1376_v30  ;;  %vm1394_vm11 = vweird.f32 %v3547_v54 }
 0xdd0   :  { %vm1395_vm13 = vmor %vm1393_vm12, %vm1394_vm11 }
 0xdd1   :  { %v1389_v39 = vmul.f32 %v3547_v54, %v1388_v16 }
 0xdd3   :  { %v1390_v40 = vmul.f32 0.5, %v1389_v39 }
 0xdd5   :  { %v1391_v37 = vsub.f32 1.5, %v1390_v40 }
 0xdd7   :  { %v1392_v20 = vmul.f32 %v3547_v54, %v1391_v37 }
 0xdd9   :  { %v1396_v41 = vsel %vm1395_vm13, %v3547_v54, %v1392_v20 }
 0xdda   :  { %1404 = vperm.xlu2 %3454, %v1396_v41  }
 0xe2c   :  { %v1400_v18 = vpop.permute.xlu1 %1399 }
 0xe2d   :  { %v1407_v46 = vmul.f32 %v1400_v18, %v1340_v59 }
 0xe2f   :  { %v1410_v47 = vmul.f32 %v3460_v7, %v1407_v46 }
 0xe31   :  { %v1413_v42 = vadd.f32 %v3461_v14, %v1410_v47 }
 0xe34   :  { %v1405_v13 = vpop.permute.xlu2 %1404 }
 0xe35   :  { %v1408_v33 = vmul.f32 %v1405_v13, %v1341_v55 }
 0xe37   :  { %v1411_v43 = vmul.f32 %v3460_v7, %v1408_v33 }
 0xe39   :  { %v1414_v31 = vadd.f32 %v3461_v14, %v1411_v43 }
 0xe3b   :  { %v1415_v51 = vpack.c.bf16 %v1414_v31, %v1413_v42 }
 0xe3d   :  { %3269 = vmatmul.msk.bf16.vlgmr.msra.gmra.mxu3 %vm185_vm0, %v1415_v51 }
 0xec0   :  { %v1446_v11 = vpop.f32.mrf.mxu3 }
 0xec1   :  { %v1447_v53 = vadd.f32 %v3462_v35, %v1446_v11  ;;  %v4364_v11 = vld [vmem:[%s4737_s2 + $0x20] sm:$0xff] }
 0xec2   :  { %1657 = vmatpush.bf16.msrb.mxu3 %v4364_v11 }
 0xec3   :  { %v1451_v61 = vmax.f32 %v1447_v53, 0.0  ;;  %v3464_v53 = vld [vmem:[%s4743_s8 + $0x4] ss:$0 sm:$0xff] }
 0xec8   :  { %v1448_v38 = vpop.f32.mrf.mxu3 }
 0xec9   :  { %v1449_v59 = vadd.f32 %v3462_v35, %v1448_v38 }
 0xecb   :  { %v1452_v62 = vmax.f32 %v1449_v59, 0.0 }
 0xecd   :  { %v1453_v55 = vpack.c.bf16 %v1452_v62, %v1451_v61  ;;  %v3465_v61 = vld [vmem:[%s4743_s8 + $0x5] ss:$0 sm:$0xff] }
 0xecf   :  { %3286 = vmatmul.msk.bf16.vlgmr.msra.gmra.mxu0 %vm1488_vm14, %v1453_v55 }
 0xf4c   :  { %v1501_v3 = vpop.f32.mrf.mxu0 }
 0xf4d   :  { %v1502_v60 = vadd.f32 %v3463_v4, %v1501_v3 }
 0xf4f   :  { %v1506_v12 = vadd.f32 %v1502_v60, %v1413_v42 }
 0xf51   :  { %3287 = vmatmul.msk.f32.vlgmr.msra.gmra.mxu1 %vm185_vm0, %v1506_v12 }
 0xf54   :  { %v1503_v2 = vpop.f32.mrf.mxu0 }
 0xf55   :  { %v1504_v19 = vadd.f32 %v3463_v4, %v1503_v2  ;;  %v4380_v2 = vld [vmem:[#allocation7 + $0x2] ss:$0 sm:$0xff] }
 0xf57   :  { %v1507_v21 = vadd.f32 %v1504_v19, %v1414_v31 }
 0xf59   :  { %3288 = vmatmul.msk.f32.gmra.mxu1 %vm185_vm0, %v1507_v21 }
 0xfce   :  { %v1533_v0 = vpop.f32.mrf.mxu1 }
 0xfcf   :  { %v1539_v23 = vmul.f32 0.03125, %v1533_v0 }
 0xfd1   :  { %1543 = vperm.xlu0 %3455, %v1539_v23  }
 0xfd6   :  { %v1536_v24 = vpop.f32.mrf.mxu1 }
 0xfd7   :  { %v1540_v57 = vmul.f32 0.03125, %v1536_v24 }
 0xfd9   :  { %1548 = vperm.xlu1 %3453, %v1540_v57  }
0x1043   :  { %v1544_v25 = vpop.permute.xlu0 %1543 }
0x1044   :  { %v1551_v26 = vsub.f32 %v1506_v12, %v1544_v25 }
0x1046   :  { %v1553_v30 = vmul.f32 %v1551_v26, %v1551_v26 }
0x1048   :  { %3289 = vmatmul.msk.f32.vlgmr.msrb.gmra.mxu2 %vm185_vm0, %v1553_v30 }
0x104b   :  { %v1549_v54 = vpop.permute.xlu1 %1548 }
0x104c   :  { %v1552_v16 = vsub.f32 %v1507_v21, %v1549_v54 }
0x104e   :  { %v1554_v39 = vmul.f32 %v1552_v16, %v1552_v16 }
0x1050   :  { %3290 = vmatmul.msk.f32.gmra.mxu2 %vm185_vm0, %v1554_v39 }
0x10cb   :  { %v1578_v40 = vpop.f32.mrf.mxu2 }
0x10cc   :  { %v1584_v37 = vmul.f32 0.03125, %v1578_v40 }
0x10ce   :  { %v1586_v20 = vadd.f32 1e-05, %v1584_v37 }
0x10d0   :  { %3548 = vrsqrt.f32 %v1586_v20  ;;  %vm1594_vm2 = vweird.f32 %v1586_v20 }
0x10d3   :  { %v1581_v41 = vpop.f32.mrf.mxu2 }
0x10d4   :  { %v1585_v50 = vmul.f32 0.03125, %v1581_v41 }
0x10d6   :  { %v3549_v1 = vpop.eup %3548  ;;  %v1587_v18 = vadd.f32 1e-05, %v1585_v50 }
0x10d7   :  { %v1589_v7 = vmul.f32 %v3549_v1, %v1586_v20  ;;  %vm1595_vm15 = vweird.f32 %v3549_v1 }
0x10d8   :  { %3550 = vrsqrt.f32 %v1587_v18  ;;  %vm1596_vm3 = vmor %vm1594_vm2, %vm1595_vm15  ;;  %vm1604_vm5 = vweird.f32 %v1587_v18 }
0x10d9   :  { %v1590_v46 = vmul.f32 %v3549_v1, %v1589_v7 }
0x10db   :  { %v1591_v13 = vmul.f32 0.5, %v1590_v46 }
0x10dd   :  { %v1592_v14 = vsub.f32 1.5, %v1591_v13 }
0x10de   :  { %v3551_v47 = vpop.eup %3550 }
0x10df   :  { %v1599_v33 = vmul.f32 %v3551_v47, %v1587_v18  ;;  %v1593_v43 = vmul.f32 %v3549_v1, %v1592_v14  ;;  %vm1605_vm4 = vweird.f32 %v3551_v47 }
0x10e0   :  { %vm1606_vm6 = vmor %vm1604_vm5, %vm1605_vm4 }
0x10e1   :  { %v1600_v42 = vmul.f32 %v3551_v47, %v1599_v33  ;;  %v1597_v31 = vsel %vm1596_vm3, %v3549_v1, %v1593_v43 }
0x10e2   :  { %1610 = vperm.xlu2 %3454, %v1597_v31  }
0x10e3   :  { %v1601_v51 = vmul.f32 0.5, %v1600_v42 }
0x10e5   :  { %v1602_v9 = vsub.f32 1.5, %v1601_v51 }
0x10e7   :  { %v1603_v10 = vmul.f32 %v3551_v47, %v1602_v9 }
0x10e9   :  { %v1607_v63 = vsel %vm1606_vm6, %v3551_v47, %v1603_v10 }
0x10ea   :  { %1615 = vperm.xlu0 %3455, %v1607_v63  }
0x113c   :  { %v1611_v35 = vpop.permute.xlu2 %1610 }
0x113d   :  { %v1618_v38 = vmul.f32 %v1611_v35, %v1551_v26 }
0x113f   :  { %v1621_v62 = vmul.f32 %v3464_v53, %v1618_v38 }
0x1141   :  { %v4373_v3 = vadd.f32 %v3465_v61, %v1621_v62 }
0x115c   :  { %v1616_v59 = vpop.permute.xlu0 %1615 }
0x115d   :  { %v1619_v55 = vmul.f32 %v1616_v59, %v1552_v16 }
0x115f   :  { %v1622_v4 = vmul.f32 %v3464_v53, %v1619_v55 }
0x1161   :  { %v4375_v60 = vadd.f32 %v3465_v61, %v1622_v4 }
0x1163   :  { %v1633_v12 = vpack.c.bf16 %v4375_v60, %v4373_v3 }
0x1165   :  { %3303 = vmatmul.msk.bf16.vlgmr.msrb.gmra.mxu3 %vm185_vm0, %v1633_v12 }
0x11e8   :  { %v1659_v19 = vpop.f32.mrf.mxu3 }
0x11e9   :  { %v1660_v21 = vadd.f32 %v4380_v2, %v1659_v19 }
0x11eb   :  { %v1665_v23 = vmul.f32 %v1660_v21, %v3921_v17  ;;  %v1771_v57 = vmul.f32 %v1660_v21, %v4025_v58  ;;  %v1732_v25 = vmul.f32 %v1660_v21, %v4039_v8  ;;  %v1832_v26 = vmul.f32 %v1660_v21, %v4037_v6 }
0x11ec   :  { %v2036_v30 = vmul.f32 %v4061_v48, %v1660_v21  ;;  %v4390_v54 = vmul.f32 %v1660_v21, %v3940_v22  ;;  %v4393_v16 = vmul.f32 %v1660_v21, %v4085_v15  ;;  %v4396_v39 = vmul.f32 %v4016_v56, %v1660_v21 }
0x11f0   :  { %v1661_v0 = vpop.f32.mrf.mxu3 }
0x11f1   :  { %v1662_v24 = vadd.f32 %v4380_v2, %v1661_v0 }
0x11f3   :  { %v1664_v40 = vpack.c.bf16 %v1662_v24, %v1660_v21  ;;  %v1666_v37 = vmul.f32 %v1662_v24, %v3921_v17  ;;  %v1772_v20 = vmul.f32 %v1662_v24, %v4025_v58  ;;  %v1733_v41 = vmul.f32 %v1662_v24, %v4039_v8 }
0x11f4   :  { %v1833_v50 = vmul.f32 %v1662_v24, %v4037_v6  ;;  %v2037_v1 = vmul.f32 %v4061_v48, %v1662_v24  ;;  %v4404_v18 = vmul.f32 %v1662_v24, %v3940_v22  ;;  %v4407_v7 = vmul.f32 %v1662_v24, %v4085_v15 }
0x11f5   :  { %1669 = vrot.lane.b32.xlu1 %v1664_v40, %s3794_s7  ;;  %v1667_v46 = vpack.c.bf16 %v1666_v37, %v1665_v23  ;;  %v1773_v13 = vpack.c.bf16 %v1772_v20, %v1771_v57  ;;  %v1734_v14 = vpack.c.bf16 %v1733_v41, %v1732_v25  ;;  %v4411_v47 = vmul.f32 %v4016_v56, %v1662_v24 }
0x11f6   :  { %v1834_v33 = vpack.c.bf16 %v1833_v50, %v1832_v26  ;;  %v2038_v8 = vpack.c.bf16 %v2037_v1, %v2036_v30  ;;  %v1875_v6 = vpack.c.bf16 %v4404_v18, %v4390_v54  ;;  %v1977_v48 = vpack.c.bf16 %v4407_v7, %v4393_v16 }
0x11f7   :  { %v1936_v43 = vpack.c.bf16 %v4411_v47, %v4396_v39 }
0x1267   :  { %v1670_v42 = vpop.permute.xlu1 %1669 }
0x1268   :  { %v1675_v31 = vsel %vm185_vm0, %v1670_v42, 0 }
0x1269   :  { %1684 = vmatpush.bf16.xpose.msrb.mxu0 %v1675_v31  ;;  %1784 = vmatpush.bf16.xpose.msra.mxu3 %v1675_v31 }
0x1270   :  { %3304 = vmatmul.msk.bf16.vlgmr.msrb.gmra.mxu0 %vm185_vm0, %v1667_v46  ;;  %3308 = vmatmul.msk.bf16.vlgmr.msra.gmra.mxu3 %vm185_vm0, %v1773_v13 }
0x1271   :  { %1823 = vmatpush.msra.mxu0 %v3793_v5  ;;  %1925 = vmatpush.msrb.mxu3 %v3793_v5 }
0x1273   :  { %1824 = vmatpush.msra.mxu0 %v3793_v5  ;;  %1926 = vmatpush.msrb.mxu3 %v3793_v5 }
0x12ed   :  { %v1686_v56 = vpop.f32.mrf.mxu0 }
0x12ee   :  { %v1687_v51 = vadd.f32 %v1686_v56, %v3955_v29 }
0x12f0   :  { %v1691_v9 = vsel %vm230_vm9, %v1687_v51, -inf }
0x12f1   :  { %1692 = vmax.xlane.f32.xlu2 %v1691_v9 }
0x12f3   :  { %v1786_v10 = vpop.f32.mrf.mxu3 }
0x12f4   :  { %v1787_v63 = vadd.f32 %v1786_v10, %v3955_v29 }
0x12f5   :  { %v1688_v35 = vpop.f32.mrf.mxu0 }
0x12f6   :  { %v1689_v53 = vadd.f32 %v1688_v35, %v3969_v34  ;;  %v1791_v38 = vsel %vm230_vm9, %v1787_v63, -inf }
0x12f7   :  { %1792 = vmax.xlane.f32.xlu1 %v1791_v38 }
0x12f8   :  { %v1694_v59 = vsel %vm230_vm9, %v1689_v53, -inf }
0x12f9   :  { %1695 = vmax.xlane.f32.xlu0 %v1694_v59 }
0x12fb   :  { %v1788_v61 = vpop.f32.mrf.mxu3 }
0x12fc   :  { %v1789_v62 = vadd.f32 %v1788_v61, %v3969_v34 }
0x12fe   :  { %v1794_v55 = vsel %vm230_vm9, %v1789_v62, -inf }
0x12ff   :  { %1795 = vmax.xlane.f32.xlu2 %v1794_v55 }
0x130d   :  { %1737 = vrot.lane.b32.xlu0 %v1734_v14, %s3797_s24 }
0x1310   :  { %1837 = vrot.lane.b32.xlu1 %v1834_v33, %s3797_s24 }
0x1318   :  { %2041 = vrot.lane.b32.xlu1 %v2038_v8, %s3797_s24 }
0x1364   :  { %v1693_v4 = vpop.xlane.xlu2 %1692 }
0x1365   :  { %v1697_v12 = vsub.f32 %v1687_v51, %v1693_v4 }
0x1367   :  { %v1699_v19 = vmul.f32 1.442695, %v1697_v12 }
0x1369   :  { %3552 = vpow2.f32 %v1699_v19 }
0x136a   :  { %v1793_v21 = vpop.xlane.xlu1 %1792 }
0x136b   :  { %v1797_v0 = vsub.f32 %v1787_v63, %v1793_v21 }
0x136c   :  { %v1696_v23 = vpop.xlane.xlu0 %1695 }
0x136d   :  { %v1799_v24 = vmul.f32 1.442695, %v1797_v0  ;;  %v1698_v57 = vsub.f32 %v1689_v53, %v1696_v23 }
0x136f   :  { %v3553_v25 = vpop.eup %3552  ;;  %3554 = vpow2.f32 %v1799_v24  ;;  %v1701_v26 = vmul.f32 1.442695, %v1698_v57 }
0x1370   :  { %3305 = vmatmul.msk.f32.vlgmr.msrb.gmra.mxu1 %vm230_vm9, %v3553_v25 }
0x1371   :  { %3556 = vpow2.f32 %v1701_v26 }
0x1372   :  { %v1796_v30 = vpop.xlane.xlu2 %1795 }
0x1373   :  { %v1798_v40 = vsub.f32 %v1789_v62, %v1796_v30 }
0x1375   :  { %v3555_v37 = vpop.eup %3554  ;;  %v1801_v20 = vmul.f32 1.442695, %v1798_v40 }
0x1376   :  { %3309 = vmatmul.msk.f32.vlgmr.msra.gmra.mxu0 %vm230_vm9, %v3555_v37 }
0x1377   :  { %v3557_v41 = vpop.eup %3556  ;;  %3558 = vpow2.f32 %v1801_v20 }
0x1378   :  { %3306 = vmatmul.msk.f32.gmra.mxu1 %vm230_vm9, %v3557_v41  ;;  %v1735_v46 = vpack.c.bf16 %v3557_v41, %v3553_v25 }
0x137d   :  { %v3559_v50 = vpop.eup %3558 }
0x137e   :  { %3310 = vmatmul.msk.f32.gmra.mxu0 %vm230_vm9, %v3559_v50  ;;  %v1835_v14 = vpack.c.bf16 %v3559_v50, %v3555_v37 }
0x137f   :  { %v1738_v1 = vpop.permute.xlu0 %1737 }
0x1380   :  { %1750 = vmatpush.bf16.msra.mxu2 %v1738_v1 }
0x1382   :  { %v1838_v13 = vpop.permute.xlu1 %1837 }
0x1383   :  { %3307 = vmatmul.msk.bf16.vlgmr.msra.gmra.mxu2 %vm230_vm9, %v1735_v46  ;;  %1850 = vmatpush.bf16.msra.mxu1 %v1838_v13 }
0x1384   :  { %1886 = vmatpush.bf16.xpose.msrb.mxu2 %v1675_v31 }
0x1386   :  { %3311 = vmatmul.msk.bf16.vlgmr.msra.gmra.mxu1 %vm230_vm9, %v1835_v14 }
0x1387   :  { %1988 = vmatpush.bf16.xpose.msrb.mxu1 %v1675_v31 }
0x138a   :  { %v2042_v33 = vpop.permute.xlu1 %2041 }
0x138b   :  { %2054 = vmatpush.bf16.msra.mxu3 %v2042_v33 }
0x138c   :  { %2027 = vmatpush.msra.mxu2 %v3793_v5 }
0x138e   :  { %2028 = vmatpush.msra.mxu2 %v3793_v5 }
0x138f   :  { %2128 = vmatpush.msra.mxu1 %v3793_v5 }
0x1391   :  { %2129 = vmatpush.msra.mxu1 %v3793_v5 }
0x1393   :  { %2130 = vmatpush.msra.mxu1 %v3793_v5  ;;  %3312 = vmatmul.msk.bf16.vlgmr.msrb.gmra.mxu2 %vm185_vm0, %v1875_v6 }
0x1394   :  { %2173 = vmatpush.msrb.mxu2 %v3793_v5 }
0x1395   :  { %2131 = vmatpush.msra.mxu1 %v3793_v5 }
0x1396   :  { %3316 = vmatmul.msk.bf16.vlgmr.msrb.gmra.mxu1 %vm185_vm0, %v1977_v48  ;;  %2174 = vmatpush.msrb.mxu2 %v3793_v5 }
0x1398   :  { %2175 = vmatpush.msrb.mxu2 %v3793_v5 }
0x139a   :  { %2176 = vmatpush.msrb.mxu2 %v3793_v5 }
0x13ed   :  { %v1726_v8 = vpop.f32.mrf.mxu1 }
0x13ee   :  { %3560 = vrcp.f32 %v1726_v8 }
0x13f3   :  { %v1826_v18 = vpop.f32.mrf.mxu0 }
0x13f4   :  { %v3561_v42 = vpop.eup %3560 }
0x13f5   :  { %1761 = vperm.xlu1 %3453, %v3561_v42   ;;  %v1729_v54 = vpop.f32.mrf.mxu1 }
0x13f6   :  { %3562 = vrcp.f32 %v1729_v54 }
0x13f7   :  { %3564 = vrcp.f32 %v1826_v18 }
0x13fb   :  { %v1829_v12 = vpop.f32.mrf.mxu0 }
0x13fc   :  { %v3563_v6 = vpop.eup %3562  ;;  %3566 = vrcp.f32 %v1829_v12 }
0x13fd   :  { %1766 = vperm.xlu1 %3453, %v3563_v6   ;;  %v3565_v31 = vpop.eup %3564 }
0x1403   :  { %v4461_v16 = vpop.f32.mrf.mxu1 }
0x1405   :  { %1861 = vperm.xlu1 %3453, %v3565_v31  }
0x1406   :  { %v4463_v7 = vpop.f32.mrf.mxu2 }
0x140b   :  { %v4465_v48 = vpop.f32.mrf.mxu1 }
0x140e   :  { %v4467_v56 = vpop.f32.mrf.mxu2 }
0x1413   :  { %v1990_v10 = vpop.f32.mrf.mxu1 }
0x1414   :  { %v1991_v35 = vadd.f32 %v1990_v10, %v3955_v29 }
0x1416   :  { %v1888_v51 = vpop.f32.mrf.mxu2  ;;  %v1995_v61 = vsel %vm230_vm9, %v1991_v35, -inf }
0x1417   :  { %v1889_v9 = vadd.f32 %v1888_v51, %v3955_v29  ;;  %v3567_v29 = vpop.eup %3566 }
0x1419   :  { %v1893_v63 = vsel %vm230_vm9, %v1889_v9, -inf }
0x141a   :  { %1894 = vmax.xlane.f32.xlu2 %v1893_v63 }
0x141b   :  { %v1992_v62 = vpop.f32.mrf.mxu1 }
0x141c   :  { %v1993_v55 = vadd.f32 %v1992_v62, %v3969_v34 }
0x141e   :  { %v1890_v53 = vpop.f32.mrf.mxu2  ;;  %v1998_v4 = vsel %vm230_vm9, %v1993_v55, -inf }
0x141f   :  { %v1891_v38 = vadd.f32 %v1890_v53, %v3969_v34 }
0x1421   :  { %v1896_v59 = vsel %vm230_vm9, %v1891_v38, -inf }
0x1422   :  { %1897 = vmax.xlane.f32.xlu0 %v1896_v59  ;;  %1996 = vmax.xlane.f32.xlu2 %v1995_v61 }
0x142a   :  { %1999 = vmax.xlane.f32.xlu2 %v1998_v4 }
0x1436   :  { %2080 = vrot.lane.b32.xlu0 %v4358_v27, %s3790_s13 }
0x1442   :  { %1939 = vrot.lane.b32.xlu2 %v1936_v43, %s3797_s24 }
0x144a   :  { %1866 = vperm.xlu2 %3454, %v3567_v29  }
0x1467   :  { %v1762_v18 = vpop.permute.xlu1 %1761 }
0x1468   :  { %v1769_v59 = vmul.f32 %v1762_v18, %v4463_v7 }
0x146f   :  { %v1767_v6 = vpop.permute.xlu1 %1766 }
0x1470   :  { %v1770_v4 = vmul.f32 %v1767_v6, %v4467_v56 }
0x1477   :  { %v1862_v51 = vpop.permute.xlu1 %1861 }
0x148d   :  { %v1895_v19 = vpop.xlane.xlu2 %1894 }
0x148e   :  { %v1899_v21 = vsub.f32 %v1889_v9, %v1895_v19 }
0x1490   :  { %v1901_v0 = vmul.f32 1.442695, %v1899_v21 }
0x1492   :  { %3568 = vpow2.f32 %v1901_v0 }
0x1495   :  { %v1898_v34 = vpop.xlane.xlu0 %1897  ;;  %v1997_v23 = vpop.xlane.xlu2 %1996 }
0x1496   :  { %v1900_v24 = vsub.f32 %v1891_v38, %v1898_v34  ;;  %v2001_v57 = vsub.f32 %v1991_v35, %v1997_v23  ;;  %v1869_v38 = vmul.f32 %v1862_v51, %v4461_v16 }
0x1498   :  { %v3569_v25 = vpop.eup %3568  ;;  %v1903_v26 = vmul.f32 1.442695, %v1900_v24  ;;  %v2003_v27 = vmul.f32 1.442695, %v2001_v57  ;;  %v1871_v12 = vadd.f32 %v1869_v38, %v1769_v59 }
0x1499   :  { %3313 = vmatmul.msk.f32.vlgmr.msrb.gmra.mxu3 %vm230_vm9, %v3569_v25 }
0x149a   :  { %3570 = vpow2.f32 %v1903_v26 }
0x149b   :  { %3572 = vpow2.f32 %v2003_v27 }
0x149d   :  { %v2000_v39 = vpop.xlane.xlu2 %1999 }
0x149e   :  { %v2002_v47 = vsub.f32 %v1993_v55, %v2000_v39 }
0x14a0   :  { %v3571_v43 = vpop.eup %3570  ;;  %v2005_v30 = vmul.f32 1.442695, %v2002_v47 }
0x14a1   :  { %v3573_v40 = vpop.eup %3572  ;;  %3314 = vmatmul.msk.f32.gmra.mxu3 %vm230_vm9, %v3571_v43  ;;  %v1937_v20 = vpack.c.bf16 %v3571_v43, %v3569_v25 }
0x14a2   :  { %3574 = vpow2.f32 %v2005_v30  ;;  %3317 = vmatmul.msk.f32.vlgmr.msra.gmra.mxu2 %vm230_vm9, %v3573_v40 }
0x14a3   :  { %2343 = vmatpush.msra.mxu2 %v3793_v5 }
0x14a5   :  { %v1940_v37 = vpop.permute.xlu2 %1939  ;;  %2344 = vmatpush.msra.mxu2 %v3793_v5 }
0x14a6   :  { %1952 = vmatpush.bf16.msrb.mxu0 %v1940_v37 }
0x14a8   :  { %v3575_v41 = vpop.eup %3574  ;;  %v2081_v31 = vpop.permute.xlu0 %2080 }
0x14a9   :  { %v2039_v50 = vpack.c.bf16 %v3575_v41, %v3573_v40  ;;  %3315 = vmatmul.msk.bf16.vlgmr.msrb.gmra.mxu0 %vm230_vm9, %v1937_v20 }
0x14aa   :  { %3318 = vmatmul.msk.f32.gmra.mxu2 %vm230_vm9, %v3575_v41  ;;  %2097 = vmatpush.bf16.msra.mxu0 %v2081_v31 }
0x14ab   :  { %3319 = vmatmul.msk.bf16.vlgmr.msra.gmra.mxu3 %vm230_vm9, %v2039_v50 }
0x14ad   :  { %v1867_v9 = vpop.permute.xlu2 %1866 }
0x151c   :  { %v1928_v1 = vpop.f32.mrf.mxu3 }
0x151d   :  { %3576 = vrcp.f32 %v1928_v1 }
0x1523   :  { %v3577_v46 = vpop.eup %3576 }
0x1524   :  { %1963 = vperm.xlu1 %3453, %v3577_v46   ;;  %v1931_v13 = vpop.f32.mrf.mxu3 }
0x1525   :  { %3578 = vrcp.f32 %v1931_v13  ;;  %v2030_v14 = vpop.f32.mrf.mxu2 }
0x1526   :  { %3580 = vrcp.f32 %v2030_v14  ;;  %v1954_v10 = vpop.f32.mrf.mxu0  ;;  %v4517_v14 = vld [vmem:[%s4737_s2 + $0x30] sm:$0xff] }
0x152b   :  { %v3579_v33 = vpop.eup %3578 }
0x152c   :  { %v3581_v8 = vpop.eup %3580  ;;  %1968 = vperm.xlu2 %3454, %v3579_v33  }
0x152d   :  { %2065 = vperm.xlu1 %3453, %v3581_v8   ;;  %v2033_v42 = vpop.f32.mrf.mxu2 }
0x152e   :  { %3582 = vrcp.f32 %v2033_v42  ;;  %v2056_v53 = vpop.f32.mrf.mxu3  ;;  %v1956_v55 = vpop.f32.mrf.mxu0 }
0x1534   :  { %v3583_v54 = vpop.eup %3582 }
0x1535   :  { %2078 = vrot.lane.b32.xlu1 %v4364_v11, %s3790_s13  ;;  %2070 = vperm.xlu2 %3454, %v3583_v54   ;;  %v1870_v11 = vmul.f32 %v1867_v9, %v4465_v48 }
0x1536   :  { %v2058_v21 = vpop.f32.mrf.mxu3 }
0x1537   :  { %v1872_v0 = vadd.f32 %v1870_v11, %v1770_v4 }
0x153d   :  { %2085 = vrot.lane.b32.xlu2 %v4380_v2, %s3790_s13 }
0x1586   :  { %v1969_v63 = vpop.permute.xlu2 %1968 }
0x1587   :  { %v1972_v29 = vmul.f32 %v1969_v63, %v1956_v55 }
0x1589   :  { %v1974_v24 = vadd.f32 %v1972_v29, %v1872_v0 }
0x158f   :  { %v2071_v2 = vpop.permute.xlu2 %2070 }
0x1590   :  { %v2074_v34 = vmul.f32 %v2071_v2, %v2058_v21  ;;  %v3467_v21 = vld [vmem:[%s4743_s8 + $0x8] ss:$0 sm:$0xff] }
0x1592   :  { %v2076_v16 = vadd.f32 %v2074_v34, %v1974_v24 }
0x1596   :  { %v1964_v35 = vpop.permute.xlu1 %1963 }
0x1597   :  { %v1971_v61 = vmul.f32 %v1964_v35, %v1954_v10  ;;  %v2086_v48 = vpop.permute.xlu2 %2085 }
0x1599   :  { %v1973_v23 = vadd.f32 %v1971_v61, %v1871_v12  ;;  %v4522_v12 = vld [vmem:[#allocation7 + $0x3] ss:$0 sm:$0xff] }
0x159f   :  { %v2066_v62 = vpop.permute.xlu1 %2065 }
0x15a0   :  { %v2073_v19 = vmul.f32 %v2066_v62, %v2056_v53 }
0x15a2   :  { %v2075_v57 = vadd.f32 %v2073_v19, %v1973_v23  ;;  %v3468_v23 = vld [vmem:[%s4743_s8 + $0x9] ss:$0 sm:$0xff] }
0x15a4   :  { %v2077_v7 = vpack.c.bf16 %v2076_v16, %v2075_v57 }
0x15a7   :  { %v2079_v25 = vpop.permute.xlu1 %2078 }
0x15a8   :  { %2098 = vmatpush.bf16.msra.mxu0 %v2079_v25 }
0x15ab   :  { %3320 = vmatmul.msk.bf16.vlgmr.msra.gmra.mxu0 %vm185_vm0, %v2077_v7 }
0x1628   :  { %v2100_v26 = vpop.f32.mrf.mxu0 }
0x1629   :  { %v2101_v27 = vadd.f32 %v2100_v26, %v2086_v48 }
0x162b   :  { %v2105_v56 = vadd.f32 %v2101_v27, %v4373_v3 }
0x162d   :  { %3323 = vmatmul.msk.f32.vlgmr.msra.gmra.mxu1 %vm185_vm0, %v2105_v56 }
0x1630   :  { %v2102_v39 = vpop.f32.mrf.mxu0 }
0x1631   :  { %v2103_v47 = vadd.f32 %v2102_v39, %v2086_v48 }
0x1633   :  { %v2106_v43 = vadd.f32 %v2103_v47, %v4375_v60  ;;  %v4509_v60 = vld [vmem:[%s4737_s2 + $0x38] sm:$0xff]  ;;  %s3179_s2 = sshll.u32 %s3799_s16, 4  ;;  %s3180_s2 = int_to_ptr.vmem [resolvable:$true] %s3179_s2 }
0x1634   :  { %2255 = vmatpush.bf16.msrb.mxu3 %v4509_v60 }
0x1635   :  { %3324 = vmatmul.msk.f32.gmra.mxu1 %vm185_vm0, %v2106_v43 }
0x1638   :  { %2256 = vmatpush.bf16.msrb.mxu3 %v4517_v14 }
0x16aa   :  { %v2133_v30 = vpop.f32.mrf.mxu1 }
0x16ab   :  { %v2139_v40 = vmul.f32 0.03125, %v2133_v30 }
0x16ad   :  { %2143 = vperm.xlu0 %3455, %v2139_v40  }
0x16b2   :  { %v2136_v37 = vpop.f32.mrf.mxu1 }
0x16b3   :  { %v2140_v20 = vmul.f32 0.03125, %v2136_v37 }
0x16b5   :  { %2148 = vperm.xlu1 %3453, %v2140_v20  }
0x16bd   :  { %2265 = vrot.lane.b32.xlu1 %v4509_v60, %s3794_s7 }
0x171f   :  { %v2144_v41 = vpop.permute.xlu0 %2143 }
0x1720   :  { %v2151_v50 = vsub.f32 %v2105_v56, %v2144_v41 }
0x1722   :  { %v2153_v1 = vmul.f32 %v2151_v50, %v2151_v50 }
0x1724   :  { %3325 = vmatmul.msk.f32.vlgmr.msrb.gmra.mxu2 %vm185_vm0, %v2153_v1 }
0x1727   :  { %v2149_v3 = vpop.permute.xlu1 %2148 }
0x1728   :  { %v2152_v46 = vsub.f32 %v2106_v43, %v2149_v3 }
0x172a   :  { %v2154_v13 = vmul.f32 %v2152_v46, %v2152_v46 }
0x172c   :  { %3326 = vmatmul.msk.f32.gmra.mxu2 %vm185_vm0, %v2154_v13 }
0x172f   :  { %v2266_v4 = vpop.permute.xlu1 %2265 }
0x1730   :  { %2279 = vmatpush.bf16.msrb.mxu0 %v2266_v4 }
0x17a7   :  { %v2178_v33 = vpop.f32.mrf.mxu2 }
0x17a8   :  { %v2184_v8 = vmul.f32 0.03125, %v2178_v33 }
0x17aa   :  { %v2186_v42 = vadd.f32 1e-05, %v2184_v8 }
0x17ac   :  { %3584 = vrsqrt.f32 %v2186_v42  ;;  %vm2194_vm1 = vweird.f32 %v2186_v42 }
0x17af   :  { %v2181_v54 = vpop.f32.mrf.mxu2 }
0x17b0   :  { %v2185_v18 = vmul.f32 0.03125, %v2181_v54 }
0x17b2   :  { %v3585_v6 = vpop.eup %3584  ;;  %v2187_v31 = vadd.f32 1e-05, %v2185_v18 }
0x17b3   :  { %v2189_v51 = vmul.f32 %v3585_v6, %v2186_v42  ;;  %vm2195_vm7 = vweird.f32 %v3585_v6 }
0x17b4   :  { %3586 = vrsqrt.f32 %v2187_v31  ;;  %vm2196_vm8 = vmor %vm2194_vm1, %vm2195_vm7  ;;  %vm2204_vm11 = vweird.f32 %v2187_v31 }
0x17b5   :  { %v2190_v9 = vmul.f32 %v3585_v6, %v2189_v51 }
0x17b7   :  { %v2191_v10 = vmul.f32 0.5, %v2190_v9 }
0x17b9   :  { %v2192_v63 = vsub.f32 1.5, %v2191_v10 }
0x17ba   :  { %v3587_v35 = vpop.eup %3586 }
0x17bb   :  { %v2199_v53 = vmul.f32 %v3587_v35, %v2187_v31  ;;  %v2193_v38 = vmul.f32 %v3585_v6, %v2192_v63  ;;  %vm2205_vm10 = vweird.f32 %v3587_v35 }
0x17bc   :  { %vm2206_vm12 = vmor %vm2204_vm11, %vm2205_vm10 }
0x17bd   :  { %v2200_v59 = vmul.f32 %v3587_v35, %v2199_v53  ;;  %v2197_v11 = vsel %vm2196_vm8, %v3585_v6, %v2193_v38 }
0x17be   :  { %2210 = vperm.xlu2 %3454, %v2197_v11  }
0x17bf   :  { %v2201_v61 = vmul.f32 0.5, %v2200_v59 }
0x17c1   :  { %v2202_v62 = vsub.f32 1.5, %v2201_v61 }
0x17c3   :  { %v2203_v55 = vmul.f32 %v3587_v35, %v2202_v62 }
0x17c5   :  { %v2207_v2 = vsel %vm2206_vm12, %v3587_v35, %v2203_v55 }
0x17c6   :  { %2263 = vrot.lane.b32.xlu2 %v4517_v14, %s3794_s7  ;;  %2215 = vperm.xlu0 %3455, %v2207_v2  }
0x17ce   :  { %2270 = vrot.lane.b32.xlu0 %v4522_v12, %s3794_s7 }
0x1818   :  { %v2211_v29 = vpop.permute.xlu2 %2210 }
0x1819   :  { %v2218_v0 = vmul.f32 %v2211_v29, %v2151_v50 }
0x181b   :  { %v2221_v24 = vmul.f32 %v3467_v21, %v2218_v0 }
0x181d   :  { %v4534_v25 = vadd.f32 %v3468_v23, %v2221_v24 }
0x1820   :  { %v2264_v19 = vpop.permute.xlu2 %2263 }
0x1821   :  { %2280 = vmatpush.bf16.msrb.mxu0 %v2264_v19 }
0x1824   :  { %3340 = vmatmul.msk.bf16.vlgmr.msrb.gmra.mxu0 %vm185_vm0, %v4137_v49 }
0x1838   :  { %v2216_v34 = vpop.permute.xlu0 %2215 }
0x1839   :  { %v2219_v57 = vmul.f32 %v2216_v34, %v2152_v46 }
0x183b   :  { %v2222_v16 = vmul.f32 %v3467_v21, %v2219_v57 }
0x183d   :  { %v4536_v7 = vadd.f32 %v3468_v23, %v2222_v16 }
0x183f   :  { %v2232_v49 = vpack.c.bf16 %v4536_v7, %v4534_v25 }
0x1840   :  { %v2271_v26 = vpop.permute.xlu0 %2270 }
0x1841   :  { %3339 = vmatmul.msk.bf16.vlgmr.msrb.gmra.mxu3 %vm185_vm0, %v2232_v49 }
0x18a1   :  { %v2282_v48 = vpop.f32.mrf.mxu0 }
0x18a2   :  { %v2283_v27 = vadd.f32 %v2282_v48, %v2271_v26 }
0x18a4   :  { %v2352_v47 = vmul.f32 %v2283_v27, %v4217_v28  ;;  %v2554_v43 = vmul.f32 %v2283_v27, %v4296_v52  ;;  %v2452_v30 = vmul.f32 %v2283_v27, %v4215_v32  ;;  %v4548_v50 = vmul.f32 %v2283_v27, %v4243_v45 }
0x18a9   :  { %v2284_v56 = vpop.f32.mrf.mxu0 }
0x18aa   :  { %v2285_v39 = vadd.f32 %v2284_v56, %v2271_v26 }
0x18ac   :  { %v2287_v40 = vpack.c.bf16 %v2285_v39, %v2283_v27  ;;  %v2353_v37 = vmul.f32 %v2285_v39, %v4217_v28  ;;  %v2555_v20 = vmul.f32 %v2285_v39, %v4296_v52  ;;  %v2453_v41 = vmul.f32 %v2285_v39, %v4215_v32 }
0x18ad   :  { %v4551_v1 = vmul.f32 %v2285_v39, %v4243_v45 }
0x18ae   :  { %v4554_v3 = vsel %vm185_vm0, %v2287_v40, 0  ;;  %v2354_v46 = vpack.c.bf16 %v2353_v37, %v2352_v47  ;;  %v2556_v13 = vpack.c.bf16 %v2555_v20, %v2554_v43  ;;  %v2454_v33 = vpack.c.bf16 %v2453_v41, %v2452_v30 }
0x18af   :  { %2304 = vmatpush.bf16.xpose.msrb.mxu1 %v4554_v3  ;;  %2404 = vmatpush.bf16.xpose.msra.mxu0 %v4554_v3  ;;  %v2658_v28 = vpack.c.bf16 %v4551_v1, %v4548_v50 }
0x18b7   :  { %2443 = vmatpush.msra.mxu1 %v3793_v5  ;;  %2545 = vmatpush.msrb.mxu0 %v3793_v5 }
0x18b9   :  { %2444 = vmatpush.msra.mxu1 %v3793_v5  ;;  %2546 = vmatpush.msrb.mxu0 %v3793_v5 }
0x18c4   :  { %v2258_v32 = vpop.f32.mrf.mxu3 }
0x18c5   :  { %v2259_v45 = vadd.f32 %v4522_v12, %v2258_v32 }
0x18c7   :  { %v2288_v42 = vmul.f32 %v2259_v45, %v3921_v17  ;;  %v2391_v54 = vmul.f32 %v2259_v45, %v4025_v58  ;;  %v4569_v18 = vmul.f32 %v2259_v45, %v3940_v22  ;;  %v4572_v6 = vmul.f32 %v2259_v45, %v4085_v15 }
0x18cc   :  { %v2260_v52 = vpop.f32.mrf.mxu3 }
0x18cd   :  { %v2261_v8 = vadd.f32 %v4522_v12, %v2260_v52 }
0x18cf   :  { %v2289_v31 = vmul.f32 %v2261_v8, %v3921_v17  ;;  %v2392_v51 = vmul.f32 %v2261_v8, %v4025_v58  ;;  %v4577_v9 = vmul.f32 %v2261_v8, %v3940_v22  ;;  %v4580_v10 = vmul.f32 %v2261_v8, %v4085_v15 }
0x18d1   :  { %v2290_v63 = vpack.c.bf16 %v2289_v31, %v2288_v42  ;;  %v2393_v35 = vpack.c.bf16 %v2392_v51, %v2391_v54  ;;  %v2495_v53 = vpack.c.bf16 %v4577_v9, %v4569_v18  ;;  %v2597_v38 = vpack.c.bf16 %v4580_v10, %v4572_v6 }
0x18d3   :  { %3341 = vmatmul.msk.bf16.vlgmr.msrb.gmra.mxu1 %vm185_vm0, %v2290_v63  ;;  %3345 = vmatmul.msk.bf16.vlgmr.msra.gmra.mxu0 %vm185_vm0, %v2393_v35 }
0x1950   :  { %v2306_v17 = vpop.f32.mrf.mxu1  ;;  %v2406_v58 = vpop.f32.mrf.mxu0 }
0x1951   :  { %v2307_v22 = vadd.f32 %v2306_v17, %v4200_v36  ;;  %v2407_v59 = vadd.f32 %v2406_v58, %v4200_v36 }
0x1953   :  { %v2411_v15 = vsel %vm230_vm9, %v2407_v59, -inf  ;;  %v2311_v11 = vsel %vm230_vm9, %v2307_v22, -inf }
0x1954   :  { %2412 = vmax.xlane.f32.xlu0 %v2411_v15  ;;  %2312 = vmax.xlane.f32.xlu1 %v2311_v11 }
0x1958   :  { %v2308_v61 = vpop.f32.mrf.mxu1  ;;  %v2408_v62 = vpop.f32.mrf.mxu0 }
0x1959   :  { %v2309_v55 = vadd.f32 %v2308_v61, %v4207_v44  ;;  %v2409_v2 = vadd.f32 %v2408_v62, %v4207_v44 }
0x195b   :  { %v2314_v4 = vsel %vm230_vm9, %v2309_v55, -inf  ;;  %v2414_v29 = vsel %vm230_vm9, %v2409_v2, -inf }
0x195c   :  { %2315 = vmax.xlane.f32.xlu2 %v2314_v4  ;;  %2415 = vmax.xlane.f32.xlu1 %v2414_v29 }
0x1968   :  { %2357 = vrot.lane.b32.xlu0 %v2354_v46, %s3794_s7 }
0x1970   :  { %2559 = vrot.lane.b32.xlu0 %v2556_v13, %s3794_s7 }
0x1974   :  { %2457 = vrot.lane.b32.xlu2 %v2454_v33, %s3794_s7 }
0x19c7   :  { %v2413_v19 = vpop.xlane.xlu0 %2412  ;;  %v2313_v21 = vpop.xlane.xlu1 %2312 }
0x19c8   :  { %v2417_v0 = vsub.f32 %v2407_v59, %v2413_v19  ;;  %v2317_v34 = vsub.f32 %v2307_v22, %v2313_v21 }
0x19ca   :  { %v2419_v23 = vmul.f32 1.442695, %v2417_v0  ;;  %v2319_v24 = vmul.f32 1.442695, %v2317_v34 }
0x19cc   :  { %3588 = vpow2.f32 %v2419_v23 }
0x19cd   :  { %3590 = vpow2.f32 %v2319_v24 }
0x19cf   :  { %v2316_v57 = vpop.xlane.xlu2 %2315  ;;  %v2416_v16 = vpop.xlane.xlu1 %2415 }
0x19d0   :  { %v2318_v49 = vsub.f32 %v2309_v55, %v2316_v57  ;;  %v2418_v48 = vsub.f32 %v2409_v2, %v2416_v16 }
0x19d2   :  { %v3589_v26 = vpop.eup %3588  ;;  %v2321_v27 = vmul.f32 1.442695, %v2318_v49  ;;  %v2421_v56 = vmul.f32 1.442695, %v2418_v48 }
0x19d3   :  { %v3591_v39 = vpop.eup %3590  ;;  %3346 = vmatmul.msk.f32.vlgmr.msra.gmra.mxu1 %vm230_vm9, %v3589_v26 }
0x19d4   :  { %3592 = vpow2.f32 %v2321_v27  ;;  %3342 = vmatmul.msk.f32.vlgmr.msra.gmra.mxu2 %vm230_vm9, %v3591_v39 }
0x19d5   :  { %3594 = vpow2.f32 %v2421_v56 }
0x19d7   :  { %v2458_v47 = vpop.permute.xlu2 %2457 }
0x19d8   :  { %2470 = vmatpush.bf16.msrb.mxu2 %v2458_v47 }
0x19da   :  { %v3593_v43 = vpop.eup %3592  ;;  %v2358_v30 = vpop.permute.xlu0 %2357 }
0x19db   :  { %v3595_v40 = vpop.eup %3594  ;;  %v2355_v37 = vpack.c.bf16 %v3593_v43, %v3591_v39  ;;  %2370 = vmatpush.bf16.msra.mxu3 %v2358_v30 }
0x19dc   :  { %2608 = vmatpush.bf16.xpose.msra.mxu2 %v4554_v3  ;;  %3347 = vmatmul.msk.f32.gmra.mxu1 %vm230_vm9, %v3595_v40  ;;  %v2455_v20 = vpack.c.bf16 %v3595_v40, %v3589_v26 }
0x19dd   :  { %3343 = vmatmul.msk.f32.gmra.mxu2 %vm230_vm9, %v3593_v43 }
0x19de   :  { %3344 = vmatmul.msk.bf16.vlgmr.msra.gmra.mxu3 %vm230_vm9, %v2355_v37 }
0x19df   :  { %2506 = vmatpush.bf16.xpose.msrb.mxu3 %v4554_v3 }
0x19e2   :  { %v2560_v41 = vpop.permute.xlu0 %2559 }
0x19e3   :  { %2572 = vmatpush.bf16.msrb.mxu1 %v2560_v41 }
0x19e5   :  { %3348 = vmatmul.msk.bf16.vlgmr.msrb.gmra.mxu2 %vm230_vm9, %v2455_v20 }
0x19e6   :  { %2746 = vmatpush.msrb.mxu2 %v3793_v5 }
0x19e7   :  { %2647 = vmatpush.msra.mxu3 %v3793_v5 }
0x19e8   :  { %2747 = vmatpush.msrb.mxu2 %v3793_v5 }
0x19e9   :  { %2648 = vmatpush.msra.mxu3 %v3793_v5 }
0x19ea   :  { %2748 = vmatpush.msrb.mxu2 %v3793_v5 }
0x19ec   :  { %2749 = vmatpush.msrb.mxu2 %v3793_v5 }
0x19ee   :  { %3349 = vmatmul.msk.bf16.vlgmr.msrb.gmra.mxu3 %vm185_vm0, %v2495_v53 }
0x19ef   :  { %2791 = vmatpush.msrb.mxu3 %v3793_v5 }
0x19f1   :  { %2792 = vmatpush.msrb.mxu3 %v3793_v5 }
0x19f3   :  { %2793 = vmatpush.msrb.mxu3 %v3793_v5 }
0x19f5   :  { %3353 = vmatmul.msk.bf16.vlgmr.msra.gmra.mxu2 %vm185_vm0, %v2597_v38  ;;  %2794 = vmatpush.msrb.mxu3 %v3793_v5 }
0x19f6   :  { %2958 = vmatpush.msra.mxu2 %v3793_v5 }
0x19f8   :  { %2959 = vmatpush.msra.mxu2 %v3793_v5 }
0x19fa   :  { %2960 = vmatpush.msra.mxu2 %v3793_v5 }
0x19fc   :  { %2961 = vmatpush.msra.mxu2 %v3793_v5 }
0x1a50   :  { %v2446_v32 = vpop.f32.mrf.mxu1 }
0x1a57   :  { %v2346_v3 = vpop.f32.mrf.mxu2 }
0x1a58   :  { %3596 = vrcp.f32 %v2346_v3 }
0x1a59   :  { %v2449_v22 = vpop.f32.mrf.mxu1 }
0x1a5e   :  { %v3597_v46 = vpop.eup %3596 }
0x1a5f   :  { %2381 = vperm.xlu0 %3455, %v3597_v46  }
0x1a60   :  { %v2349_v13 = vpop.f32.mrf.mxu2 }
0x1a61   :  { %3598 = vrcp.f32 %v2349_v13  ;;  %v4629_v33 = vpop.f32.mrf.mxu3 }
0x1a62   :  { %3600 = vrcp.f32 %v2446_v32 }
0x1a63   :  { %3602 = vrcp.f32 %v2449_v22 }
0x1a67   :  { %v3599_v45 = vpop.eup %3598 }
0x1a68   :  { %2386 = vperm.xlu0 %3455, %v3599_v45   ;;  %v4631_v52 = vpop.f32.mrf.mxu2  ;;  %v3601_v42 = vpop.eup %3600 }
0x1a69   :  { %v4633_v8 = vpop.f32.mrf.mxu3 }
0x1a70   :  { %2481 = vperm.xlu0 %3455, %v3601_v42   ;;  %v4635_v54 = vpop.f32.mrf.mxu2 }
0x1a71   :  { %v2508_v18 = vpop.f32.mrf.mxu3 }
0x1a72   :  { %v2509_v6 = vadd.f32 %v2508_v18, %v4200_v36 }
0x1a74   :  { %v2513_v31 = vsel %vm230_vm9, %v2509_v6, -inf }
0x1a75   :  { %2514 = vmax.xlane.f32.xlu1 %v2513_v31 }
0x1a78   :  { %v2610_v51 = vpop.f32.mrf.mxu2 }
0x1a79   :  { %v2611_v9 = vadd.f32 %v2610_v51, %v4200_v36  ;;  %v2510_v10 = vpop.f32.mrf.mxu3  ;;  %v3603_v36 = vpop.eup %3602 }
0x1a7a   :  { %v2511_v63 = vadd.f32 %v2510_v10, %v4207_v44 }
0x1a7b   :  { %v2615_v53 = vsel %vm230_vm9, %v2611_v9, -inf }
0x1a7c   :  { %v2516_v35 = vsel %vm230_vm9, %v2511_v63, -inf }
0x1a7d   :  { %2517 = vmax.xlane.f32.xlu2 %v2516_v35  ;;  %2616 = vmax.xlane.f32.xlu1 %v2615_v53 }
0x1a80   :  { %v2612_v38 = vpop.f32.mrf.mxu2 }
0x1a81   :  { %v2613_v17 = vadd.f32 %v2612_v38, %v4207_v44 }
0x1a83   :  { %v2618_v58 = vsel %vm230_vm9, %v2613_v17, -inf }
0x1a85   :  { %2619 = vmax.xlane.f32.xlu1 %v2618_v58 }
0x1a95   :  { %2700 = vrot.lane.b32.xlu2 %v4509_v60, %s3790_s13 }
0x1a9e   :  { %2661 = vrot.lane.b32.xlu1 %v2658_v28, %s3794_s7 }
0x1aa6   :  { %2486 = vperm.xlu1 %3453, %v3603_v36  }
0x1ad1   :  { %v2382_v39 = vpop.permute.xlu0 %2381 }
0x1ada   :  { %v2387_v43 = vpop.permute.xlu0 %2386 }
0x1ae2   :  { %v2482_v30 = vpop.permute.xlu0 %2481 }
0x1ae3   :  { %v2489_v13 = vmul.f32 %v2482_v30, %v4631_v52  ;;  %v3427_v30 = vld [vmem:[%s4739_s4 + $0x18] sm:$0xff] }
0x1ae8   :  { %v2515_v59 = vpop.xlane.xlu1 %2514 }
0x1ae9   :  { %v2519_v15 = vsub.f32 %v2509_v6, %v2515_v59 }
0x1aeb   :  { %v2521_v11 = vmul.f32 1.442695, %v2519_v15 }
0x1aed   :  { %3604 = vpow2.f32 %v2521_v11 }
0x1af0   :  { %v2518_v44 = vpop.xlane.xlu2 %2517  ;;  %v2617_v61 = vpop.xlane.xlu1 %2616 }
0x1af1   :  { %v2520_v62 = vsub.f32 %v2511_v63, %v2518_v44  ;;  %v2621_v55 = vsub.f32 %v2611_v9, %v2617_v61 }
0x1af3   :  { %v3605_v2 = vpop.eup %3604  ;;  %v2523_v4 = vmul.f32 1.442695, %v2520_v62  ;;  %v2623_v60 = vmul.f32 1.442695, %v2621_v55 }
0x1af4   :  { %3350 = vmatmul.msk.f32.vlgmr.msrb.gmra.mxu0 %vm230_vm9, %v3605_v2 }
0x1af5   :  { %3606 = vpow2.f32 %v2523_v4 }
0x1af6   :  { %3608 = vpow2.f32 %v2623_v60 }
0x1af8   :  { %v2620_v50 = vpop.xlane.xlu1 %2619  ;;  %v2701_v47 = vpop.permute.xlu2 %2700 }
0x1af9   :  { %v2622_v1 = vsub.f32 %v2613_v17, %v2620_v50  ;;  %2716 = vmatpush.bf16.msra.mxu1 %v2701_v47 }
0x1afb   :  { %v3607_v28 = vpop.eup %3606  ;;  %v2625_v29 = vmul.f32 1.442695, %v2622_v1 }
0x1afc   :  { %v3609_v19 = vpop.eup %3608  ;;  %v2557_v21 = vpack.c.bf16 %v3607_v28, %v3605_v2  ;;  %3351 = vmatmul.msk.f32.gmra.mxu0 %vm230_vm9, %v3607_v28 }
0x1afd   :  { %3610 = vpow2.f32 %v2625_v29  ;;  %3354 = vmatmul.msk.f32.vlgmr.msra.gmra.mxu3 %vm230_vm9, %v3609_v19 }
0x1afe   :  { %3352 = vmatmul.msk.bf16.vlgmr.msrb.gmra.mxu1 %vm230_vm9, %v2557_v21  ;;  %3003 = vmatpush.msra.mxu3 %v3793_v5 }
0x1b00   :  { %3004 = vmatpush.msra.mxu3 %v3793_v5 }
0x1b02   :  { %3005 = vmatpush.msra.mxu3 %v3793_v5 }
0x1b03   :  { %v3611_v0 = vpop.eup %3610 }
0x1b04   :  { %3006 = vmatpush.msra.mxu3 %v3793_v5  ;;  %v2659_v23 = vpack.c.bf16 %v3611_v0, %v3609_v19 }
0x1b05   :  { %3355 = vmatmul.msk.f32.gmra.mxu3 %vm230_vm9, %v3611_v0 }
0x1b10   :  { %v2662_v34 = vpop.permute.xlu1 %2661 }
0x1b11   :  { %2674 = vmatpush.bf16.msra.mxu0 %v2662_v34 }
0x1b14   :  { %3356 = vmatmul.msk.bf16.vlgmr.msra.gmra.mxu0 %vm230_vm9, %v2659_v23 }
0x1b15   :  { %2873 = vmatpush.bf16.msrb.mxu0 %v3427_v30  ;;  %v3475_v30 = vld [vmem:[%s4743_s8 + $0xd] ss:$0 sm:$0xff] }
0x1b18   :  { %v2487_v40 = vpop.permute.xlu1 %2486 }
0x1b19   :  { %v2490_v32 = vmul.f32 %v2487_v40, %v4635_v54  ;;  %v3426_v40 = vld [vmem:[%s4739_s4 + $0x10] sm:$0xff] }
0x1b1a   :  { %2874 = vmatpush.bf16.msrb.mxu0 %v3426_v40 }
0x1b1e   :  { %3075 = vmatpush.msra.mxu0 %v3793_v5 }
0x1b20   :  { %3076 = vmatpush.msra.mxu0 %v3793_v5 }
0x1b22   :  { %3077 = vmatpush.msra.mxu0 %v3793_v5 }
0x1b24   :  { %3078 = vmatpush.msra.mxu0 %v3793_v5 }
0x1b71   :  { %v2548_v24 = vpop.f32.mrf.mxu0 }
0x1b72   :  { %3612 = vrcp.f32 %v2548_v24 }
0x1b78   :  { %v3613_v57 = vpop.eup %3612 }
0x1b79   :  { %2583 = vperm.xlu0 %3455, %v3613_v57   ;;  %v2551_v16 = vpop.f32.mrf.mxu0 }
0x1b7a   :  { %3614 = vrcp.f32 %v2551_v16 }
0x1b7b   :  { %v2574_v20 = vpop.f32.mrf.mxu1 }
0x1b80   :  { %v3615_v49 = vpop.eup %3614  ;;  %v2650_v48 = vpop.f32.mrf.mxu3 }
0x1b81   :  { %3616 = vrcp.f32 %v2650_v48  ;;  %2588 = vperm.xlu1 %3453, %v3615_v49  }
0x1b83   :  { %v2576_v45 = vpop.f32.mrf.mxu1 }
0x1b87   :  { %v3617_v26 = vpop.eup %3616 }
0x1b88   :  { %2685 = vperm.xlu0 %3455, %v3617_v26   ;;  %v2653_v27 = vpop.f32.mrf.mxu3 }
0x1b89   :  { %3618 = vrcp.f32 %v2653_v27 }
0x1b8f   :  { %v3619_v56 = vpop.eup %3618 }
0x1b90   :  { %2690 = vperm.xlu1 %3453, %v3619_v56   ;;  %2698 = vrot.lane.b32.xlu0 %v4517_v14, %s3790_s13  ;;  %v2389_v14 = vmul.f32 %v2382_v39, %v4629_v33 }
0x1b91   :  { %v2676_v41 = vpop.f32.mrf.mxu0 }
0x1b92   :  { %v2491_v6 = vadd.f32 %v2489_v13, %v2389_v14 }
0x1b98   :  { %2704 = vrot.lane.b32.xlu1 %v4522_v12, %s3790_s13  ;;  %v2390_v12 = vmul.f32 %v2387_v43, %v4633_v8 }
0x1b99   :  { %v2678_v51 = vpop.f32.mrf.mxu0 }
0x1b9a   :  { %v2492_v31 = vadd.f32 %v2490_v32, %v2390_v12 }
0x1beb   :  { %v2584_v37 = vpop.permute.xlu0 %2583 }
0x1bec   :  { %v2591_v42 = vmul.f32 %v2584_v37, %v2574_v20  ;;  %v3470_v20 = vld [vmem:[%s4743_s8 + $0xa] ss:$0 sm:$0xff] }
0x1bee   :  { %v2593_v35 = vadd.f32 %v2591_v42, %v2491_v6  ;;  %v3430_v6 = vld [vmem:[%s4740_s5 + $0x30] sm:$0xff] }
0x1bf3   :  { %v2589_v3 = vpop.permute.xlu1 %2588 }
0x1bf4   :  { %v2592_v18 = vmul.f32 %v2589_v3, %v2576_v45 }
0x1bf6   :  { %v2594_v53 = vadd.f32 %v2592_v18, %v2492_v31  ;;  %v3431_v18 = vld [vmem:[%s4740_s5 + $0x38] sm:$0xff]  ;;  %v3429_v31 = vld [vmem:[%s4740_s5 + $0x28] sm:$0xff] }
0x1bfa   :  { %v2686_v46 = vpop.permute.xlu0 %2685 }
0x1bfb   :  { %v2693_v9 = vmul.f32 %v2686_v46, %v2676_v41  ;;  %v3471_v46 = vld [vmem:[%s4743_s8 + $0xb] ss:$0 sm:$0xff] }
0x1bfd   :  { %v2695_v52 = vadd.f32 %v2693_v9, %v2593_v35 }
0x1c02   :  { %v2691_v10 = vpop.permute.xlu1 %2690  ;;  %v2699_v63 = vpop.permute.xlu0 %2698 }
0x1c03   :  { %v2694_v38 = vmul.f32 %v2691_v10, %v2678_v51  ;;  %2717 = vmatpush.bf16.msra.mxu1 %v2699_v63  ;;  %v3428_v51 = vld [vmem:[%s4740_s5 + $0x20] sm:$0xff] }
0x1c04   :  { %v3472_v10 = vld [vmem:[#allocation8 + $0x1] ss:$0 sm:$0xff] }
0x1c05   :  { %v2696_v17 = vadd.f32 %v2694_v38, %v2594_v53 }
0x1c07   :  { %v2697_v54 = vpack.c.bf16 %v2696_v17, %v2695_v52  ;;  %2926 = vmatpush.bf16.msrb.mxu1 %v3431_v18 }
0x1c09   :  { %3357 = vmatmul.msk.bf16.vlgmr.msra.gmra.mxu1 %vm185_vm0, %v2697_v54  ;;  %v3473_v54 = vld [vmem:[#allocation10 + $0x1] ss:$0 sm:$0xff] }
0x1c0a   :  { %v2705_v33 = vpop.permute.xlu1 %2704 }
0x1c0b   :  { %2927 = vmatpush.bf16.msrb.mxu1 %v3430_v6 }
0x1c0f   :  { %2928 = vmatpush.bf16.msrb.mxu1 %v3429_v31 }
0x1c13   :  { %2929 = vmatpush.bf16.msrb.mxu1 %v3428_v51 }
0x1c17   :  { %3120 = vmatpush.msra.mxu1 %v3793_v5 }
0x1c19   :  { %3121 = vmatpush.msra.mxu1 %v3793_v5 }
0x1c1b   :  { %3122 = vmatpush.msra.mxu1 %v3793_v5 }
0x1c1d   :  { %3123 = vmatpush.msra.mxu1 %v3793_v5 }
0x1c86   :  { %v2719_v58 = vpop.f32.mrf.mxu1 }
0x1c87   :  { %v2720_v8 = vadd.f32 %v2719_v58, %v2705_v33 }
0x1c89   :  { %v2724_v22 = vadd.f32 %v2720_v8, %v4534_v25 }
0x1c8b   :  { %3360 = vmatmul.msk.f32.vlgmr.msrb.gmra.mxu2 %vm185_vm0, %v2724_v22 }
0x1c8e   :  { %v2721_v36 = vpop.f32.mrf.mxu1 }
0x1c8f   :  { %v2722_v59 = vadd.f32 %v2721_v36, %v2705_v33 }
0x1c91   :  { %v2725_v15 = vadd.f32 %v2722_v59, %v4536_v7 }
0x1c93   :  { %3361 = vmatmul.msk.f32.gmra.mxu2 %vm185_vm0, %v2725_v15 }
0x1d0e   :  { %v2751_v11 = vpop.f32.mrf.mxu2 }
0x1d0f   :  { %v2757_v44 = vmul.f32 0.03125, %v2751_v11 }
0x1d11   :  { %2761 = vperm.xlu0 %3455, %v2757_v44  }
0x1d16   :  { %v2754_v61 = vpop.f32.mrf.mxu2 }
0x1d17   :  { %v2758_v62 = vmul.f32 0.03125, %v2754_v61 }
0x1d19   :  { %2766 = vperm.xlu1 %3453, %v2758_v62  }
0x1d83   :  { %v2762_v55 = vpop.permute.xlu0 %2761 }
0x1d84   :  { %v2769_v2 = vsub.f32 %v2724_v22, %v2762_v55 }
0x1d86   :  { %v2771_v4 = vmul.f32 %v2769_v2, %v2769_v2 }
0x1d88   :  { %3362 = vmatmul.msk.f32.vlgmr.msrb.gmra.mxu3 %vm185_vm0, %v2771_v4 }
0x1d8b   :  { %v2767_v25 = vpop.permute.xlu1 %2766 }
0x1d8c   :  { %v2770_v60 = vsub.f32 %v2725_v15, %v2767_v25 }
0x1d8e   :  { %v2772_v50 = vmul.f32 %v2770_v60, %v2770_v60 }
0x1d90   :  { %3363 = vmatmul.msk.f32.gmra.mxu3 %vm185_vm0, %v2772_v50 }
0x1e0b   :  { %v2796_v1 = vpop.f32.mrf.mxu3 }
0x1e0c   :  { %v2802_v7 = vmul.f32 0.03125, %v2796_v1 }
0x1e0e   :  { %v2804_v28 = vadd.f32 1e-05, %v2802_v7 }
0x1e10   :  { %3620 = vrsqrt.f32 %v2804_v28  ;;  %vm2812_vm13 = vweird.f32 %v2804_v28 }
0x1e13   :  { %v2799_v29 = vpop.f32.mrf.mxu3 }
0x1e14   :  { %v2803_v19 = vmul.f32 0.03125, %v2799_v29 }
0x1e16   :  { %v3621_v21 = vpop.eup %3620  ;;  %v2805_v0 = vadd.f32 1e-05, %v2803_v19 }
0x1e17   :  { %v2807_v34 = vmul.f32 %v3621_v21, %v2804_v28  ;;  %vm2813_vm9 = vweird.f32 %v3621_v21 }
0x1e18   :  { %3622 = vrsqrt.f32 %v2805_v0  ;;  %vm2814_vm15 = vmor %vm2812_vm13, %vm2813_vm9  ;;  %vm2822_vm3 = vweird.f32 %v2805_v0 }
0x1e19   :  { %v2808_v23 = vmul.f32 %v3621_v21, %v2807_v34 }
0x1e1b   :  { %v2809_v24 = vmul.f32 0.5, %v2808_v23 }
0x1e1d   :  { %v2810_v57 = vsub.f32 1.5, %v2809_v24 }
0x1e1e   :  { %v3623_v16 = vpop.eup %3622 }
0x1e1f   :  { %v2817_v49 = vmul.f32 %v3623_v16, %v2805_v0  ;;  %v2811_v48 = vmul.f32 %v3621_v21, %v2810_v57  ;;  %vm2823_vm2 = vweird.f32 %v3623_v16 }
0x1e20   :  { %vm2824_vm4 = vmor %vm2822_vm3, %vm2823_vm2 }
0x1e21   :  { %v2818_v26 = vmul.f32 %v3623_v16, %v2817_v49  ;;  %v2815_v27 = vsel %vm2814_vm15, %v3621_v21, %v2811_v48 }
0x1e22   :  { %2828 = vperm.xlu2 %3454, %v2815_v27  }
0x1e23   :  { %v2819_v56 = vmul.f32 0.5, %v2818_v26 }
0x1e25   :  { %v2820_v39 = vsub.f32 1.5, %v2819_v56 }
0x1e27   :  { %v2821_v47 = vmul.f32 %v3623_v16, %v2820_v39 }
0x1e29   :  { %v2825_v43 = vsel %vm2824_vm4, %v3623_v16, %v2821_v47  ;;  %v3474_v47 = vld [vmem:[%s4743_s8 + $0xc] ss:$0 sm:$0xff] }
0x1e2a   :  { %2833 = vperm.xlu0 %3455, %v2825_v43  }
0x1e7c   :  { %v2829_v37 = vpop.permute.xlu2 %2828 }
0x1e7d   :  { %v2836_v41 = vmul.f32 %v2829_v37, %v2769_v2 }
0x1e7f   :  { %v2839_v13 = vmul.f32 %v3470_v20, %v2836_v41 }
0x1e81   :  { %v2842_v14 = vadd.f32 %v3471_v46, %v2839_v13 }
0x1e9c   :  { %v2834_v3 = vpop.permute.xlu0 %2833 }
0x1e9d   :  { %v2837_v32 = vmul.f32 %v2834_v3, %v2770_v60 }
0x1e9f   :  { %v2840_v45 = vmul.f32 %v3470_v20, %v2837_v32 }
0x1ea1   :  { %v2843_v12 = vadd.f32 %v3471_v46, %v2840_v45 }
0x1ea3   :  { %v2844_v42 = vpack.c.bf16 %v2843_v12, %v2842_v14 }
0x1ea5   :  { %3376 = vmatmul.msk.bf16.vlgmr.msrb.gmra.mxu0 %vm185_vm0, %v2844_v42 }
0x1f22   :  { %v2876_v9 = vpop.f32.mrf.mxu0 }
0x1f23   :  { %v2877_v63 = vadd.f32 %v3472_v10, %v2876_v9 }
0x1f25   :  { %v2881_v38 = vmax.f32 %v2877_v63, 0.0 }
0x1f2a   :  { %v2878_v35 = vpop.f32.mrf.mxu0 }
0x1f2b   :  { %v2879_v53 = vadd.f32 %v3472_v10, %v2878_v35 }
0x1f2d   :  { %v2882_v52 = vmax.f32 %v2879_v53, 0.0 }
0x1f2f   :  { %v2883_v17 = vpack.c.bf16 %v2882_v52, %v2881_v38 }
0x1f31   :  { %3401 = vmatmul.msk.bf16.vlgmr.msrb.gmra.mxu1 %vm1488_vm14, %v2883_v17 }
0x1fae   :  { %v2931_v33 = vpop.f32.mrf.mxu1 }
0x1faf   :  { %v2932_v58 = vadd.f32 %v3473_v54, %v2931_v33 }
0x1fb1   :  { %v2936_v8 = vadd.f32 %v2932_v58, %v2842_v14 }
0x1fb3   :  { %3404 = vmatmul.msk.f32.vlgmr.msra.gmra.mxu2 %vm185_vm0, %v2936_v8 }
0x1fb6   :  { %v2933_v22 = vpop.f32.mrf.mxu1 }
0x1fb7   :  { %v2934_v36 = vadd.f32 %v3473_v54, %v2933_v22 }
0x1fb9   :  { %v2937_v59 = vadd.f32 %v2934_v36, %v2843_v12 }
0x1fbb   :  { %3405 = vmatmul.msk.f32.gmra.mxu2 %vm185_vm0, %v2937_v59 }
0x2036   :  { %v2963_v5 = vpop.f32.mrf.mxu2 }
0x2037   :  { %v2969_v15 = vmul.f32 0.03125, %v2963_v5 }
0x2039   :  { %2973 = vperm.xlu1 %3453, %v2969_v15  }
0x203e   :  { %v2966_v11 = vpop.f32.mrf.mxu2 }
0x203f   :  { %v2970_v44 = vmul.f32 0.03125, %v2966_v11 }
0x2041   :  { %2978 = vperm.xlu2 %3454, %v2970_v44  }
0x209b   :  { %v2979_v2 = vpop.permute.xlu2 %2978 }
0x209c   :  { %v2982_v4 = vsub.f32 %v2937_v59, %v2979_v2 }
0x209e   :  { %v2984_v25 = vmul.f32 %v2982_v4, %v2982_v4 }
0x20ab   :  { %v2974_v61 = vpop.permute.xlu1 %2973 }
0x20ac   :  { %v2981_v62 = vsub.f32 %v2936_v8, %v2974_v61 }
0x20ae   :  { %v2983_v55 = vmul.f32 %v2981_v62, %v2981_v62 }
0x20b0   :  { %3406 = vmatmul.msk.f32.vlgmr.msra.gmra.mxu3 %vm185_vm0, %v2983_v55  ;;  %v3056_v55 = vld [vmem:[%s4744_s9] sm:$0x3] }
0x20b1   :  { %v3167_v2 = vperm.slane %v3056_v55, 0 }
0x20b8   :  { %3407 = vmatmul.msk.f32.gmra.mxu3 %vm185_vm0, %v2984_v25  ;;  %v3170_v25 = vperm.slane %v3056_v55, 1 }
0x2133   :  { %v3008_v60 = vpop.f32.mrf.mxu3 }
0x2134   :  { %v3014_v50 = vmul.f32 0.03125, %v3008_v60 }
0x2136   :  { %v3016_v1 = vadd.f32 1e-05, %v3014_v50 }
0x2138   :  { %3624 = vrsqrt.f32 %v3016_v1  ;;  %vm3024_vm5 = vweird.f32 %v3016_v1 }
0x213b   :  { %v3011_v7 = vpop.f32.mrf.mxu3 }
0x213c   :  { %v3015_v28 = vmul.f32 0.03125, %v3011_v7 }
0x213e   :  { %v3625_v29 = vpop.eup %3624  ;;  %v3017_v19 = vadd.f32 1e-05, %v3015_v28 }
0x213f   :  { %v3019_v21 = vmul.f32 %v3625_v29, %v3016_v1  ;;  %vm3025_vm14 = vweird.f32 %v3625_v29 }
0x2140   :  { %3626 = vrsqrt.f32 %v3017_v19  ;;  %vm3026_vm6 = vmor %vm3024_vm5, %vm3025_vm14  ;;  %vm3034_vm1 = vweird.f32 %v3017_v19 }
0x2141   :  { %v3020_v0 = vmul.f32 %v3625_v29, %v3019_v21 }
0x2143   :  { %v3021_v34 = vmul.f32 0.5, %v3020_v0 }
0x2145   :  { %v3022_v23 = vsub.f32 1.5, %v3021_v34 }
0x2146   :  { %v3627_v24 = vpop.eup %3626 }
0x2147   :  { %v3029_v57 = vmul.f32 %v3627_v24, %v3017_v19  ;;  %v3023_v16 = vmul.f32 %v3625_v29, %v3022_v23  ;;  %vm3035_vm7 = vweird.f32 %v3627_v24 }
0x2148   :  { %vm3036_vm8 = vmor %vm3034_vm1, %vm3035_vm7 }
0x2149   :  { %v3030_v49 = vmul.f32 %v3627_v24, %v3029_v57  ;;  %v3027_v48 = vsel %vm3026_vm6, %v3625_v29, %v3023_v16 }
0x214a   :  { %3040 = vperm.xlu0 %3455, %v3027_v48  }
0x214b   :  { %v3031_v26 = vmul.f32 0.5, %v3030_v49 }
0x214d   :  { %v3032_v27 = vsub.f32 1.5, %v3031_v26 }
0x214f   :  { %v3033_v56 = vmul.f32 %v3627_v24, %v3032_v27 }
0x2151   :  { %v3037_v39 = vsel %vm3036_vm8, %v3627_v24, %v3033_v56 }
0x2152   :  { %3045 = vperm.xlu1 %3453, %v3037_v39  }
0x21bc   :  { %v3041_v43 = vpop.permute.xlu0 %3040 }
0x21bd   :  { %v3048_v40 = vmul.f32 %v3041_v43, %v2981_v62 }
0x21bf   :  { %v3051_v37 = vmul.f32 %v3474_v47, %v3048_v40 }
0x21c1   :  { %v3054_v20 = vadd.f32 %v3475_v30, %v3051_v37 }
0x21c3   :  { %3408 = vmatmul.msk.f32.vlgmr.msra.gmra.mxu0 %vm185_vm0, %v3054_v20 }
0x21c4   :  { %v3046_v41 = vpop.permute.xlu1 %3045 }
0x21c5   :  { %v3049_v3 = vmul.f32 %v3046_v41, %v2982_v4 }
0x21c7   :  { %v3052_v46 = vmul.f32 %v3474_v47, %v3049_v3 }
0x21c9   :  { %v3055_v13 = vadd.f32 %v3475_v30, %v3052_v46 }
0x21cb   :  { %3409 = vmatmul.msk.f32.gmra.mxu0 %vm185_vm0, %v3055_v13 }
0x2240   :  { %v3080_v32 = vpop.f32.mrf.mxu0 }
0x2241   :  { %v3086_v45 = vmul.f32 0.03125, %v3080_v32 }
0x2243   :  { %3090 = vperm.xlu2 %3454, %v3086_v45  }
0x2248   :  { %v3083_v14 = vpop.f32.mrf.mxu0 }
0x2249   :  { %v3087_v12 = vmul.f32 0.03125, %v3083_v14 }
0x224b   :  { %3095 = vperm.xlu0 %3455, %v3087_v12  }
0x229d   :  { %v3091_v42 = vpop.permute.xlu2 %3090 }
0x229e   :  { %v3098_v18 = vsub.f32 %v3054_v20, %v3091_v42 }
0x22a0   :  { %v3100_v6 = vmul.f32 %v3098_v18, %v3098_v18 }
0x22a2   :  { %3410 = vmatmul.msk.f32.vlgmr.msra.gmra.mxu1 %vm185_vm0, %v3100_v6 }
0x22bd   :  { %v3096_v31 = vpop.permute.xlu0 %3095 }
0x22be   :  { %v3099_v51 = vsub.f32 %v3055_v13, %v3096_v31 }
0x22c0   :  { %v3101_v9 = vmul.f32 %v3099_v51, %v3099_v51 }
0x22c2   :  { %3411 = vmatmul.msk.f32.gmra.mxu1 %vm185_vm0, %v3101_v9 }
0x231f   :  { %v3125_v10 = vpop.f32.mrf.mxu1 }
0x2320   :  { %v3131_v63 = vmul.f32 0.03125, %v3125_v10 }
0x2322   :  { %v3133_v35 = vadd.f32 1e-05, %v3131_v63 }
0x2324   :  { %3628 = vrsqrt.f32 %v3133_v35  ;;  %vm3141_vm11 = vweird.f32 %v3133_v35 }
0x232a   :  { %v3629_v53 = vpop.eup %3628 }
0x232b   :  { %v3136_v38 = vmul.f32 %v3629_v53, %v3133_v35  ;;  %vm3142_vm10 = vweird.f32 %v3629_v53 }
0x232c   :  { %vm3143_vm12 = vmor %vm3141_vm11, %vm3142_vm10 }
0x232d   :  { %v3137_v52 = vmul.f32 %v3629_v53, %v3136_v38 }
0x232f   :  { %v3138_v17 = vmul.f32 0.5, %v3137_v52 }
0x2331   :  { %v3139_v54 = vsub.f32 1.5, %v3138_v17 }
0x2333   :  { %v3140_v33 = vmul.f32 %v3629_v53, %v3139_v54 }
0x2335   :  { %v3144_v58 = vsel %vm3143_vm12, %v3629_v53, %v3140_v33 }
0x2336   :  { %3157 = vperm.xlu1 %3453, %v3144_v58  }
0x233f   :  { %v3128_v8 = vpop.f32.mrf.mxu1 }
0x2340   :  { %v3132_v22 = vmul.f32 0.03125, %v3128_v8 }
0x2342   :  { %v3134_v36 = vadd.f32 1e-05, %v3132_v22 }
0x2344   :  { %3630 = vrsqrt.f32 %v3134_v36  ;;  %vm3151_vm13 = vweird.f32 %v3134_v36 }
0x234a   :  { %v3631_v59 = vpop.eup %3630 }
0x234b   :  { %v3146_v5 = vmul.f32 %v3631_v59, %v3134_v36  ;;  %vm3152_vm9 = vweird.f32 %v3631_v59 }
0x234c   :  { %vm3153_vm15 = vmor %vm3151_vm13, %vm3152_vm9 }
0x234d   :  { %v3147_v15 = vmul.f32 %v3631_v59, %v3146_v5 }
0x234f   :  { %v3148_v11 = vmul.f32 0.5, %v3147_v15 }
0x2351   :  { %v3149_v44 = vsub.f32 1.5, %v3148_v11 }
0x2353   :  { %v3150_v61 = vmul.f32 %v3631_v59, %v3149_v44 }
0x2355   :  { %v3154_v62 = vsel %vm3153_vm15, %v3631_v59, %v3150_v61 }
0x2356   :  { %3162 = vperm.xlu2 %3454, %v3154_v62  }
0x23a8   :  { %v3158_v4 = vpop.permute.xlu1 %3157 }
0x23a9   :  { %v3165_v60 = vmul.f32 %v3158_v4, %v3098_v18 }
0x23ab   :  { %v3168_v50 = vmul.f32 %v3167_v2, %v3165_v60 }
0x23ad   :  { %v3171_v1 = vadd.f32 %v3170_v25, %v3168_v50 }
0x23af   :  { %3173 = vst.msk [vmem:[#allocation11] sm:$0xff] %vm185_vm0, %v3171_v1 }
0x23b0   :  { %v3163_v7 = vpop.permute.xlu2 %3162 }
0x23b1   :  { %v3166_v28 = vmul.f32 %v3163_v7, %v3099_v51 }
0x23b3   :  { %v3169_v29 = vmul.f32 %v3167_v2, %v3166_v28 }
0x23b5   :  { %v3172_v19 = vadd.f32 %v3170_v25, %v3169_v29 }
0x23b7   :  { %3174 = vst.msk [vmem:[#allocation11 + $0x8] sm:$0xff] %vm185_vm0, %v3172_v19 }
0x23b8   :  { %3187 = dma.vmem_to_hbm [thread:$0]  %s3180_s2, 256, %s3182_s19, [#allocation4], %s3785_s21, %s3785_s21, %s3786_s22  }
0x23b9   :  { %3782 = dma.done.wait [#allocation4], 256  }
0x23ba   :  { %3783 = vsyncadd [#allocation4], 4294967040 }
0x23bb   :  { %3192 = vsyncpa [#allocation3], 1 }
0x23bc   :  { %3193 = vsyncpa [#allocation6], 1 }
0x23bd   :  { %3194 = vsyncpa [#allocation9], 1 }
0x23be   :  { %3195 = vsyncpa [#allocation4], 1 }

</bundles_post_ra>
